<compile_context>
chip_gen: v7x
topology: tpu7x:2x2x1
jax: 0.10.0
libtpu: 0.0.40
codegen_flags: <defaults>
</compile_context>

<pallas_src>
import math
import functools

import jax
import jax.numpy as jnp
from jax import lax
from jax.experimental import pallas as pl
from jax.experimental.pallas import tpu as pltpu


# ---------------------------------------------------------------------------
# small helpers
# ---------------------------------------------------------------------------

def _round_up(x, m):
    return ((x + m - 1) // m) * m


def _ln(x, g, b, eps):
    """LayerNorm over the last axis (f32 statistics)."""
    mu = jnp.mean(x, axis=-1, keepdims=True)
    xc = x - mu
    var = jnp.mean(xc * xc, axis=-1, keepdims=True)
    return xc * lax.rsqrt(var + eps) * g + b


def _row(v):
    return v.reshape(1, -1).astype(jnp.float32)


# ---------------------------------------------------------------------------
# generic row-tiled dense (+relu) — Conv2dSubsampling2 / proj / pos projection
# ---------------------------------------------------------------------------

def _dense_kernel(x_ref, w_ref, b_ref, o_ref, *, activation):
    y = jnp.dot(x_ref[...], w_ref[...],
                preferred_element_type=jnp.float32) + b_ref[...]
    if activation == "relu":
        y = jnp.maximum(y, 0.0)
    o_ref[...] = y


def dense(x, w, b, activation="none", tm=1024):
    """y = x @ w + b (optional relu).  Activation operand shipped as bf16."""
    M, K = x.shape
    N = w.shape[1]
    tm = min(tm, _round_up(M, 8))
    Mp = _round_up(M, tm)
    xb = x.astype(jnp.bfloat16)              # bf16 HBM operand (halves read BW)
    if Mp != M:
        xb = jnp.pad(xb, ((0, Mp - M), (0, 0)))
    out = pl.pallas_call(
        functools.partial(_dense_kernel, activation=activation),
        grid=(Mp // tm,),
        in_specs=[
            pl.BlockSpec((tm, K), lambda i: (i, 0)),
            pl.BlockSpec((K, N), lambda i: (0, 0)),   # weight resident
            pl.BlockSpec((1, N), lambda i: (0, 0)),
        ],
        out_specs=pl.BlockSpec((tm, N), lambda i: (i, 0)),
        out_shape=jax.ShapeDtypeStruct((Mp, N), jnp.float32),
        compiler_params=pltpu.CompilerParams(dimension_semantics=("parallel",)),
    )(xb, w.astype(jnp.bfloat16), _row(b))
    return out[:M]


def _ln_kernel(x_ref, g_ref, b_ref, o_ref, *, eps):
    o_ref[...] = _ln(x_ref[...], g_ref[...], b_ref[...], eps)


def layer_norm(x2d, gamma, beta, eps=1e-5, tm=1024):
    M, D = x2d.shape
    tm = min(tm, _round_up(M, 8))
    Mp = _round_up(M, tm)
    if Mp != M:
        x2d = jnp.pad(x2d, ((0, Mp - M), (0, 0)))
    out = pl.pallas_call(
        functools.partial(_ln_kernel, eps=eps),
        grid=(Mp // tm,),
        in_specs=[pl.BlockSpec((tm, D), lambda i: (i, 0)),
                  pl.BlockSpec((1, D), lambda i: (0, 0)),
                  pl.BlockSpec((1, D), lambda i: (0, 0))],
        out_specs=pl.BlockSpec((tm, D), lambda i: (i, 0)),
        out_shape=jax.ShapeDtypeStruct((Mp, D), jnp.float32),
        compiler_params=pltpu.CompilerParams(dimension_semantics=("parallel",)),
    )(x2d, _row(gamma), _row(beta))
    return out[:M]


# ---------------------------------------------------------------------------
# fully-fused conformer layer (macaron-FF + MHSA + conv module + FF + final LN)
# ---------------------------------------------------------------------------

# Row indices of the packed per-layer (N_VEC, D) vector operand.
(V_LN_FFM_G, V_LN_FFM_B, V_FFM_B2,
 V_LN_MHA_G, V_LN_MHA_B, V_POS_U, V_POS_V, V_BO,
 V_LN_CONV_G, V_LN_CONV_B, V_PW1_BA, V_PW1_BG, V_DW_SHIFT, V_PW2_B,
 V_LN_FF_G, V_LN_FF_B, V_FF_B2,
 V_LN_FINAL_G, V_LN_FINAL_B) = range(19)
N_VEC = 19


def _layer_kernel(x_ref, vec_ref, ffm_b1_ref, ffm_w1_ref, ffm_w2_ref,
                  wqkv_ref, bqkv_ref, p_ref, wo_ref,
                  pw1_wa_ref, pw1_wg_ref, dw_ref, pw2_w_ref,
                  ff_b1_ref, ff_w1_ref, ff_w2_ref,
                  o_ref, xp_ref, *, heads, K, eps):
    T, D = x_ref.shape
    dk = D // heads
    pad = (K - 1) // 2
    bf = jnp.bfloat16

    def vrow(i):                                   # one packed (1, D) vector row
        return vec_ref[i, :].reshape(1, D)

    x = x_ref[...]                                 # (T, D) f32 residual, stays in VMEM

    # ---- 1) macaron feed-forward (half-step residual) --------------------
    h = _ln(x, vrow(V_LN_FFM_G), vrow(V_LN_FFM_B), eps)
    h1 = jnp.dot(h.astype(bf), ffm_w1_ref[...],
                 preferred_element_type=jnp.float32) + ffm_b1_ref[...]
    h1 = h1 * jax.nn.sigmoid(h1)                   # SiLU (f32 elementwise)
    h2 = jnp.dot(h1.astype(bf), ffm_w2_ref[...],
                 preferred_element_type=jnp.float32) + vrow(V_FFM_B2)
    x = x + 0.5 * h2

    # ---- 2) relative-position MHSA (wenet no-rel-shift variant) ----------
    h = _ln(x, vrow(V_LN_MHA_G), vrow(V_LN_MHA_B), eps)
    qkv = jnp.dot(h.astype(bf), wqkv_ref[...],
                  preferred_element_type=jnp.float32) + bqkv_ref[...]
    q = qkv[:, :D]                                 # 1/sqrt(dk) pre-folded into Wq/bq/u/v
    qu = (q + vrow(V_POS_U)).astype(bf)
    qv = (q + vrow(V_POS_V)).astype(bf)
    kb = qkv[:, D:2 * D].astype(bf)
    vb = qkv[:, 2 * D:].astype(bf)
    pb = p_ref[...]                                # (T, D) bf16 positional projection
    contract = (((1,), (1,)), ((), ()))            # contract 2*dk, no transposes
    outs = []
    # TODO(synk): for long T switch to a KV-tiled online-softmax (flash) with a
    #             fori_loop over heads so (T, T) temporaries never coexist.
    for hh in range(heads):                        # static unroll (heads is small)
        sl = slice(hh * dk, (hh + 1) * dk)
        quv = jnp.concatenate([qu[:, sl], qv[:, sl]], axis=1)   # (T, 2*dk)
        kp = jnp.concatenate([kb[:, sl], pb[:, sl]], axis=1)    # (T, 2*dk)
        s = lax.dot_general(quv, kp, contract,
                            preferred_element_type=jnp.float32)  # merged ac + bd
        m = jnp.max(s, axis=-1, keepdims=True)
        e = jnp.exp(s - m)                         # f32 softmax
        attn = e * pl.reciprocal(jnp.sum(e, axis=-1, keepdims=True), approx=True)
        outs.append(jnp.dot(attn.astype(bf), vb[:, sl],
                            preferred_element_type=jnp.float32))
    att = jnp.concatenate(outs, axis=-1)           # (T, D) lane-dense
    y = jnp.dot(att.astype(bf), wo_ref[...],
                preferred_element_type=jnp.float32) + vrow(V_BO)
    x = x + y

    # ---- 3) convolution module --------------------------------------------
    h = _ln(x, vrow(V_LN_CONV_G), vrow(V_LN_CONV_B), eps)
    hb = h.astype(bf)
    a = jnp.dot(hb, pw1_wa_ref[...],
                preferred_element_type=jnp.float32) + vrow(V_PW1_BA)
    g = jnp.dot(hb, pw1_wg_ref[...],
                preferred_element_type=jnp.float32) + vrow(V_PW1_BG)
    glu = a * jax.nn.sigmoid(g)                    # GLU: value * sigmoid(gate)
    zpad = jnp.zeros((pad, D), jnp.float32)
    xp_ref[...] = jnp.concatenate([zpad, glu, zpad], axis=0)   # stage padded window
    dw = dw_ref[...]                               # (K, D) — BN scale folded in
    acc = xp_ref[pl.ds(0, T), :] * dw[0]
    for kk in range(1, K):                         # depthwise MAC, taps read from VMEM
        acc = acc + xp_ref[pl.ds(kk, T), :] * dw[kk]
    y = acc + vrow(V_DW_SHIFT)                     # conv bias + BN shift (eval)
    y = y * jax.nn.sigmoid(y)                      # swish
    y = jnp.dot(y.astype(bf), pw2_w_ref[...],
                preferred_element_type=jnp.float32) + vrow(V_PW2_B)
    x = x + y

    # ---- 4) feed-forward (half-step) + fused per-layer final LayerNorm ----
    h = _ln(x, vrow(V_LN_FF_G), vrow(V_LN_FF_B), eps)
    h1 = jnp.dot(h.astype(bf), ff_w1_ref[...],
                 preferred_element_type=jnp.float32) + ff_b1_ref[...]
    h1 = h1 * jax.nn.sigmoid(h1)
    h2 = jnp.dot(h1.astype(bf), ff_w2_ref[...],
                 preferred_element_type=jnp.float32) + vrow(V_FF_B2)
    x = x + 0.5 * h2
    o_ref[...] = _ln(x, vrow(V_LN_FINAL_G), vrow(V_LN_FINAL_B), eps)


def fused_conformer_layer(x, p, lw, *, heads, eps=1e-5):
    B, T, D = x.shape
    LU = lw['ffm_w1'].shape[1]
    K = lw['dw'].shape[0]
    return pl.pallas_call(
        functools.partial(_layer_kernel, heads=heads, K=K, eps=eps),
        grid=(B,),
        in_specs=[
            pl.BlockSpec((None, T, D), lambda bb: (bb, 0, 0)),   # x (batch squeezed)
            pl.BlockSpec((N_VEC, D), lambda bb: (0, 0)),         # packed vectors
            pl.BlockSpec((1, LU), lambda bb: (0, 0)),            # ffm_b1
            pl.BlockSpec((D, LU), lambda bb: (0, 0)),            # ffm_w1
            pl.BlockSpec((LU, D), lambda bb: (0, 0)),            # ffm_w2
            pl.BlockSpec((D, 3 * D), lambda bb: (0, 0)),         # wqkv (scaled q)
            pl.BlockSpec((1, 3 * D), lambda bb: (0, 0)),         # bqkv
            pl.BlockSpec((T, D), lambda bb: (0, 0)),             # p (shared, bf16)
            pl.BlockSpec((D, D), lambda bb: (0, 0)),             # wo
            pl.BlockSpec((D, D), lambda bb: (0, 0)),             # pw1_wa
            pl.BlockSpec((D, D), lambda bb: (0, 0)),             # pw1_wg
            pl.BlockSpec((K, D), lambda bb: (0, 0)),             # dw (BN folded)
            pl.BlockSpec((D, D), lambda bb: (0, 0)),             # pw2_w
            pl.BlockSpec((1, LU), lambda bb: (0, 0)),            # ff_b1
            pl.BlockSpec((D, LU), lambda bb: (0, 0)),            # ff_w1
            pl.BlockSpec((LU, D), lambda bb: (0, 0)),            # ff_w2
        ],
        out_specs=pl.BlockSpec((None, T, D), lambda bb: (bb, 0, 0)),
        out_shape=jax.ShapeDtypeStruct((B, T, D), jnp.float32),
        scratch_shapes=[pltpu.VMEM((T + K - 1, D), jnp.float32)],
        compiler_params=pltpu.CompilerParams(
            dimension_semantics=("parallel",),
            vmem_limit_bytes=48 * 1024 * 1024),     # explicit: portable to v7x 64 MiB
    )(x, lw['vecs'], lw['ffm_b1'], lw['ffm_w1'], lw['ffm_w2'],
      lw['wqkv'], lw['bqkv'], p, lw['wo'],
      lw['pw1_wa'], lw['pw1_wg'], lw['dw'], lw['pw2_w'],
      lw['ff_b1'], lw['ff_w1'], lw['ff_w2'])


def prepare_layer_weights(lp, heads):
    """Pack per-layer params: fold BN (eval) + 1/sqrt(dk), cast matmul weights bf16."""
    D = lp['wo'].shape[0]
    dk = D // heads
    s = 1.0 / math.sqrt(dk)
    # fold BatchNorm1d (eval, running stats) into the depthwise conv
    bn_scale = lp['bn_gamma'] * lax.rsqrt(lp['bn_var'] + 1e-5)
    dw_w = (lp['dw_w'] * bn_scale[None, :]).astype(jnp.float32)
    dw_shift = lp['dw_b'] * bn_scale + (lp['bn_beta'] - lp['bn_mean'] * bn_scale)
    # fold the attention score scale into the q projection and the pos biases
    wqkv = jnp.concatenate([lp['wqkv'][:, :D] * s, lp['wqkv'][:, D:]], axis=1)
    bqkv = jnp.concatenate([lp['bqkv'][:D] * s, lp['bqkv'][D:]])
    vecs = jnp.stack([
        lp['ln_ffm_g'], lp['ln_ffm_b'], lp['ffm_b2'],
        lp['ln_mha_g'], lp['ln_mha_b'],
        lp['pos_bias_u'].reshape(-1) * s, lp['pos_bias_v'].reshape(-1) * s,
        lp['bo'],
        lp['ln_conv_g'], lp['ln_conv_b'], lp['pw1_ba'], lp['pw1_bg'],
        dw_shift, lp['pw2_b'],
        lp['ln_ff_g'], lp['ln_ff_b'], lp['ff_b2'],
        lp['ln_final_g'], lp['ln_final_b'],
    ]).astype(jnp.float32)
    return dict(
        vecs=vecs,
        ffm_b1=_row(lp['ffm_b1']), ffm_w1=lp['ffm_w1'].astype(jnp.bfloat16),
        ffm_w2=lp['ffm_w2'].astype(jnp.bfloat16),
        wqkv=wqkv.astype(jnp.bfloat16), bqkv=_row(bqkv),
        wo=lp['wo'].astype(jnp.bfloat16),
        pw1_wa=lp['pw1_wa'].astype(jnp.bfloat16),
        pw1_wg=lp['pw1_wg'].astype(jnp.bfloat16),
        dw=dw_w, pw2_w=lp['pw2_w'].astype(jnp.bfloat16),
        ff_b1=_row(lp['ff_b1']), ff_w1=lp['ff_w1'].astype(jnp.bfloat16),
        ff_w2=lp['ff_w2'].astype(jnp.bfloat16),
    )


# ---------------------------------------------------------------------------
# JAX glue (im2col, positional encoding, orchestration, params)
# ---------------------------------------------------------------------------

def conv2d_nhwc(x, w, b, stride):
    """3x3 Conv2d + ReLU via bf16 im2col + row-tiled Pallas dense. x:(B,H,W,Cin)."""
    B, H, W, C = x.shape
    kh = kw = 3
    Ho = (H - kh) // stride + 1
    Wo = (W - kw) // stride + 1
    xb = x.astype(jnp.bfloat16)      # materialize patches in bf16 (halves HBM traffic)
    cols = []
    for i in range(kh):
        for j in range(kw):
            cols.append(xb[:, i:i + stride * (Ho - 1) + 1:stride,
                           j:j + stride * (Wo - 1) + 1:stride, :])
    patches = jnp.stack(cols, axis=3).reshape(B * Ho * Wo, kh * kw * C)
    out = dense(patches, w, b, activation="relu")
    # TODO(synk): fuse patch extraction into the dense kernel (9 shifted BlockSpec
    #             views) to remove the 9x im2col round trip through HBM entirely.
    return out.reshape(B, Ho, Wo, w.shape[1])


def sinusoid_pos_emb(T, d):
    pos = jnp.arange(T, dtype=jnp.float32)[:, None]
    div = jnp.exp(jnp.arange(0, d, 2, dtype=jnp.float32) * -(math.log(10000.0) / d))
    pe = jnp.zeros((T, d), jnp.float32)
    pe = pe.at[:, 0::2].set(jnp.sin(pos * div))
    pe = pe.at[:, 1::2].set(jnp.cos(pos * div))
    return pe


def conformer_forward(params, x, cfg):
    """Conformer.forward (use_ssl=False). x: (B, T, F) -> (B, T', d_model)."""
    assert x.ndim == 3, f"Input size error in Conformer. Need 3, but got {x.ndim}"
    B, T, F = x.shape
    d = cfg['d_model']
    heads = cfg['heads']
    nb = len(params['layers'])
    # lens == full length -> masks are all True everywhere -> masking is a no-op.

    # Conv2dSubsampling2
    h = x[:, :, :, None].astype(jnp.float32)                       # (B, T, F, 1)
    h = conv2d_nhwc(h, params['conv1_w'], params['conv1_b'], 2)
    h = conv2d_nhwc(h, params['conv2_w'], params['conv2_b'], 1)
    _, T2, F2, C = h.shape
    # torch: (B,C,T,F) -> transpose(1,2) -> view(B,T,C*F)
    h = jnp.transpose(h, (0, 1, 3, 2)).reshape(B * T2, C * F2)
    h = dense(h, params['proj_w'], params['proj_b']).reshape(B, T2, d)

    # RelPositionalEncoding (eval): scale by sqrt(d), pos_emb = pe[:T2]
    h = h * math.sqrt(d)
    pos_emb = sinusoid_pos_emb(T2, d)

    # Batched positional projections for all layers: one widened matmul.
    wp_all = jnp.concatenate([lp['wp'] for lp in params['layers']], axis=1)
    p_all = dense(pos_emb, wp_all, jnp.zeros((nb * d,), jnp.float32))
    p_all = p_all.astype(jnp.bfloat16)

    for li, lp in enumerate(params['layers']):
        lw = prepare_layer_weights(lp, heads)
        p = p_all[:, li * d:(li + 1) * d]
        h = fused_conformer_layer(h, p, lw, heads=heads)

    h2 = layer_norm(h.reshape(B * T2, d),
                    params['after_norm_g'], params['after_norm_b'])
    return h2.reshape(B, T2, d)


def init_params(key, cfg):
    d = cfg['d_model']; lu = cfg['linear_units']; H = cfg['heads']; dk = d // H
    K = cfg['cnn_kernel']; F = cfg['bin_size']; nb = cfg['num_blocks']
    F2 = (F - 1) // 2 - 2

    state = {'key': key}

    def rnd(shape, scale=0.05):
        state['key'], sub = jax.random.split(state['key'])
        return scale * jax.random.normal(sub, shape, jnp.float32)

    ones = lambda n: jnp.ones((n,), jnp.float32)
    zeros = lambda n: jnp.zeros((n,), jnp.float32)

    params = {
        'conv1_w': rnd((3 * 3 * 1, d), 0.2), 'conv1_b': rnd((d,), 0.05),
        'conv2_w': rnd((3 * 3 * d, d)), 'conv2_b': rnd((d,), 0.05),
        'proj_w': rnd((d * F2, d)), 'proj_b': rnd((d,), 0.05),
        'after_norm_g': ones(d), 'after_norm_b': zeros(d),
        'layers': [],
    }
    for _ in range(nb):
        lp = {
            'ln_ffm_g': ones(d), 'ln_ffm_b': zeros(d),
            'ffm_w1': rnd((d, lu)), 'ffm_b1': zeros(lu),
            'ffm_w2': rnd((lu, d)), 'ffm_b2': zeros(d),
            'ln_mha_g': ones(d), 'ln_mha_b': zeros(d),
            # q|k|v projections stacked into one fused weight
            'wqkv': rnd((d, 3 * d)), 'bqkv': zeros(3 * d),
            'wp': rnd((d, d)),
            'wo': rnd((d, d)), 'bo': zeros(d),
            'pos_bias_u': rnd((H, dk), 0.1),
            'pos_bias_v': rnd((H, dk), 0.1),
            'ln_conv_g': ones(d), 'ln_conv_b': zeros(d),
            # pointwise_conv1 (d -> 2d) stored as lane-aligned value/gate halves
            'pw1_wa': rnd((d, d)), 'pw1_ba': zeros(d),
            'pw1_wg': rnd((d, d)), 'pw1_bg': zeros(d),
            'dw_w': rnd((K, d), 0.1), 'dw_b': zeros(d),
            'bn_gamma': ones(d), 'bn_beta': zeros(d),
            'bn_mean': zeros(d), 'bn_var': ones(d),
            'pw2_w': rnd((d, d)), 'pw2_b': zeros(d),
            'ln_ff_g': ones(d), 'ln_ff_b': zeros(d),
            'ff_w1': rnd((d, lu)), 'ff_b1': zeros(lu),
            'ff_w2': rnd((lu, d)), 'ff_b2': zeros(d),
            'ln_final_g': ones(d), 'ln_final_b': zeros(d),
        }
        params['layers'].append(lp)
    return params


if __name__ == "__main__":
    # Small but module-consistent shapes: bin_size=16 (freq), seq T=16, batch=2,
    # d_model=128 (module default output_size -> lane-dense stores), 4 heads,
    # linear_units=256 (default), 2 blocks, depthwise kernel 15 (default).
    cfg = dict(bin_size=16, d_model=128, heads=4, linear_units=256,
               num_blocks=2, cnn_kernel=15)

    key = jax.random.PRNGKey(0)
    pkey, xkey = jax.random.split(key)
    params = init_params(pkey, cfg)

    B, T = 2, 16
    x = jax.random.normal(xkey, (B, T, cfg['bin_size']), jnp.float32)

    @jax.jit
    def fwd(p, xx):
        return conformer_forward(p, xx, cfg)

    out = jax.block_until_ready(fwd(params, x))

    T_sub = ((T - 3) // 2 + 1) - 2   # Conv2dSubsampling2 output length
    assert out.shape == (B, T_sub, cfg['d_model']), out.shape
    assert bool(jnp.all(jnp.isfinite(out)))
    print("KERNEL_OK")
</pallas_src>

<mosaic_0001>
module attributes {stable_mosaic.version = 11 : i64} {
  func.func @_dense_kernel(%arg0: i32, %arg1: memref<104x9xbf16, #tpu.memory_space<vmem>>, %arg2: memref<9x128xbf16, #tpu.memory_space<vmem>>, %arg3: memref<1x128xf32, #tpu.memory_space<vmem>>, %arg4: memref<104x128xf32, #tpu.memory_space<vmem>>) attributes {dimension_semantics = [#tpu.dimension_semantics<parallel>], iteration_bounds = array<i64: 1>, scalar_prefetch = 0 : i64, scratch_operands = 0 : i64, tpu.core_type = #tpu.core_type<tc>, window_params = [{transform_indices = @transform_0, window_bounds = array<i64: 104, 9>}, {pipeline_mode = #tpu.pipeline_mode<synchronous>, transform_indices = @transform_1, window_bounds = array<i64: 9, 128>}, {pipeline_mode = #tpu.pipeline_mode<synchronous>, transform_indices = @transform_2, window_bounds = array<i64: 1, 128>}, {transform_indices = @transform_3, window_bounds = array<i64: 104, 128>}]} {
    %c0 = arith.constant 0 : index
    %c0_0 = arith.constant 0 : index
    %0 = vector.load %arg1[%c0, %c0_0] : memref<104x9xbf16, #tpu.memory_space<vmem>>, vector<104x9xbf16>
    %c0_1 = arith.constant 0 : index
    %c0_2 = arith.constant 0 : index
    %1 = vector.load %arg2[%c0_1, %c0_2] : memref<9x128xbf16, #tpu.memory_space<vmem>>, vector<9x128xbf16>
    %cst = arith.constant dense<0.000000e+00> : vector<104x128xf32>
    %2 = tpu.matmul %0, %1, %cst {dimension_numbers = #tpu.dot_dimension_numbers<[1], [0], [0], [1], [0, 0, 1, 1], [], []>} : vector<104x9xbf16>, vector<9x128xbf16>, vector<104x128xf32> -> vector<104x128xf32>
    %c0_3 = arith.constant 0 : index
    %c0_4 = arith.constant 0 : index
    %3 = vector.load %arg3[%c0_3, %c0_4] : memref<1x128xf32, #tpu.memory_space<vmem>>, vector<1x128xf32>
    %4 = vector.broadcast %3 : vector<1x128xf32> to vector<104x128xf32>
    %5 = arith.addf %2, %4 : vector<104x128xf32>
    %cst_5 = arith.constant 0.000000e+00 : f32
    %6 = vector.broadcast %cst_5 : f32 to vector<104x128xf32>
    %7 = arith.maximumf %5, %6 : vector<104x128xf32>
    %c0_6 = arith.constant 0 : index
    %c0_7 = arith.constant 0 : index
    %8 = vector.load %arg4[%c0_6, %c0_7] : memref<104x128xf32, #tpu.memory_space<vmem>>, vector<104x128xf32>
    tpu.vector_store %arg4[%c0_6, %c0_7], %7 {strides = array<i32>} : memref<104x128xf32, #tpu.memory_space<vmem>>, vector<104x128xf32>,
    return
  }
  func.func @transform_0(%arg0: i32) -> (i32, i32) {
    %c0_i32 = arith.constant 0 : i32
    %c0_i32_0 = arith.constant 0 : i32
    return %arg0, %c0_i32 : i32, i32
  }
  func.func @transform_1(%arg0: i32) -> (i32, i32) {
    %c0_i32 = arith.constant 0 : i32
    %c0_i32_0 = arith.constant 0 : i32
    %c0_i32_1 = arith.constant 0 : i32
    return %c0_i32, %c0_i32_0 : i32, i32
  }
  func.func @transform_2(%arg0: i32) -> (i32, i32) {
    %c0_i32 = arith.constant 0 : i32
    %c0_i32_0 = arith.constant 0 : i32
    %c0_i32_1 = arith.constant 0 : i32
    return %c0_i32, %c0_i32_0 : i32, i32
  }
  func.func @transform_3(%arg0: i32) -> (i32, i32) {
    %c0_i32 = arith.constant 0 : i32
    %c0_i32_0 = arith.constant 0 : i32
    return %arg0, %c0_i32 : i32, i32
  }
}

module attributes {stable_mosaic.version = 11 : i64} {
  func.func @_dense_kernel(%arg0: i32, %arg1: memref<56x1152xbf16, #tpu.memory_space<vmem>>, %arg2: memref<1152x128xbf16, #tpu.memory_space<vmem>>, %arg3: memref<1x128xf32, #tpu.memory_space<vmem>>, %arg4: memref<56x128xf32, #tpu.memory_space<vmem>>) attributes {dimension_semantics = [#tpu.dimension_semantics<parallel>], iteration_bounds = array<i64: 1>, scalar_prefetch = 0 : i64, scratch_operands = 0 : i64, tpu.core_type = #tpu.core_type<tc>, window_params = [{transform_indices = @transform_0, window_bounds = array<i64: 56, 1152>}, {pipeline_mode = #tpu.pipeline_mode<synchronous>, transform_indices = @transform_1, window_bounds = array<i64: 1152, 128>}, {pipeline_mode = #tpu.pipeline_mode<synchronous>, transform_indices = @transform_2, window_bounds = array<i64: 1, 128>}, {transform_indices = @transform_3, window_bounds = array<i64: 56, 128>}]} {
    %c0 = arith.constant 0 : index
    %c0_0 = arith.constant 0 : index
    %0 = vector.load %arg1[%c0, %c0_0] : memref<56x1152xbf16, #tpu.memory_space<vmem>>, vector<56x1152xbf16>
    %c0_1 = arith.constant 0 : index
    %c0_2 = arith.constant 0 : index
    %1 = vector.load %arg2[%c0_1, %c0_2] : memref<1152x128xbf16, #tpu.memory_space<vmem>>, vector<1152x128xbf16>
    %cst = arith.constant dense<0.000000e+00> : vector<56x128xf32>
    %2 = tpu.matmul %0, %1, %cst {dimension_numbers = #tpu.dot_dimension_numbers<[1], [0], [0], [1], [0, 0, 1, 1], [], []>} : vector<56x1152xbf16>, vector<1152x128xbf16>, vector<56x128xf32> -> vector<56x128xf32>
    %c0_3 = arith.constant 0 : index
    %c0_4 = arith.constant 0 : index
    %3 = vector.load %arg3[%c0_3, %c0_4] : memref<1x128xf32, #tpu.memory_space<vmem>>, vector<1x128xf32>
    %4 = vector.broadcast %3 : vector<1x128xf32> to vector<56x128xf32>
    %5 = arith.addf %2, %4 : vector<56x128xf32>
    %cst_5 = arith.constant 0.000000e+00 : f32
    %6 = vector.broadcast %cst_5 : f32 to vector<56x128xf32>
    %7 = arith.maximumf %5, %6 : vector<56x128xf32>
    %c0_6 = arith.constant 0 : index
    %c0_7 = arith.constant 0 : index
    %8 = vector.load %arg4[%c0_6, %c0_7] : memref<56x128xf32, #tpu.memory_space<vmem>>, vector<56x128xf32>
    tpu.vector_store %arg4[%c0_6, %c0_7], %7 {strides = array<i32>} : memref<56x128xf32, #tpu.memory_space<vmem>>, vector<56x128xf32>,
    return
  }
  func.func @transform_0(%arg0: i32) -> (i32, i32) {
    %c0_i32 = arith.constant 0 : i32
    %c0_i32_0 = arith.constant 0 : i32
    return %arg0, %c0_i32 : i32, i32
  }
  func.func @transform_1(%arg0: i32) -> (i32, i32) {
    %c0_i32 = arith.constant 0 : i32
    %c0_i32_0 = arith.constant 0 : i32
    %c0_i32_1 = arith.constant 0 : i32
    return %c0_i32, %c0_i32_0 : i32, i32
  }
  func.func @transform_2(%arg0: i32) -> (i32, i32) {
    %c0_i32 = arith.constant 0 : i32
    %c0_i32_0 = arith.constant 0 : i32
    %c0_i32_1 = arith.constant 0 : i32
    return %c0_i32, %c0_i32_0 : i32, i32
  }
  func.func @transform_3(%arg0: i32) -> (i32, i32) {
    %c0_i32 = arith.constant 0 : i32
    %c0_i32_0 = arith.constant 0 : i32
    return %arg0, %c0_i32 : i32, i32
  }
}

module attributes {stable_mosaic.version = 11 : i64} {
  func.func @_dense_kernel(%arg0: i32, %arg1: memref<16x640xbf16, #tpu.memory_space<vmem>>, %arg2: memref<640x128xbf16, #tpu.memory_space<vmem>>, %arg3: memref<1x128xf32, #tpu.memory_space<vmem>>, %arg4: memref<16x128xf32, #tpu.memory_space<vmem>>) attributes {dimension_semantics = [#tpu.dimension_semantics<parallel>], iteration_bounds = array<i64: 1>, scalar_prefetch = 0 : i64, scratch_operands = 0 : i64, tpu.core_type = #tpu.core_type<tc>, window_params = [{transform_indices = @transform_0, window_bounds = array<i64: 16, 640>}, {pipeline_mode = #tpu.pipeline_mode<synchronous>, transform_indices = @transform_1, window_bounds = array<i64: 640, 128>}, {pipeline_mode = #tpu.pipeline_mode<synchronous>, transform_indices = @transform_2, window_bounds = array<i64: 1, 128>}, {transform_indices = @transform_3, window_bounds = array<i64: 16, 128>}]} {
    %c0 = arith.constant 0 : index
    %c0_0 = arith.constant 0 : index
    %0 = vector.load %arg1[%c0, %c0_0] : memref<16x640xbf16, #tpu.memory_space<vmem>>, vector<16x640xbf16>
    %c0_1 = arith.constant 0 : index
    %c0_2 = arith.constant 0 : index
    %1 = vector.load %arg2[%c0_1, %c0_2] : memref<640x128xbf16, #tpu.memory_space<vmem>>, vector<640x128xbf16>
    %cst = arith.constant dense<0.000000e+00> : vector<16x128xf32>
    %2 = tpu.matmul %0, %1, %cst {dimension_numbers = #tpu.dot_dimension_numbers<[1], [0], [0], [1], [0, 0, 1, 1], [], []>} : vector<16x640xbf16>, vector<640x128xbf16>, vector<16x128xf32> -> vector<16x128xf32>
    %c0_3 = arith.constant 0 : index
    %c0_4 = arith.constant 0 : index
    %3 = vector.load %arg3[%c0_3, %c0_4] : memref<1x128xf32, #tpu.memory_space<vmem>>, vector<1x128xf32>
    %4 = vector.broadcast %3 : vector<1x128xf32> to vector<16x128xf32>
    %5 = arith.addf %2, %4 : vector<16x128xf32>
    %c0_5 = arith.constant 0 : index
    %c0_6 = arith.constant 0 : index
    %6 = vector.load %arg4[%c0_5, %c0_6] : memref<16x128xf32, #tpu.memory_space<vmem>>, vector<16x128xf32>
    tpu.vector_store %arg4[%c0_5, %c0_6], %5 {strides = array<i32>} : memref<16x128xf32, #tpu.memory_space<vmem>>, vector<16x128xf32>,
    return
  }
  func.func @transform_0(%arg0: i32) -> (i32, i32) {
    %c0_i32 = arith.constant 0 : i32
    %c0_i32_0 = arith.constant 0 : i32
    return %arg0, %c0_i32 : i32, i32
  }
  func.func @transform_1(%arg0: i32) -> (i32, i32) {
    %c0_i32 = arith.constant 0 : i32
    %c0_i32_0 = arith.constant 0 : i32
    %c0_i32_1 = arith.constant 0 : i32
    return %c0_i32, %c0_i32_0 : i32, i32
  }
  func.func @transform_2(%arg0: i32) -> (i32, i32) {
    %c0_i32 = arith.constant 0 : i32
    %c0_i32_0 = arith.constant 0 : i32
    %c0_i32_1 = arith.constant 0 : i32
    return %c0_i32, %c0_i32_0 : i32, i32
  }
  func.func @transform_3(%arg0: i32) -> (i32, i32) {
    %c0_i32 = arith.constant 0 : i32
    %c0_i32_0 = arith.constant 0 : i32
    return %arg0, %c0_i32 : i32, i32
  }
}

module attributes {stable_mosaic.version = 11 : i64} {
  func.func @_dense_kernel(%arg0: i32, %arg1: memref<8x128xbf16, #tpu.memory_space<vmem>>, %arg2: memref<128x256xbf16, #tpu.memory_space<vmem>>, %arg3: memref<1x256xf32, #tpu.memory_space<vmem>>, %arg4: memref<8x256xf32, #tpu.memory_space<vmem>>) attributes {dimension_semantics = [#tpu.dimension_semantics<parallel>], iteration_bounds = array<i64: 1>, scalar_prefetch = 0 : i64, scratch_operands = 0 : i64, tpu.core_type = #tpu.core_type<tc>, window_params = [{transform_indices = @transform_0, window_bounds = array<i64: 8, 128>}, {pipeline_mode = #tpu.pipeline_mode<synchronous>, transform_indices = @transform_1, window_bounds = array<i64: 128, 256>}, {pipeline_mode = #tpu.pipeline_mode<synchronous>, transform_indices = @transform_2, window_bounds = array<i64: 1, 256>}, {transform_indices = @transform_3, window_bounds = array<i64: 8, 256>}]} {
    %c0 = arith.constant 0 : index
    %c0_0 = arith.constant 0 : index
    %0 = vector.load %arg1[%c0, %c0_0] : memref<8x128xbf16, #tpu.memory_space<vmem>>, vector<8x128xbf16>
    %c0_1 = arith.constant 0 : index
    %c0_2 = arith.constant 0 : index
    %1 = vector.load %arg2[%c0_1, %c0_2] : memref<128x256xbf16, #tpu.memory_space<vmem>>, vector<128x256xbf16>
    %cst = arith.constant dense<0.000000e+00> : vector<8x256xf32>
    %2 = tpu.matmul %0, %1, %cst {dimension_numbers = #tpu.dot_dimension_numbers<[1], [0], [0], [1], [0, 0, 1, 1], [], []>} : vector<8x128xbf16>, vector<128x256xbf16>, vector<8x256xf32> -> vector<8x256xf32>
    %c0_3 = arith.constant 0 : index
    %c0_4 = arith.constant 0 : index
    %3 = vector.load %arg3[%c0_3, %c0_4] : memref<1x256xf32, #tpu.memory_space<vmem>>, vector<1x256xf32>
    %4 = vector.broadcast %3 : vector<1x256xf32> to vector<8x256xf32>
    %5 = arith.addf %2, %4 : vector<8x256xf32>
    %c0_5 = arith.constant 0 : index
    %c0_6 = arith.constant 0 : index
    %6 = vector.load %arg4[%c0_5, %c0_6] : memref<8x256xf32, #tpu.memory_space<vmem>>, vector<8x256xf32>
    tpu.vector_store %arg4[%c0_5, %c0_6], %5 {strides = array<i32>} : memref<8x256xf32, #tpu.memory_space<vmem>>, vector<8x256xf32>,
    return
  }
  func.func @transform_0(%arg0: i32) -> (i32, i32) {
    %c0_i32 = arith.constant 0 : i32
    %c0_i32_0 = arith.constant 0 : i32
    return %arg0, %c0_i32 : i32, i32
  }
  func.func @transform_1(%arg0: i32) -> (i32, i32) {
    %c0_i32 = arith.constant 0 : i32
    %c0_i32_0 = arith.constant 0 : i32
    %c0_i32_1 = arith.constant 0 : i32
    return %c0_i32, %c0_i32_0 : i32, i32
  }
  func.func @transform_2(%arg0: i32) -> (i32, i32) {
    %c0_i32 = arith.constant 0 : i32
    %c0_i32_0 = arith.constant 0 : i32
    %c0_i32_1 = arith.constant 0 : i32
    return %c0_i32, %c0_i32_0 : i32, i32
  }
  func.func @transform_3(%arg0: i32) -> (i32, i32) {
    %c0_i32 = arith.constant 0 : i32
    %c0_i32_0 = arith.constant 0 : i32
    return %arg0, %c0_i32 : i32, i32
  }
}

module attributes {stable_mosaic.version = 11 : i64} {
  func.func @_ln_kernel(%arg0: i32, %arg1: memref<16x128xf32, #tpu.memory_space<vmem>>, %arg2: memref<1x128xf32, #tpu.memory_space<vmem>>, %arg3: memref<1x128xf32, #tpu.memory_space<vmem>>, %arg4: memref<16x128xf32, #tpu.memory_space<vmem>>) attributes {dimension_semantics = [#tpu.dimension_semantics<parallel>], iteration_bounds = array<i64: 1>, scalar_prefetch = 0 : i64, scratch_operands = 0 : i64, tpu.core_type = #tpu.core_type<tc>, window_params = [{transform_indices = @transform_0, window_bounds = array<i64: 16, 128>}, {pipeline_mode = #tpu.pipeline_mode<synchronous>, transform_indices = @transform_1, window_bounds = array<i64: 1, 128>}, {pipeline_mode = #tpu.pipeline_mode<synchronous>, transform_indices = @transform_2, window_bounds = array<i64: 1, 128>}, {transform_indices = @transform_3, window_bounds = array<i64: 16, 128>}]} {
    %c0 = arith.constant 0 : index
    %c0_0 = arith.constant 0 : index
    %0 = vector.load %arg1[%c0, %c0_0] : memref<16x128xf32, #tpu.memory_space<vmem>>, vector<16x128xf32>
    %c0_1 = arith.constant 0 : index
    %c0_2 = arith.constant 0 : index
    %1 = vector.load %arg2[%c0_1, %c0_2] : memref<1x128xf32, #tpu.memory_space<vmem>>, vector<1x128xf32>
    %c0_3 = arith.constant 0 : index
    %c0_4 = arith.constant 0 : index
    %2 = vector.load %arg3[%c0_3, %c0_4] : memref<1x128xf32, #tpu.memory_space<vmem>>, vector<1x128xf32>
    %cst = arith.constant dense<0.000000e+00> : vector<16xf32>
    %3 = vector.multi_reduction <add>, %0, %cst [1] : vector<16x128xf32> to vector<16xf32>
    %4 = vector.shape_cast %3 : vector<16xf32> to vector<16x1xf32>
    %cst_5 = arith.constant 1.280000e+02 : f32
    %5 = vector.broadcast %cst_5 : f32 to vector<16x1xf32>
    %6 = arith.divf %4, %5 : vector<16x1xf32>
    %7 = vector.broadcast %6 : vector<16x1xf32> to vector<16x128xf32>
    %8 = arith.subf %0, %7 : vector<16x128xf32>
    %9 = arith.mulf %8, %8 : vector<16x128xf32>
    %cst_6 = arith.constant dense<0.000000e+00> : vector<16xf32>
    %10 = vector.multi_reduction <add>, %9, %cst_6 [1] : vector<16x128xf32> to vector<16xf32>
    %11 = vector.shape_cast %10 : vector<16xf32> to vector<16x1xf32>
    %cst_7 = arith.constant 1.280000e+02 : f32
    %12 = vector.broadcast %cst_7 : f32 to vector<16x1xf32>
    %13 = arith.divf %11, %12 : vector<16x1xf32>
    %cst_8 = arith.constant 9.99999974E-6 : f32
    %14 = vector.broadcast %cst_8 : f32 to vector<16x1xf32>
    %15 = arith.addf %13, %14 : vector<16x1xf32>
    %16 = math.rsqrt %15 : vector<16x1xf32>
    %17 = vector.broadcast %16 : vector<16x1xf32> to vector<16x128xf32>
    %18 = arith.mulf %8, %17 : vector<16x128xf32>
    %19 = vector.broadcast %1 : vector<1x128xf32> to vector<16x128xf32>
    %20 = arith.mulf %18, %19 : vector<16x128xf32>
    %21 = vector.broadcast %2 : vector<1x128xf32> to vector<16x128xf32>
    %22 = arith.addf %20, %21 : vector<16x128xf32>
    %c0_9 = arith.constant 0 : index
    %c0_10 = arith.constant 0 : index
    %23 = vector.load %arg4[%c0_9, %c0_10] : memref<16x128xf32, #tpu.memory_space<vmem>>, vector<16x128xf32>
    tpu.vector_store %arg4[%c0_9, %c0_10], %22 {strides = array<i32>} : memref<16x128xf32, #tpu.memory_space<vmem>>, vector<16x128xf32>,
    return
  }
  func.func @transform_0(%arg0: i32) -> (i32, i32) {
    %c0_i32 = arith.constant 0 : i32
    %c0_i32_0 = arith.constant 0 : i32
    return %arg0, %c0_i32 : i32, i32
  }
  func.func @transform_1(%arg0: i32) -> (i32, i32) {
    %c0_i32 = arith.constant 0 : i32
    %c0_i32_0 = arith.constant 0 : i32
    %c0_i32_1 = arith.constant 0 : i32
    return %c0_i32, %c0_i32_0 : i32, i32
  }
  func.func @transform_2(%arg0: i32) -> (i32, i32) {
    %c0_i32 = arith.constant 0 : i32
    %c0_i32_0 = arith.constant 0 : i32
    %c0_i32_1 = arith.constant 0 : i32
    return %c0_i32, %c0_i32_0 : i32, i32
  }
  func.func @transform_3(%arg0: i32) -> (i32, i32) {
    %c0_i32 = arith.constant 0 : i32
    %c0_i32_0 = arith.constant 0 : i32
    return %arg0, %c0_i32 : i32, i32
  }
}

module attributes {stable_mosaic.version = 11 : i64} {
  func.func @_layer_kernel(%arg0: i32, %arg1: memref<1x5x128xf32, #tpu.memory_space<vmem>>, %arg2: memref<19x128xf32, #tpu.memory_space<vmem>>, %arg3: memref<1x256xf32, #tpu.memory_space<vmem>>, %arg4: memref<128x256xbf16, #tpu.memory_space<vmem>>, %arg5: memref<256x128xbf16, #tpu.memory_space<vmem>>, %arg6: memref<128x384xbf16, #tpu.memory_space<vmem>>, %arg7: memref<1x384xf32, #tpu.memory_space<vmem>>, %arg8: memref<5x128xbf16, #tpu.memory_space<vmem>>, %arg9: memref<128x128xbf16, #tpu.memory_space<vmem>>, %arg10: memref<128x128xbf16, #tpu.memory_space<vmem>>, %arg11: memref<128x128xbf16, #tpu.memory_space<vmem>>, %arg12: memref<15x128xf32, #tpu.memory_space<vmem>>, %arg13: memref<128x128xbf16, #tpu.memory_space<vmem>>, %arg14: memref<1x256xf32, #tpu.memory_space<vmem>>, %arg15: memref<128x256xbf16, #tpu.memory_space<vmem>>, %arg16: memref<256x128xbf16, #tpu.memory_space<vmem>>, %arg17: memref<1x5x128xf32, #tpu.memory_space<vmem>>, %arg18: memref<19x128xf32, #tpu.memory_space<vmem>>) attributes {dimension_semantics = [#tpu.dimension_semantics<parallel>], iteration_bounds = array<i64: 2>, scalar_prefetch = 0 : i64, scratch_operands = 1 : i64, tpu.core_type = #tpu.core_type<tc>, window_params = [{transform_indices = @transform_0, window_bounds = array<i64: 1, 5, 128>}, {pipeline_mode = #tpu.pipeline_mode<synchronous>, transform_indices = @transform_1, window_bounds = array<i64: 19, 128>}, {pipeline_mode = #tpu.pipeline_mode<synchronous>, transform_indices = @transform_2, window_bounds = array<i64: 1, 256>}, {pipeline_mode = #tpu.pipeline_mode<synchronous>, transform_indices = @transform_3, window_bounds = array<i64: 128, 256>}, {pipeline_mode = #tpu.pipeline_mode<synchronous>, transform_indices = @transform_4, window_bounds = array<i64: 256, 128>}, {pipeline_mode = #tpu.pipeline_mode<synchronous>, transform_indices = @transform_5, window_bounds = array<i64: 128, 384>}, {pipeline_mode = #tpu.pipeline_mode<synchronous>, transform_indices = @transform_6, window_bounds = array<i64: 1, 384>}, {pipeline_mode = #tpu.pipeline_mode<synchronous>, transform_indices = @transform_7, window_bounds = array<i64: 5, 128>}, {pipeline_mode = #tpu.pipeline_mode<synchronous>, transform_indices = @transform_8, window_bounds = array<i64: 128, 128>}, {pipeline_mode = #tpu.pipeline_mode<synchronous>, transform_indices = @transform_9, window_bounds = array<i64: 128, 128>}, {pipeline_mode = #tpu.pipeline_mode<synchronous>, transform_indices = @transform_10, window_bounds = array<i64: 128, 128>}, {pipeline_mode = #tpu.pipeline_mode<synchronous>, transform_indices = @transform_11, window_bounds = array<i64: 15, 128>}, {pipeline_mode = #tpu.pipeline_mode<synchronous>, transform_indices = @transform_12, window_bounds = array<i64: 128, 128>}, {pipeline_mode = #tpu.pipeline_mode<synchronous>, transform_indices = @transform_13, window_bounds = array<i64: 1, 256>}, {pipeline_mode = #tpu.pipeline_mode<synchronous>, transform_indices = @transform_14, window_bounds = array<i64: 128, 256>}, {pipeline_mode = #tpu.pipeline_mode<synchronous>, transform_indices = @transform_15, window_bounds = array<i64: 256, 128>}, {transform_indices = @transform_16, window_bounds = array<i64: 1, 5, 128>}]} {
    %c0 = arith.constant 0 : index
    %c0_0 = arith.constant 0 : index
    %c0_1 = arith.constant 0 : index
    %0 = vector.load %arg1[%c0, %c0_0, %c0_1] : memref<1x5x128xf32, #tpu.memory_space<vmem>>, vector<1x5x128xf32>
    %1 = vector.shape_cast %0 : vector<1x5x128xf32> to vector<5x128xf32>
    %c0_2 = arith.constant 0 : index
    %c0_3 = arith.constant 0 : index
    %2 = vector.load %arg2[%c0_2, %c0_3] : memref<19x128xf32, #tpu.memory_space<vmem>>, vector<1x128xf32>
    %3 = vector.shape_cast %2 : vector<1x128xf32> to vector<128xf32>
    %4 = vector.shape_cast %3 : vector<128xf32> to vector<1x128xf32>
    %c1 = arith.constant 1 : index
    %c0_4 = arith.constant 0 : index
    %5 = vector.load %arg2[%c1, %c0_4] : memref<19x128xf32, #tpu.memory_space<vmem>>, vector<1x128xf32>
    %6 = vector.shape_cast %5 : vector<1x128xf32> to vector<128xf32>
    %7 = vector.shape_cast %6 : vector<128xf32> to vector<1x128xf32>
    %cst = arith.constant dense<0.000000e+00> : vector<5xf32>
    %8 = vector.multi_reduction <add>, %1, %cst [1] : vector<5x128xf32> to vector<5xf32>
    %9 = vector.shape_cast %8 : vector<5xf32> to vector<5x1xf32>
    %cst_5 = arith.constant 1.280000e+02 : f32
    %10 = vector.broadcast %cst_5 : f32 to vector<5x1xf32>
    %11 = arith.divf %9, %10 : vector<5x1xf32>
    %12 = vector.broadcast %11 : vector<5x1xf32> to vector<5x128xf32>
    %13 = arith.subf %1, %12 : vector<5x128xf32>
    %14 = arith.mulf %13, %13 : vector<5x128xf32>
    %cst_6 = arith.constant dense<0.000000e+00> : vector<5xf32>
    %15 = vector.multi_reduction <add>, %14, %cst_6 [1] : vector<5x128xf32> to vector<5xf32>
    %16 = vector.shape_cast %15 : vector<5xf32> to vector<5x1xf32>
    %cst_7 = arith.constant 1.280000e+02 : f32
    %17 = vector.broadcast %cst_7 : f32 to vector<5x1xf32>
    %18 = arith.divf %16, %17 : vector<5x1xf32>
    %cst_8 = arith.constant 9.99999974E-6 : f32
    %19 = vector.broadcast %cst_8 : f32 to vector<5x1xf32>
    %20 = arith.addf %18, %19 : vector<5x1xf32>
    %21 = math.rsqrt %20 : vector<5x1xf32>
    %22 = vector.broadcast %21 : vector<5x1xf32> to vector<5x128xf32>
    %23 = arith.mulf %13, %22 : vector<5x128xf32>
    %24 = vector.broadcast %4 : vector<1x128xf32> to vector<5x128xf32>
    %25 = arith.mulf %23, %24 : vector<5x128xf32>
    %26 = vector.broadcast %7 : vector<1x128xf32> to vector<5x128xf32>
    %27 = arith.addf %25, %26 : vector<5x128xf32>
    %28 = arith.truncf %27 : vector<5x128xf32> to vector<5x128xbf16>
    %c0_9 = arith.constant 0 : index
    %c0_10 = arith.constant 0 : index
    %29 = vector.load %arg4[%c0_9, %c0_10] : memref<128x256xbf16, #tpu.memory_space<vmem>>, vector<128x256xbf16>
    %cst_11 = arith.constant dense<0.000000e+00> : vector<5x256xf32>
    %30 = tpu.matmul %28, %29, %cst_11 {dimension_numbers = #tpu.dot_dimension_numbers<[1], [0], [0], [1], [0, 0, 1, 1], [], []>} : vector<5x128xbf16>, vector<128x256xbf16>, vector<5x256xf32> -> vector<5x256xf32>
    %c0_12 = arith.constant 0 : index
    %c0_13 = arith.constant 0 : index
    %31 = vector.load %arg3[%c0_12, %c0_13] : memref<1x256xf32, #tpu.memory_space<vmem>>, vector<1x256xf32>
    %32 = vector.broadcast %31 : vector<1x256xf32> to vector<5x256xf32>
    %33 = arith.addf %30, %32 : vector<5x256xf32>
    %34 = arith.negf %33 : vector<5x256xf32>
    %35 = math.exp %34 : vector<5x256xf32>
    %cst_14 = arith.constant 1.000000e+00 : f32
    %36 = vector.broadcast %cst_14 : f32 to vector<5x256xf32>
    %37 = arith.addf %36, %35 : vector<5x256xf32>
    %38 = arith.divf %36, %37 : vector<5x256xf32>
    %39 = arith.mulf %33, %38 : vector<5x256xf32>
    %40 = arith.truncf %39 : vector<5x256xf32> to vector<5x256xbf16>
    %c0_15 = arith.constant 0 : index
    %c0_16 = arith.constant 0 : index
    %41 = vector.load %arg5[%c0_15, %c0_16] : memref<256x128xbf16, #tpu.memory_space<vmem>>, vector<256x128xbf16>
    %cst_17 = arith.constant dense<0.000000e+00> : vector<5x128xf32>
    %42 = tpu.matmul %40, %41, %cst_17 {dimension_numbers = #tpu.dot_dimension_numbers<[1], [0], [0], [1], [0, 0, 1, 1], [], []>} : vector<5x256xbf16>, vector<256x128xbf16>, vector<5x128xf32> -> vector<5x128xf32>
    %c2 = arith.constant 2 : index
    %c0_18 = arith.constant 0 : index
    %43 = vector.load %arg2[%c2, %c0_18] : memref<19x128xf32, #tpu.memory_space<vmem>>, vector<1x128xf32>
    %44 = vector.shape_cast %43 : vector<1x128xf32> to vector<128xf32>
    %45 = vector.shape_cast %44 : vector<128xf32> to vector<1x128xf32>
    %46 = vector.broadcast %45 : vector<1x128xf32> to vector<5x128xf32>
    %47 = arith.addf %42, %46 : vector<5x128xf32>
    %cst_19 = arith.constant 5.000000e-01 : f32
    %48 = vector.broadcast %cst_19 : f32 to vector<5x128xf32>
    %49 = arith.mulf %48, %47 : vector<5x128xf32>
    %50 = arith.addf %1, %49 : vector<5x128xf32>
    %c3 = arith.constant 3 : index
    %c0_20 = arith.constant 0 : index
    %51 = vector.load %arg2[%c3, %c0_20] : memref<19x128xf32, #tpu.memory_space<vmem>>, vector<1x128xf32>
    %52 = vector.shape_cast %51 : vector<1x128xf32> to vector<128xf32>
    %53 = vector.shape_cast %52 : vector<128xf32> to vector<1x128xf32>
    %c4 = arith.constant 4 : index
    %c0_21 = arith.constant 0 : index
    %54 = vector.load %arg2[%c4, %c0_21] : memref<19x128xf32, #tpu.memory_space<vmem>>, vector<1x128xf32>
    %55 = vector.shape_cast %54 : vector<1x128xf32> to vector<128xf32>
    %56 = vector.shape_cast %55 : vector<128xf32> to vector<1x128xf32>
    %cst_22 = arith.constant dense<0.000000e+00> : vector<5xf32>
    %57 = vector.multi_reduction <add>, %50, %cst_22 [1] : vector<5x128xf32> to vector<5xf32>
    %58 = vector.shape_cast %57 : vector<5xf32> to vector<5x1xf32>
    %cst_23 = arith.constant 1.280000e+02 : f32
    %59 = vector.broadcast %cst_23 : f32 to vector<5x1xf32>
    %60 = arith.divf %58, %59 : vector<5x1xf32>
    %61 = vector.broadcast %60 : vector<5x1xf32> to vector<5x128xf32>
    %62 = arith.subf %50, %61 : vector<5x128xf32>
    %63 = arith.mulf %62, %62 : vector<5x128xf32>
    %cst_24 = arith.constant dense<0.000000e+00> : vector<5xf32>
    %64 = vector.multi_reduction <add>, %63, %cst_24 [1] : vector<5x128xf32> to vector<5xf32>
    %65 = vector.shape_cast %64 : vector<5xf32> to vector<5x1xf32>
    %cst_25 = arith.constant 1.280000e+02 : f32
    %66 = vector.broadcast %cst_25 : f32 to vector<5x1xf32>
    %67 = arith.divf %65, %66 : vector<5x1xf32>
    %cst_26 = arith.constant 9.99999974E-6 : f32
    %68 = vector.broadcast %cst_26 : f32 to vector<5x1xf32>
    %69 = arith.addf %67, %68 : vector<5x1xf32>
    %70 = math.rsqrt %69 : vector<5x1xf32>
    %71 = vector.broadcast %70 : vector<5x1xf32> to vector<5x128xf32>
    %72 = arith.mulf %62, %71 : vector<5x128xf32>
    %73 = vector.broadcast %53 : vector<1x128xf32> to vector<5x128xf32>
    %74 = arith.mulf %72, %73 : vector<5x128xf32>
    %75 = vector.broadcast %56 : vector<1x128xf32> to vector<5x128xf32>
    %76 = arith.addf %74, %75 : vector<5x128xf32>
    %77 = arith.truncf %76 : vector<5x128xf32> to vector<5x128xbf16>
    %c0_27 = arith.constant 0 : index
    %c0_28 = arith.constant 0 : index
    %78 = vector.load %arg6[%c0_27, %c0_28] : memref<128x384xbf16, #tpu.memory_space<vmem>>, vector<128x384xbf16>
    %cst_29 = arith.constant dense<0.000000e+00> : vector<5x384xf32>
    %79 = tpu.matmul %77, %78, %cst_29 {dimension_numbers = #tpu.dot_dimension_numbers<[1], [0], [0], [1], [0, 0, 1, 1], [], []>} : vector<5x128xbf16>, vector<128x384xbf16>, vector<5x384xf32> -> vector<5x384xf32>
    %c0_30 = arith.constant 0 : index
    %c0_31 = arith.constant 0 : index
    %80 = vector.load %arg7[%c0_30, %c0_31] : memref<1x384xf32, #tpu.memory_space<vmem>>, vector<1x384xf32>
    %81 = vector.broadcast %80 : vector<1x384xf32> to vector<5x384xf32>
    %82 = arith.addf %79, %81 : vector<5x384xf32>
    %83 = vector.extract_strided_slice %82 {offsets = [0, 0], sizes = [5, 128], strides = [1, 1]} : vector<5x384xf32> to vector<5x128xf32>
    %c5 = arith.constant 5 : index
    %c0_32 = arith.constant 0 : index
    %84 = vector.load %arg2[%c5, %c0_32] : memref<19x128xf32, #tpu.memory_space<vmem>>, vector<1x128xf32>
    %85 = vector.shape_cast %84 : vector<1x128xf32> to vector<128xf32>
    %86 = vector.shape_cast %85 : vector<128xf32> to vector<1x128xf32>
    %87 = vector.broadcast %86 : vector<1x128xf32> to vector<5x128xf32>
    %88 = arith.addf %83, %87 : vector<5x128xf32>
    %89 = arith.truncf %88 : vector<5x128xf32> to vector<5x128xbf16>
    %c6 = arith.constant 6 : index
    %c0_33 = arith.constant 0 : index
    %90 = vector.load %arg2[%c6, %c0_33] : memref<19x128xf32, #tpu.memory_space<vmem>>, vector<1x128xf32>
    %91 = vector.shape_cast %90 : vector<1x128xf32> to vector<128xf32>
    %92 = vector.shape_cast %91 : vector<128xf32> to vector<1x128xf32>
    %93 = vector.broadcast %92 : vector<1x128xf32> to vector<5x128xf32>
    %94 = arith.addf %83, %93 : vector<5x128xf32>
    %95 = arith.truncf %94 : vector<5x128xf32> to vector<5x128xbf16>
    %96 = vector.extract_strided_slice %82 {offsets = [0, 128], sizes = [5, 128], strides = [1, 1]} : vector<5x384xf32> to vector<5x128xf32>
    %97 = arith.truncf %96 : vector<5x128xf32> to vector<5x128xbf16>
    %98 = vector.extract_strided_slice %82 {offsets = [0, 256], sizes = [5, 128], strides = [1, 1]} : vector<5x384xf32> to vector<5x128xf32>
    %99 = arith.truncf %98 : vector<5x128xf32> to vector<5x128xbf16>
    %c0_34 = arith.constant 0 : index
    %c0_35 = arith.constant 0 : index
    %100 = vector.load %arg8[%c0_34, %c0_35] : memref<5x128xbf16, #tpu.memory_space<vmem>>, vector<5x128xbf16>
    %101 = vector.extract_strided_slice %89 {offsets = [0, 0], sizes = [5, 32], strides = [1, 1]} : vector<5x128xbf16> to vector<5x32xbf16>
    %102 = vector.extract_strided_slice %95 {offsets = [0, 0], sizes = [5, 32], strides = [1, 1]} : vector<5x128xbf16> to vector<5x32xbf16>
    %103 = tpu.concatenate %101, %102 in 1 : vector<5x32xbf16>, vector<5x32xbf16> -> vector<5x64xbf16>
    %104 = vector.extract_strided_slice %97 {offsets = [0, 0], sizes = [5, 32], strides = [1, 1]} : vector<5x128xbf16> to vector<5x32xbf16>
    %105 = vector.extract_strided_slice %100 {offsets = [0, 0], sizes = [5, 32], strides = [1, 1]} : vector<5x128xbf16> to vector<5x32xbf16>
    %106 = tpu.concatenate %104, %105 in 1 : vector<5x32xbf16>, vector<5x32xbf16> -> vector<5x64xbf16>
    %cst_36 = arith.constant dense<0.000000e+00> : vector<5x5xf32>
    %107 = tpu.matmul %103, %106, %cst_36 {dimension_numbers = #tpu.dot_dimension_numbers<[1], [1], [0], [0], [0, 0, 1, 0], [], []>} : vector<5x64xbf16>, vector<5x64xbf16>, vector<5x5xf32> -> vector<5x5xf32>
    %cst_37 = arith.constant dense<0xFF800000> : vector<5xf32>
    %108 = vector.multi_reduction <maximumf>, %107, %cst_37 [1] : vector<5x5xf32> to vector<5xf32>
    %109 = vector.shape_cast %108 : vector<5xf32> to vector<5x1xf32>
    %110 = vector.broadcast %109 : vector<5x1xf32> to vector<5x5xf32>
    %111 = arith.subf %107, %110 : vector<5x5xf32>
    %112 = math.exp %111 : vector<5x5xf32>
    %cst_38 = arith.constant dense<0.000000e+00> : vector<5xf32>
    %113 = vector.multi_reduction <add>, %112, %cst_38 [1] : vector<5x5xf32> to vector<5xf32>
    %114 = vector.shape_cast %113 : vector<5xf32> to vector<5x1xf32>
    %115 = tpu.reciprocal %114 {approx = true} : vector<5x1xf32> -> vector<5x1xf32>
    %116 = vector.broadcast %115 : vector<5x1xf32> to vector<5x5xf32>
    %117 = arith.mulf %112, %116 : vector<5x5xf32>
    %118 = arith.truncf %117 : vector<5x5xf32> to vector<5x5xbf16>
    %119 = vector.extract_strided_slice %99 {offsets = [0, 0], sizes = [5, 32], strides = [1, 1]} : vector<5x128xbf16> to vector<5x32xbf16>
    %cst_39 = arith.constant dense<0.000000e+00> : vector<5x32xf32>
    %120 = tpu.matmul %118, %119, %cst_39 {dimension_numbers = #tpu.dot_dimension_numbers<[1], [0], [0], [1], [0, 0, 1, 1], [], []>} : vector<5x5xbf16>, vector<5x32xbf16>, vector<5x32xf32> -> vector<5x32xf32>
    %121 = vector.extract_strided_slice %89 {offsets = [0, 32], sizes = [5, 32], strides = [1, 1]} : vector<5x128xbf16> to vector<5x32xbf16>
    %122 = vector.extract_strided_slice %95 {offsets = [0, 32], sizes = [5, 32], strides = [1, 1]} : vector<5x128xbf16> to vector<5x32xbf16>
    %123 = tpu.concatenate %121, %122 in 1 : vector<5x32xbf16>, vector<5x32xbf16> -> vector<5x64xbf16>
    %124 = vector.extract_strided_slice %97 {offsets = [0, 32], sizes = [5, 32], strides = [1, 1]} : vector<5x128xbf16> to vector<5x32xbf16>
    %125 = vector.extract_strided_slice %100 {offsets = [0, 32], sizes = [5, 32], strides = [1, 1]} : vector<5x128xbf16> to vector<5x32xbf16>
    %126 = tpu.concatenate %124, %125 in 1 : vector<5x32xbf16>, vector<5x32xbf16> -> vector<5x64xbf16>
    %cst_40 = arith.constant dense<0.000000e+00> : vector<5x5xf32>
    %127 = tpu.matmul %123, %126, %cst_40 {dimension_numbers = #tpu.dot_dimension_numbers<[1], [1], [0], [0], [0, 0, 1, 0], [], []>} : vector<5x64xbf16>, vector<5x64xbf16>, vector<5x5xf32> -> vector<5x5xf32>
    %cst_41 = arith.constant dense<0xFF800000> : vector<5xf32>
    %128 = vector.multi_reduction <maximumf>, %127, %cst_41 [1] : vector<5x5xf32> to vector<5xf32>
    %129 = vector.shape_cast %128 : vector<5xf32> to vector<5x1xf32>
    %130 = vector.broadcast %129 : vector<5x1xf32> to vector<5x5xf32>
    %131 = arith.subf %127, %130 : vector<5x5xf32>
    %132 = math.exp %131 : vector<5x5xf32>
    %cst_42 = arith.constant dense<0.000000e+00> : vector<5xf32>
    %133 = vector.multi_reduction <add>, %132, %cst_42 [1] : vector<5x5xf32> to vector<5xf32>
    %134 = vector.shape_cast %133 : vector<5xf32> to vector<5x1xf32>
    %135 = tpu.reciprocal %134 {approx = true} : vector<5x1xf32> -> vector<5x1xf32>
    %136 = vector.broadcast %135 : vector<5x1xf32> to vector<5x5xf32>
    %137 = arith.mulf %132, %136 : vector<5x5xf32>
    %138 = arith.truncf %137 : vector<5x5xf32> to vector<5x5xbf16>
    %139 = vector.extract_strided_slice %99 {offsets = [0, 32], sizes = [5, 32], strides = [1, 1]} : vector<5x128xbf16> to vector<5x32xbf16>
    %cst_43 = arith.constant dense<0.000000e+00> : vector<5x32xf32>
    %140 = tpu.matmul %138, %139, %cst_43 {dimension_numbers = #tpu.dot_dimension_numbers<[1], [0], [0], [1], [0, 0, 1, 1], [], []>} : vector<5x5xbf16>, vector<5x32xbf16>, vector<5x32xf32> -> vector<5x32xf32>
    %141 = vector.extract_strided_slice %89 {offsets = [0, 64], sizes = [5, 32], strides = [1, 1]} : vector<5x128xbf16> to vector<5x32xbf16>
    %142 = vector.extract_strided_slice %95 {offsets = [0, 64], sizes = [5, 32], strides = [1, 1]} : vector<5x128xbf16> to vector<5x32xbf16>
    %143 = tpu.concatenate %141, %142 in 1 : vector<5x32xbf16>, vector<5x32xbf16> -> vector<5x64xbf16>
    %144 = vector.extract_strided_slice %97 {offsets = [0, 64], sizes = [5, 32], strides = [1, 1]} : vector<5x128xbf16> to vector<5x32xbf16>
    %145 = vector.extract_strided_slice %100 {offsets = [0, 64], sizes = [5, 32], strides = [1, 1]} : vector<5x128xbf16> to vector<5x32xbf16>
    %146 = tpu.concatenate %144, %145 in 1 : vector<5x32xbf16>, vector<5x32xbf16> -> vector<5x64xbf16>
    %cst_44 = arith.constant dense<0.000000e+00> : vector<5x5xf32>
    %147 = tpu.matmul %143, %146, %cst_44 {dimension_numbers = #tpu.dot_dimension_numbers<[1], [1], [0], [0], [0, 0, 1, 0], [], []>} : vector<5x64xbf16>, vector<5x64xbf16>, vector<5x5xf32> -> vector<5x5xf32>
    %cst_45 = arith.constant dense<0xFF800000> : vector<5xf32>
    %148 = vector.multi_reduction <maximumf>, %147, %cst_45 [1] : vector<5x5xf32> to vector<5xf32>
    %149 = vector.shape_cast %148 : vector<5xf32> to vector<5x1xf32>
    %150 = vector.broadcast %149 : vector<5x1xf32> to vector<5x5xf32>
    %151 = arith.subf %147, %150 : vector<5x5xf32>
    %152 = math.exp %151 : vector<5x5xf32>
    %cst_46 = arith.constant dense<0.000000e+00> : vector<5xf32>
    %153 = vector.multi_reduction <add>, %152, %cst_46 [1] : vector<5x5xf32> to vector<5xf32>
    %154 = vector.shape_cast %153 : vector<5xf32> to vector<5x1xf32>
    %155 = tpu.reciprocal %154 {approx = true} : vector<5x1xf32> -> vector<5x1xf32>
    %156 = vector.broadcast %155 : vector<5x1xf32> to vector<5x5xf32>
    %157 = arith.mulf %152, %156 : vector<5x5xf32>
    %158 = arith.truncf %157 : vector<5x5xf32> to vector<5x5xbf16>
    %159 = vector.extract_strided_slice %99 {offsets = [0, 64], sizes = [5, 32], strides = [1, 1]} : vector<5x128xbf16> to vector<5x32xbf16>
    %cst_47 = arith.constant dense<0.000000e+00> : vector<5x32xf32>
    %160 = tpu.matmul %158, %159, %cst_47 {dimension_numbers = #tpu.dot_dimension_numbers<[1], [0], [0], [1], [0, 0, 1, 1], [], []>} : vector<5x5xbf16>, vector<5x32xbf16>, vector<5x32xf32> -> vector<5x32xf32>
    %161 = vector.extract_strided_slice %89 {offsets = [0, 96], sizes = [5, 32], strides = [1, 1]} : vector<5x128xbf16> to vector<5x32xbf16>
    %162 = vector.extract_strided_slice %95 {offsets = [0, 96], sizes = [5, 32], strides = [1, 1]} : vector<5x128xbf16> to vector<5x32xbf16>
    %163 = tpu.concatenate %161, %162 in 1 : vector<5x32xbf16>, vector<5x32xbf16> -> vector<5x64xbf16>
    %164 = vector.extract_strided_slice %97 {offsets = [0, 96], sizes = [5, 32], strides = [1, 1]} : vector<5x128xbf16> to vector<5x32xbf16>
    %165 = vector.extract_strided_slice %100 {offsets = [0, 96], sizes = [5, 32], strides = [1, 1]} : vector<5x128xbf16> to vector<5x32xbf16>
    %166 = tpu.concatenate %164, %165 in 1 : vector<5x32xbf16>, vector<5x32xbf16> -> vector<5x64xbf16>
    %cst_48 = arith.constant dense<0.000000e+00> : vector<5x5xf32>
    %167 = tpu.matmul %163, %166, %cst_48 {dimension_numbers = #tpu.dot_dimension_numbers<[1], [1], [0], [0], [0, 0, 1, 0], [], []>} : vector<5x64xbf16>, vector<5x64xbf16>, vector<5x5xf32> -> vector<5x5xf32>
    %cst_49 = arith.constant dense<0xFF800000> : vector<5xf32>
    %168 = vector.multi_reduction <maximumf>, %167, %cst_49 [1] : vector<5x5xf32> to vector<5xf32>
    %169 = vector.shape_cast %168 : vector<5xf32> to vector<5x1xf32>
    %170 = vector.broadcast %169 : vector<5x1xf32> to vector<5x5xf32>
    %171 = arith.subf %167, %170 : vector<5x5xf32>
    %172 = math.exp %171 : vector<5x5xf32>
    %cst_50 = arith.constant dense<0.000000e+00> : vector<5xf32>
    %173 = vector.multi_reduction <add>, %172, %cst_50 [1] : vector<5x5xf32> to vector<5xf32>
    %174 = vector.shape_cast %173 : vector<5xf32> to vector<5x1xf32>
    %175 = tpu.reciprocal %174 {approx = true} : vector<5x1xf32> -> vector<5x1xf32>
    %176 = vector.broadcast %175 : vector<5x1xf32> to vector<5x5xf32>
    %177 = arith.mulf %172, %176 : vector<5x5xf32>
    %178 = arith.truncf %177 : vector<5x5xf32> to vector<5x5xbf16>
    %179 = vector.extract_strided_slice %99 {offsets = [0, 96], sizes = [5, 32], strides = [1, 1]} : vector<5x128xbf16> to vector<5x32xbf16>
    %cst_51 = arith.constant dense<0.000000e+00> : vector<5x32xf32>
    %180 = tpu.matmul %178, %179, %cst_51 {dimension_numbers = #tpu.dot_dimension_numbers<[1], [0], [0], [1], [0, 0, 1, 1], [], []>} : vector<5x5xbf16>, vector<5x32xbf16>, vector<5x32xf32> -> vector<5x32xf32>
    %181 = tpu.concatenate %120, %140, %160, %180 in 1 : vector<5x32xf32>, vector<5x32xf32>, vector<5x32xf32>, vector<5x32xf32> -> vector<5x128xf32>
    %182 = arith.truncf %181 : vector<5x128xf32> to vector<5x128xbf16>
    %c0_52 = arith.constant 0 : index
    %c0_53 = arith.constant 0 : index
    %183 = vector.load %arg9[%c0_52, %c0_53] : memref<128x128xbf16, #tpu.memory_space<vmem>>, vector<128x128xbf16>
    %cst_54 = arith.constant dense<0.000000e+00> : vector<5x128xf32>
    %184 = tpu.matmul %182, %183, %cst_54 {dimension_numbers = #tpu.dot_dimension_numbers<[1], [0], [0], [1], [0, 0, 1, 1], [], []>} : vector<5x128xbf16>, vector<128x128xbf16>, vector<5x128xf32> -> vector<5x128xf32>
    %c7 = arith.constant 7 : index
    %c0_55 = arith.constant 0 : index
    %185 = vector.load %arg2[%c7, %c0_55] : memref<19x128xf32, #tpu.memory_space<vmem>>, vector<1x128xf32>
    %186 = vector.shape_cast %185 : vector<1x128xf32> to vector<128xf32>
    %187 = vector.shape_cast %186 : vector<128xf32> to vector<1x128xf32>
    %188 = vector.broadcast %187 : vector<1x128xf32> to vector<5x128xf32>
    %189 = arith.addf %184, %188 : vector<5x128xf32>
    %190 = arith.addf %50, %189 : vector<5x128xf32>
    %c8 = arith.constant 8 : index
    %c0_56 = arith.constant 0 : index
    %191 = vector.load %arg2[%c8, %c0_56] : memref<19x128xf32, #tpu.memory_space<vmem>>, vector<1x128xf32>
    %192 = vector.shape_cast %191 : vector<1x128xf32> to vector<128xf32>
    %193 = vector.shape_cast %192 : vector<128xf32> to vector<1x128xf32>
    %c9 = arith.constant 9 : index
    %c0_57 = arith.constant 0 : index
    %194 = vector.load %arg2[%c9, %c0_57] : memref<19x128xf32, #tpu.memory_space<vmem>>, vector<1x128xf32>
    %195 = vector.shape_cast %194 : vector<1x128xf32> to vector<128xf32>
    %196 = vector.shape_cast %195 : vector<128xf32> to vector<1x128xf32>
    %cst_58 = arith.constant dense<0.000000e+00> : vector<5xf32>
    %197 = vector.multi_reduction <add>, %190, %cst_58 [1] : vector<5x128xf32> to vector<5xf32>
    %198 = vector.shape_cast %197 : vector<5xf32> to vector<5x1xf32>
    %cst_59 = arith.constant 1.280000e+02 : f32
    %199 = vector.broadcast %cst_59 : f32 to vector<5x1xf32>
    %200 = arith.divf %198, %199 : vector<5x1xf32>
    %201 = vector.broadcast %200 : vector<5x1xf32> to vector<5x128xf32>
    %202 = arith.subf %190, %201 : vector<5x128xf32>
    %203 = arith.mulf %202, %202 : vector<5x128xf32>
    %cst_60 = arith.constant dense<0.000000e+00> : vector<5xf32>
    %204 = vector.multi_reduction <add>, %203, %cst_60 [1] : vector<5x128xf32> to vector<5xf32>
    %205 = vector.shape_cast %204 : vector<5xf32> to vector<5x1xf32>
    %cst_61 = arith.constant 1.280000e+02 : f32
    %206 = vector.broadcast %cst_61 : f32 to vector<5x1xf32>
    %207 = arith.divf %205, %206 : vector<5x1xf32>
    %cst_62 = arith.constant 9.99999974E-6 : f32
    %208 = vector.broadcast %cst_62 : f32 to vector<5x1xf32>
    %209 = arith.addf %207, %208 : vector<5x1xf32>
    %210 = math.rsqrt %209 : vector<5x1xf32>
    %211 = vector.broadcast %210 : vector<5x1xf32> to vector<5x128xf32>
    %212 = arith.mulf %202, %211 : vector<5x128xf32>
    %213 = vector.broadcast %193 : vector<1x128xf32> to vector<5x128xf32>
    %214 = arith.mulf %212, %213 : vector<5x128xf32>
    %215 = vector.broadcast %196 : vector<1x128xf32> to vector<5x128xf32>
    %216 = arith.addf %214, %215 : vector<5x128xf32>
    %217 = arith.truncf %216 : vector<5x128xf32> to vector<5x128xbf16>
    %c0_63 = arith.constant 0 : index
    %c0_64 = arith.constant 0 : index
    %218 = vector.load %arg10[%c0_63, %c0_64] : memref<128x128xbf16, #tpu.memory_space<vmem>>, vector<128x128xbf16>
    %cst_65 = arith.constant dense<0.000000e+00> : vector<5x128xf32>
    %219 = tpu.matmul %217, %218, %cst_65 {dimension_numbers = #tpu.dot_dimension_numbers<[1], [0], [0], [1], [0, 0, 1, 1], [], []>} : vector<5x128xbf16>, vector<128x128xbf16>, vector<5x128xf32> -> vector<5x128xf32>
    %c10 = arith.constant 10 : index
    %c0_66 = arith.constant 0 : index
    %220 = vector.load %arg2[%c10, %c0_66] : memref<19x128xf32, #tpu.memory_space<vmem>>, vector<1x128xf32>
    %221 = vector.shape_cast %220 : vector<1x128xf32> to vector<128xf32>
    %222 = vector.shape_cast %221 : vector<128xf32> to vector<1x128xf32>
    %223 = vector.broadcast %222 : vector<1x128xf32> to vector<5x128xf32>
    %224 = arith.addf %219, %223 : vector<5x128xf32>
    %c0_67 = arith.constant 0 : index
    %c0_68 = arith.constant 0 : index
    %225 = vector.load %arg11[%c0_67, %c0_68] : memref<128x128xbf16, #tpu.memory_space<vmem>>, vector<128x128xbf16>
    %cst_69 = arith.constant dense<0.000000e+00> : vector<5x128xf32>
    %226 = tpu.matmul %217, %225, %cst_69 {dimension_numbers = #tpu.dot_dimension_numbers<[1], [0], [0], [1], [0, 0, 1, 1], [], []>} : vector<5x128xbf16>, vector<128x128xbf16>, vector<5x128xf32> -> vector<5x128xf32>
    %c11 = arith.constant 11 : index
    %c0_70 = arith.constant 0 : index
    %227 = vector.load %arg2[%c11, %c0_70] : memref<19x128xf32, #tpu.memory_space<vmem>>, vector<1x128xf32>
    %228 = vector.shape_cast %227 : vector<1x128xf32> to vector<128xf32>
    %229 = vector.shape_cast %228 : vector<128xf32> to vector<1x128xf32>
    %230 = vector.broadcast %229 : vector<1x128xf32> to vector<5x128xf32>
    %231 = arith.addf %226, %230 : vector<5x128xf32>
    %232 = arith.negf %231 : vector<5x128xf32>
    %233 = math.exp %232 : vector<5x128xf32>
    %cst_71 = arith.constant 1.000000e+00 : f32
    %234 = vector.broadcast %cst_71 : f32 to vector<5x128xf32>
    %235 = arith.addf %234, %233 : vector<5x128xf32>
    %236 = arith.divf %234, %235 : vector<5x128xf32>
    %237 = arith.mulf %224, %236 : vector<5x128xf32>
    %cst_72 = arith.constant 0.000000e+00 : f32
    %238 = vector.broadcast %cst_72 : f32 to vector<7x128xf32>
    %239 = tpu.concatenate %238, %237, %238 in 0 : vector<7x128xf32>, vector<5x128xf32>, vector<7x128xf32> -> vector<19x128xf32>
    %c0_73 = arith.constant 0 : index
    %c0_74 = arith.constant 0 : index
    %240 = vector.load %arg18[%c0_73, %c0_74] : memref<19x128xf32, #tpu.memory_space<vmem>>, vector<19x128xf32>
    tpu.vector_store %arg18[%c0_73, %c0_74], %239 {strides = array<i32>} : memref<19x128xf32, #tpu.memory_space<vmem>>, vector<19x128xf32>,
    %c0_75 = arith.constant 0 : index
    %c0_76 = arith.constant 0 : index
    %241 = vector.load %arg12[%c0_75, %c0_76] : memref<15x128xf32, #tpu.memory_space<vmem>>, vector<15x128xf32>
    %c0_77 = arith.constant 0 : index
    %c0_78 = arith.constant 0 : index
    %242 = vector.load %arg18[%c0_77, %c0_78] : memref<19x128xf32, #tpu.memory_space<vmem>>, vector<5x128xf32>
    %243 = vector.extract_strided_slice %241 {offsets = [0, 0], sizes = [1, 128], strides = [1, 1]} : vector<15x128xf32> to vector<1x128xf32>
    %244 = vector.shape_cast %243 : vector<1x128xf32> to vector<128xf32>
    %245 = vector.shape_cast %244 : vector<128xf32> to vector<1x128xf32>
    %246 = vector.broadcast %245 : vector<1x128xf32> to vector<5x128xf32>
    %247 = arith.mulf %242, %246 : vector<5x128xf32>
    %c1_79 = arith.constant 1 : index
    %c0_80 = arith.constant 0 : index
    %248 = vector.load %arg18[%c1_79, %c0_80] : memref<19x128xf32, #tpu.memory_space<vmem>>, vector<5x128xf32>
    %249 = vector.extract_strided_slice %241 {offsets = [1, 0], sizes = [1, 128], strides = [1, 1]} : vector<15x128xf32> to vector<1x128xf32>
    %250 = vector.shape_cast %249 : vector<1x128xf32> to vector<128xf32>
    %251 = vector.shape_cast %250 : vector<128xf32> to vector<1x128xf32>
    %252 = vector.broadcast %251 : vector<1x128xf32> to vector<5x128xf32>
    %253 = arith.mulf %248, %252 : vector<5x128xf32>
    %254 = arith.addf %247, %253 : vector<5x128xf32>
    %c2_81 = arith.constant 2 : index
    %c0_82 = arith.constant 0 : index
    %255 = vector.load %arg18[%c2_81, %c0_82] : memref<19x128xf32, #tpu.memory_space<vmem>>, vector<5x128xf32>
    %256 = vector.extract_strided_slice %241 {offsets = [2, 0], sizes = [1, 128], strides = [1, 1]} : vector<15x128xf32> to vector<1x128xf32>
    %257 = vector.shape_cast %256 : vector<1x128xf32> to vector<128xf32>
    %258 = vector.shape_cast %257 : vector<128xf32> to vector<1x128xf32>
    %259 = vector.broadcast %258 : vector<1x128xf32> to vector<5x128xf32>
    %260 = arith.mulf %255, %259 : vector<5x128xf32>
    %261 = arith.addf %254, %260 : vector<5x128xf32>
    %c3_83 = arith.constant 3 : index
    %c0_84 = arith.constant 0 : index
    %262 = vector.load %arg18[%c3_83, %c0_84] : memref<19x128xf32, #tpu.memory_space<vmem>>, vector<5x128xf32>
    %263 = vector.extract_strided_slice %241 {offsets = [3, 0], sizes = [1, 128], strides = [1, 1]} : vector<15x128xf32> to vector<1x128xf32>
    %264 = vector.shape_cast %263 : vector<1x128xf32> to vector<128xf32>
    %265 = vector.shape_cast %264 : vector<128xf32> to vector<1x128xf32>
    %266 = vector.broadcast %265 : vector<1x128xf32> to vector<5x128xf32>
    %267 = arith.mulf %262, %266 : vector<5x128xf32>
    %268 = arith.addf %261, %267 : vector<5x128xf32>
    %c4_85 = arith.constant 4 : index
    %c0_86 = arith.constant 0 : index
    %269 = vector.load %arg18[%c4_85, %c0_86] : memref<19x128xf32, #tpu.memory_space<vmem>>, vector<5x128xf32>
    %270 = vector.extract_strided_slice %241 {offsets = [4, 0], sizes = [1, 128], strides = [1, 1]} : vector<15x128xf32> to vector<1x128xf32>
    %271 = vector.shape_cast %270 : vector<1x128xf32> to vector<128xf32>
    %272 = vector.shape_cast %271 : vector<128xf32> to vector<1x128xf32>
    %273 = vector.broadcast %272 : vector<1x128xf32> to vector<5x128xf32>
    %274 = arith.mulf %269, %273 : vector<5x128xf32>
    %275 = arith.addf %268, %274 : vector<5x128xf32>
    %c5_87 = arith.constant 5 : index
    %c0_88 = arith.constant 0 : index
    %276 = vector.load %arg18[%c5_87, %c0_88] : memref<19x128xf32, #tpu.memory_space<vmem>>, vector<5x128xf32>
    %277 = vector.extract_strided_slice %241 {offsets = [5, 0], sizes = [1, 128], strides = [1, 1]} : vector<15x128xf32> to vector<1x128xf32>
    %278 = vector.shape_cast %277 : vector<1x128xf32> to vector<128xf32>
    %279 = vector.shape_cast %278 : vector<128xf32> to vector<1x128xf32>
    %280 = vector.broadcast %279 : vector<1x128xf32> to vector<5x128xf32>
    %281 = arith.mulf %276, %280 : vector<5x128xf32>
    %282 = arith.addf %275, %281 : vector<5x128xf32>
    %c6_89 = arith.constant 6 : index
    %c0_90 = arith.constant 0 : index
    %283 = vector.load %arg18[%c6_89, %c0_90] : memref<19x128xf32, #tpu.memory_space<vmem>>, vector<5x128xf32>
    %284 = vector.extract_strided_slice %241 {offsets = [6, 0], sizes = [1, 128], strides = [1, 1]} : vector<15x128xf32> to vector<1x128xf32>
    %285 = vector.shape_cast %284 : vector<1x128xf32> to vector<128xf32>
    %286 = vector.shape_cast %285 : vector<128xf32> to vector<1x128xf32>
    %287 = vector.broadcast %286 : vector<1x128xf32> to vector<5x128xf32>
    %288 = arith.mulf %283, %287 : vector<5x128xf32>
    %289 = arith.addf %282, %288 : vector<5x128xf32>
    %c7_91 = arith.constant 7 : index
    %c0_92 = arith.constant 0 : index
    %290 = vector.load %arg18[%c7_91, %c0_92] : memref<19x128xf32, #tpu.memory_space<vmem>>, vector<5x128xf32>
    %291 = vector.extract_strided_slice %241 {offsets = [7, 0], sizes = [1, 128], strides = [1, 1]} : vector<15x128xf32> to vector<1x128xf32>
    %292 = vector.shape_cast %291 : vector<1x128xf32> to vector<128xf32>
    %293 = vector.shape_cast %292 : vector<128xf32> to vector<1x128xf32>
    %294 = vector.broadcast %293 : vector<1x128xf32> to vector<5x128xf32>
    %295 = arith.mulf %290, %294 : vector<5x128xf32>
    %296 = arith.addf %289, %295 : vector<5x128xf32>
    %c8_93 = arith.constant 8 : index
    %c0_94 = arith.constant 0 : index
    %297 = vector.load %arg18[%c8_93, %c0_94] : memref<19x128xf32, #tpu.memory_space<vmem>>, vector<5x128xf32>
    %298 = vector.extract_strided_slice %241 {offsets = [8, 0], sizes = [1, 128], strides = [1, 1]} : vector<15x128xf32> to vector<1x128xf32>
    %299 = vector.shape_cast %298 : vector<1x128xf32> to vector<128xf32>
    %300 = vector.shape_cast %299 : vector<128xf32> to vector<1x128xf32>
    %301 = vector.broadcast %300 : vector<1x128xf32> to vector<5x128xf32>
    %302 = arith.mulf %297, %301 : vector<5x128xf32>
    %303 = arith.addf %296, %302 : vector<5x128xf32>
    %c9_95 = arith.constant 9 : index
    %c0_96 = arith.constant 0 : index
    %304 = vector.load %arg18[%c9_95, %c0_96] : memref<19x128xf32, #tpu.memory_space<vmem>>, vector<5x128xf32>
    %305 = vector.extract_strided_slice %241 {offsets = [9, 0], sizes = [1, 128], strides = [1, 1]} : vector<15x128xf32> to vector<1x128xf32>
    %306 = vector.shape_cast %305 : vector<1x128xf32> to vector<128xf32>
    %307 = vector.shape_cast %306 : vector<128xf32> to vector<1x128xf32>
    %308 = vector.broadcast %307 : vector<1x128xf32> to vector<5x128xf32>
    %309 = arith.mulf %304, %308 : vector<5x128xf32>
    %310 = arith.addf %303, %309 : vector<5x128xf32>
    %c10_97 = arith.constant 10 : index
    %c0_98 = arith.constant 0 : index
    %311 = vector.load %arg18[%c10_97, %c0_98] : memref<19x128xf32, #tpu.memory_space<vmem>>, vector<5x128xf32>
    %312 = vector.extract_strided_slice %241 {offsets = [10, 0], sizes = [1, 128], strides = [1, 1]} : vector<15x128xf32> to vector<1x128xf32>
    %313 = vector.shape_cast %312 : vector<1x128xf32> to vector<128xf32>
    %314 = vector.shape_cast %313 : vector<128xf32> to vector<1x128xf32>
    %315 = vector.broadcast %314 : vector<1x128xf32> to vector<5x128xf32>
    %316 = arith.mulf %311, %315 : vector<5x128xf32>
    %317 = arith.addf %310, %316 : vector<5x128xf32>
    %c11_99 = arith.constant 11 : index
    %c0_100 = arith.constant 0 : index
    %318 = vector.load %arg18[%c11_99, %c0_100] : memref<19x128xf32, #tpu.memory_space<vmem>>, vector<5x128xf32>
    %319 = vector.extract_strided_slice %241 {offsets = [11, 0], sizes = [1, 128], strides = [1, 1]} : vector<15x128xf32> to vector<1x128xf32>
    %320 = vector.shape_cast %319 : vector<1x128xf32> to vector<128xf32>
    %321 = vector.shape_cast %320 : vector<128xf32> to vector<1x128xf32>
    %322 = vector.broadcast %321 : vector<1x128xf32> to vector<5x128xf32>
    %323 = arith.mulf %318, %322 : vector<5x128xf32>
    %324 = arith.addf %317, %323 : vector<5x128xf32>
    %c12 = arith.constant 12 : index
    %c0_101 = arith.constant 0 : index
    %325 = vector.load %arg18[%c12, %c0_101] : memref<19x128xf32, #tpu.memory_space<vmem>>, vector<5x128xf32>
    %326 = vector.extract_strided_slice %241 {offsets = [12, 0], sizes = [1, 128], strides = [1, 1]} : vector<15x128xf32> to vector<1x128xf32>
    %327 = vector.shape_cast %326 : vector<1x128xf32> to vector<128xf32>
    %328 = vector.shape_cast %327 : vector<128xf32> to vector<1x128xf32>
    %329 = vector.broadcast %328 : vector<1x128xf32> to vector<5x128xf32>
    %330 = arith.mulf %325, %329 : vector<5x128xf32>
    %331 = arith.addf %324, %330 : vector<5x128xf32>
    %c13 = arith.constant 13 : index
    %c0_102 = arith.constant 0 : index
    %332 = vector.load %arg18[%c13, %c0_102] : memref<19x128xf32, #tpu.memory_space<vmem>>, vector<5x128xf32>
    %333 = vector.extract_strided_slice %241 {offsets = [13, 0], sizes = [1, 128], strides = [1, 1]} : vector<15x128xf32> to vector<1x128xf32>
    %334 = vector.shape_cast %333 : vector<1x128xf32> to vector<128xf32>
    %335 = vector.shape_cast %334 : vector<128xf32> to vector<1x128xf32>
    %336 = vector.broadcast %335 : vector<1x128xf32> to vector<5x128xf32>
    %337 = arith.mulf %332, %336 : vector<5x128xf32>
    %338 = arith.addf %331, %337 : vector<5x128xf32>
    %c14 = arith.constant 14 : index
    %c0_103 = arith.constant 0 : index
    %339 = vector.load %arg18[%c14, %c0_103] : memref<19x128xf32, #tpu.memory_space<vmem>>, vector<5x128xf32>
    %340 = vector.extract_strided_slice %241 {offsets = [14, 0], sizes = [1, 128], strides = [1, 1]} : vector<15x128xf32> to vector<1x128xf32>
    %341 = vector.shape_cast %340 : vector<1x128xf32> to vector<128xf32>
    %342 = vector.shape_cast %341 : vector<128xf32> to vector<1x128xf32>
    %343 = vector.broadcast %342 : vector<1x128xf32> to vector<5x128xf32>
    %344 = arith.mulf %339, %343 : vector<5x128xf32>
    %345 = arith.addf %338, %344 : vector<5x128xf32>
    %c12_104 = arith.constant 12 : index
    %c0_105 = arith.constant 0 : index
    %346 = vector.load %arg2[%c12_104, %c0_105] : memref<19x128xf32, #tpu.memory_space<vmem>>, vector<1x128xf32>
    %347 = vector.shape_cast %346 : vector<1x128xf32> to vector<128xf32>
    %348 = vector.shape_cast %347 : vector<128xf32> to vector<1x128xf32>
    %349 = vector.broadcast %348 : vector<1x128xf32> to vector<5x128xf32>
    %350 = arith.addf %345, %349 : vector<5x128xf32>
    %351 = arith.negf %350 : vector<5x128xf32>
    %352 = math.exp %351 : vector<5x128xf32>
    %cst_106 = arith.constant 1.000000e+00 : f32
    %353 = vector.broadcast %cst_106 : f32 to vector<5x128xf32>
    %354 = arith.addf %353, %352 : vector<5x128xf32>
    %355 = arith.divf %353, %354 : vector<5x128xf32>
    %356 = arith.mulf %350, %355 : vector<5x128xf32>
    %357 = arith.truncf %356 : vector<5x128xf32> to vector<5x128xbf16>
    %c0_107 = arith.constant 0 : index
    %c0_108 = arith.constant 0 : index
    %358 = vector.load %arg13[%c0_107, %c0_108] : memref<128x128xbf16, #tpu.memory_space<vmem>>, vector<128x128xbf16>
    %cst_109 = arith.constant dense<0.000000e+00> : vector<5x128xf32>
    %359 = tpu.matmul %357, %358, %cst_109 {dimension_numbers = #tpu.dot_dimension_numbers<[1], [0], [0], [1], [0, 0, 1, 1], [], []>} : vector<5x128xbf16>, vector<128x128xbf16>, vector<5x128xf32> -> vector<5x128xf32>
    %c13_110 = arith.constant 13 : index
    %c0_111 = arith.constant 0 : index
    %360 = vector.load %arg2[%c13_110, %c0_111] : memref<19x128xf32, #tpu.memory_space<vmem>>, vector<1x128xf32>
    %361 = vector.shape_cast %360 : vector<1x128xf32> to vector<128xf32>
    %362 = vector.shape_cast %361 : vector<128xf32> to vector<1x128xf32>
    %363 = vector.broadcast %362 : vector<1x128xf32> to vector<5x128xf32>
    %364 = arith.addf %359, %363 : vector<5x128xf32>
    %365 = arith.addf %190, %364 : vector<5x128xf32>
    %c14_112 = arith.constant 14 : index
    %c0_113 = arith.constant 0 : index
    %366 = vector.load %arg2[%c14_112, %c0_113] : memref<19x128xf32, #tpu.memory_space<vmem>>, vector<1x128xf32>
    %367 = vector.shape_cast %366 : vector<1x128xf32> to vector<128xf32>
    %368 = vector.shape_cast %367 : vector<128xf32> to vector<1x128xf32>
    %c15 = arith.constant 15 : index
    %c0_114 = arith.constant 0 : index
    %369 = vector.load %arg2[%c15, %c0_114] : memref<19x128xf32, #tpu.memory_space<vmem>>, vector<1x128xf32>
    %370 = vector.shape_cast %369 : vector<1x128xf32> to vector<128xf32>
    %371 = vector.shape_cast %370 : vector<128xf32> to vector<1x128xf32>
    %cst_115 = arith.constant dense<0.000000e+00> : vector<5xf32>
    %372 = vector.multi_reduction <add>, %365, %cst_115 [1] : vector<5x128xf32> to vector<5xf32>
    %373 = vector.shape_cast %372 : vector<5xf32> to vector<5x1xf32>
    %cst_116 = arith.constant 1.280000e+02 : f32
    %374 = vector.broadcast %cst_116 : f32 to vector<5x1xf32>
    %375 = arith.divf %373, %374 : vector<5x1xf32>
    %376 = vector.broadcast %375 : vector<5x1xf32> to vector<5x128xf32>
    %377 = arith.subf %365, %376 : vector<5x128xf32>
    %378 = arith.mulf %377, %377 : vector<5x128xf32>
    %cst_117 = arith.constant dense<0.000000e+00> : vector<5xf32>
    %379 = vector.multi_reduction <add>, %378, %cst_117 [1] : vector<5x128xf32> to vector<5xf32>
    %380 = vector.shape_cast %379 : vector<5xf32> to vector<5x1xf32>
    %cst_118 = arith.constant 1.280000e+02 : f32
    %381 = vector.broadcast %cst_118 : f32 to vector<5x1xf32>
    %382 = arith.divf %380, %381 : vector<5x1xf32>
    %cst_119 = arith.constant 9.99999974E-6 : f32
    %383 = vector.broadcast %cst_119 : f32 to vector<5x1xf32>
    %384 = arith.addf %382, %383 : vector<5x1xf32>
    %385 = math.rsqrt %384 : vector<5x1xf32>
    %386 = vector.broadcast %385 : vector<5x1xf32> to vector<5x128xf32>
    %387 = arith.mulf %377, %386 : vector<5x128xf32>
    %388 = vector.broadcast %368 : vector<1x128xf32> to vector<5x128xf32>
    %389 = arith.mulf %387, %388 : vector<5x128xf32>
    %390 = vector.broadcast %371 : vector<1x128xf32> to vector<5x128xf32>
    %391 = arith.addf %389, %390 : vector<5x128xf32>
    %392 = arith.truncf %391 : vector<5x128xf32> to vector<5x128xbf16>
    %c0_120 = arith.constant 0 : index
    %c0_121 = arith.constant 0 : index
    %393 = vector.load %arg15[%c0_120, %c0_121] : memref<128x256xbf16, #tpu.memory_space<vmem>>, vector<128x256xbf16>
    %cst_122 = arith.constant dense<0.000000e+00> : vector<5x256xf32>
    %394 = tpu.matmul %392, %393, %cst_122 {dimension_numbers = #tpu.dot_dimension_numbers<[1], [0], [0], [1], [0, 0, 1, 1], [], []>} : vector<5x128xbf16>, vector<128x256xbf16>, vector<5x256xf32> -> vector<5x256xf32>
    %c0_123 = arith.constant 0 : index
    %c0_124 = arith.constant 0 : index
    %395 = vector.load %arg14[%c0_123, %c0_124] : memref<1x256xf32, #tpu.memory_space<vmem>>, vector<1x256xf32>
    %396 = vector.broadcast %395 : vector<1x256xf32> to vector<5x256xf32>
    %397 = arith.addf %394, %396 : vector<5x256xf32>
    %398 = arith.negf %397 : vector<5x256xf32>
    %399 = math.exp %398 : vector<5x256xf32>
    %cst_125 = arith.constant 1.000000e+00 : f32
    %400 = vector.broadcast %cst_125 : f32 to vector<5x256xf32>
    %401 = arith.addf %400, %399 : vector<5x256xf32>
    %402 = arith.divf %400, %401 : vector<5x256xf32>
    %403 = arith.mulf %397, %402 : vector<5x256xf32>
    %404 = arith.truncf %403 : vector<5x256xf32> to vector<5x256xbf16>
    %c0_126 = arith.constant 0 : index
    %c0_127 = arith.constant 0 : index
    %405 = vector.load %arg16[%c0_126, %c0_127] : memref<256x128xbf16, #tpu.memory_space<vmem>>, vector<256x128xbf16>
    %cst_128 = arith.constant dense<0.000000e+00> : vector<5x128xf32>
    %406 = tpu.matmul %404, %405, %cst_128 {dimension_numbers = #tpu.dot_dimension_numbers<[1], [0], [0], [1], [0, 0, 1, 1], [], []>} : vector<5x256xbf16>, vector<256x128xbf16>, vector<5x128xf32> -> vector<5x128xf32>
    %c16 = arith.constant 16 : index
    %c0_129 = arith.constant 0 : index
    %407 = vector.load %arg2[%c16, %c0_129] : memref<19x128xf32, #tpu.memory_space<vmem>>, vector<1x128xf32>
    %408 = vector.shape_cast %407 : vector<1x128xf32> to vector<128xf32>
    %409 = vector.shape_cast %408 : vector<128xf32> to vector<1x128xf32>
    %410 = vector.broadcast %409 : vector<1x128xf32> to vector<5x128xf32>
    %411 = arith.addf %406, %410 : vector<5x128xf32>
    %cst_130 = arith.constant 5.000000e-01 : f32
    %412 = vector.broadcast %cst_130 : f32 to vector<5x128xf32>
    %413 = arith.mulf %412, %411 : vector<5x128xf32>
    %414 = arith.addf %365, %413 : vector<5x128xf32>
    %c17 = arith.constant 17 : index
    %c0_131 = arith.constant 0 : index
    %415 = vector.load %arg2[%c17, %c0_131] : memref<19x128xf32, #tpu.memory_space<vmem>>, vector<1x128xf32>
    %416 = vector.shape_cast %415 : vector<1x128xf32> to vector<128xf32>
    %417 = vector.shape_cast %416 : vector<128xf32> to vector<1x128xf32>
    %c18 = arith.constant 18 : index
    %c0_132 = arith.constant 0 : index
    %418 = vector.load %arg2[%c18, %c0_132] : memref<19x128xf32, #tpu.memory_space<vmem>>, vector<1x128xf32>
    %419 = vector.shape_cast %418 : vector<1x128xf32> to vector<128xf32>
    %420 = vector.shape_cast %419 : vector<128xf32> to vector<1x128xf32>
    %cst_133 = arith.constant dense<0.000000e+00> : vector<5xf32>
    %421 = vector.multi_reduction <add>, %414, %cst_133 [1] : vector<5x128xf32> to vector<5xf32>
    %422 = vector.shape_cast %421 : vector<5xf32> to vector<5x1xf32>
    %cst_134 = arith.constant 1.280000e+02 : f32
    %423 = vector.broadcast %cst_134 : f32 to vector<5x1xf32>
    %424 = arith.divf %422, %423 : vector<5x1xf32>
    %425 = vector.broadcast %424 : vector<5x1xf32> to vector<5x128xf32>
    %426 = arith.subf %414, %425 : vector<5x128xf32>
    %427 = arith.mulf %426, %426 : vector<5x128xf32>
    %cst_135 = arith.constant dense<0.000000e+00> : vector<5xf32>
    %428 = vector.multi_reduction <add>, %427, %cst_135 [1] : vector<5x128xf32> to vector<5xf32>
    %429 = vector.shape_cast %428 : vector<5xf32> to vector<5x1xf32>
    %cst_136 = arith.constant 1.280000e+02 : f32
    %430 = vector.broadcast %cst_136 : f32 to vector<5x1xf32>
    %431 = arith.divf %429, %430 : vector<5x1xf32>
    %cst_137 = arith.constant 9.99999974E-6 : f32
    %432 = vector.broadcast %cst_137 : f32 to vector<5x1xf32>
    %433 = arith.addf %431, %432 : vector<5x1xf32>
    %434 = math.rsqrt %433 : vector<5x1xf32>
    %435 = vector.broadcast %434 : vector<5x1xf32> to vector<5x128xf32>
    %436 = arith.mulf %426, %435 : vector<5x128xf32>
    %437 = vector.broadcast %417 : vector<1x128xf32> to vector<5x128xf32>
    %438 = arith.mulf %436, %437 : vector<5x128xf32>
    %439 = vector.broadcast %420 : vector<1x128xf32> to vector<5x128xf32>
    %440 = arith.addf %438, %439 : vector<5x128xf32>
    %c0_138 = arith.constant 0 : index
    %c0_139 = arith.constant 0 : index
    %c0_140 = arith.constant 0 : index
    %441 = vector.load %arg17[%c0_138, %c0_139, %c0_140] : memref<1x5x128xf32, #tpu.memory_space<vmem>>, vector<1x5x128xf32>
    %442 = vector.shape_cast %441 : vector<1x5x128xf32> to vector<5x128xf32>
    %443 = vector.shape_cast %440 : vector<5x128xf32> to vector<1x5x128xf32>
    tpu.vector_store %arg17[%c0_138, %c0_139, %c0_140], %443 {strides = array<i32>} : memref<1x5x128xf32, #tpu.memory_space<vmem>>, vector<1x5x128xf32>,
    return
  }
  func.func @transform_0(%arg0: i32) -> (i32, i32, i32) {
    %c0_i32 = arith.constant 0 : i32
    %c0_i32_0 = arith.constant 0 : i32
    %c0_i32_1 = arith.constant 0 : i32
    return %arg0, %c0_i32, %c0_i32_0 : i32, i32, i32
  }
  func.func @transform_1(%arg0: i32) -> (i32, i32) {
    %c0_i32 = arith.constant 0 : i32
    %c0_i32_0 = arith.constant 0 : i32
    %c0_i32_1 = arith.constant 0 : i32
    return %c0_i32, %c0_i32_0 : i32, i32
  }
  func.func @transform_2(%arg0: i32) -> (i32, i32) {
    %c0_i32 = arith.constant 0 : i32
    %c0_i32_0 = arith.constant 0 : i32
    %c0_i32_1 = arith.constant 0 : i32
    return %c0_i32, %c0_i32_0 : i32, i32
  }
  func.func @transform_3(%arg0: i32) -> (i32, i32) {
    %c0_i32 = arith.constant 0 : i32
    %c0_i32_0 = arith.constant 0 : i32
    %c0_i32_1 = arith.constant 0 : i32
    return %c0_i32, %c0_i32_0 : i32, i32
  }
  func.func @transform_4(%arg0: i32) -> (i32, i32) {
    %c0_i32 = arith.constant 0 : i32
    %c0_i32_0 = arith.constant 0 : i32
    %c0_i32_1 = arith.constant 0 : i32
    return %c0_i32, %c0_i32_0 : i32, i32
  }
  func.func @transform_5(%arg0: i32) -> (i32, i32) {
    %c0_i32 = arith.constant 0 : i32
    %c0_i32_0 = arith.constant 0 : i32
    %c0_i32_1 = arith.constant 0 : i32
    return %c0_i32, %c0_i32_0 : i32, i32
  }
  func.func @transform_6(%arg0: i32) -> (i32, i32) {
    %c0_i32 = arith.constant 0 : i32
    %c0_i32_0 = arith.constant 0 : i32
    %c0_i32_1 = arith.constant 0 : i32
    return %c0_i32, %c0_i32_0 : i32, i32
  }
  func.func @transform_7(%arg0: i32) -> (i32, i32) {
    %c0_i32 = arith.constant 0 : i32
    %c0_i32_0 = arith.constant 0 : i32
    %c0_i32_1 = arith.constant 0 : i32
    return %c0_i32, %c0_i32_0 : i32, i32
  }
  func.func @transform_8(%arg0: i32) -> (i32, i32) {
    %c0_i32 = arith.constant 0 : i32
    %c0_i32_0 = arith.constant 0 : i32
    %c0_i32_1 = arith.constant 0 : i32
    return %c0_i32, %c0_i32_0 : i32, i32
  }
  func.func @transform_9(%arg0: i32) -> (i32, i32) {
    %c0_i32 = arith.constant 0 : i32
    %c0_i32_0 = arith.constant 0 : i32
    %c0_i32_1 = arith.constant 0 : i32
    return %c0_i32, %c0_i32_0 : i32, i32
  }
  func.func @transform_10(%arg0: i32) -> (i32, i32) {
    %c0_i32 = arith.constant 0 : i32
    %c0_i32_0 = arith.constant 0 : i32
    %c0_i32_1 = arith.constant 0 : i32
    return %c0_i32, %c0_i32_0 : i32, i32
  }
  func.func @transform_11(%arg0: i32) -> (i32, i32) {
    %c0_i32 = arith.constant 0 : i32
    %c0_i32_0 = arith.constant 0 : i32
    %c0_i32_1 = arith.constant 0 : i32
    return %c0_i32, %c0_i32_0 : i32, i32
  }
  func.func @transform_12(%arg0: i32) -> (i32, i32) {
    %c0_i32 = arith.constant 0 : i32
    %c0_i32_0 = arith.constant 0 : i32
    %c0_i32_1 = arith.constant 0 : i32
    return %c0_i32, %c0_i32_0 : i32, i32
  }
  func.func @transform_13(%arg0: i32) -> (i32, i32) {
    %c0_i32 = arith.constant 0 : i32
    %c0_i32_0 = arith.constant 0 : i32
    %c0_i32_1 = arith.constant 0 : i32
    return %c0_i32, %c0_i32_0 : i32, i32
  }
  func.func @transform_14(%arg0: i32) -> (i32, i32) {
    %c0_i32 = arith.constant 0 : i32
    %c0_i32_0 = arith.constant 0 : i32
    %c0_i32_1 = arith.constant 0 : i32
    return %c0_i32, %c0_i32_0 : i32, i32
  }
  func.func @transform_15(%arg0: i32) -> (i32, i32) {
    %c0_i32 = arith.constant 0 : i32
    %c0_i32_0 = arith.constant 0 : i32
    %c0_i32_1 = arith.constant 0 : i32
    return %c0_i32, %c0_i32_0 : i32, i32
  }
  func.func @transform_16(%arg0: i32) -> (i32, i32, i32) {
    %c0_i32 = arith.constant 0 : i32
    %c0_i32_0 = arith.constant 0 : i32
    %c0_i32_1 = arith.constant 0 : i32
    return %arg0, %c0_i32, %c0_i32_0 : i32, i32, i32
  }
}

</mosaic_0001>

<bundles_post_ra>
// kernel: fwd.7
= control target key start
LH: loop header
LB: loop body
LE: loop exit
PB: predicated region body
PF: predicated region fallthrough
CT: control target
= control target key end

     0   :  { %vm97_vm0 = vcmask 1043456   ;;  %vm98_vm1 = vcmask 1044480   ;;  %v289_v0 = vmov 0.0   ;;  %v290_v2 = vmov 65535   ;;  %s407_s1 = inlined_call_operand.vmem [shape: bf16[9,128], index: 1, kind: input, shape index: {}]   ;;  %s408_s0 = inlined_call_operand.vmem [shape: bf16[104,9], index: 0, kind: input, shape index: {}]   ;;  %s409_s2 = inlined_call_operand.vmem [shape: f32[1,128], index: 2, kind: input, shape index: {}]   ;;  %s410_s3 = inlined_call_operand.vmem [shape: f32[104,128], index: 3, kind: output, shape index: {}]  }
   0x1   :  { %246 = vmatprep.subr.bf16.mxu0 %v289_v0  ;;  %v281_v1 = vld [vmem:[%s407_s1] sm:$0x1f]   ;;  %276 = vmatprep.subr.bf16.mxu1 %v289_v0  ;;  %v99_v3 = vsel %vm97_vm0, 4294967295, %v290_v2  ;;  %vm291_vm2 = vmmov 0   ;;  %vm75_vm3 = vcmask 72704   ;;  %v284_v8 = vld [vmem:[%s408_s0 + $0x8] sm:$0xff]  }
   0x2   :  { %v100_v4 = vsel %vm98_vm1, %v99_v3, 0  ;;  %248 = vmatprep.mubr.msk.bf16.mxu0 %vm291_vm2, %v289_v0  ;;  %v282_v5 = vld [vmem:[%s408_s0] sm:$0xff]   ;;  %264 = vmatprep.mubr.msk.bf16.mxu1 %vm291_vm2, %v289_v0  ;;  %v285_v9 = vld [vmem:[%s408_s0 + $0x28] sm:$0xff]   ;;  %v286_v10 = vld [vmem:[%s408_s0 + $0x10] sm:$0xff]  }
   0x3   :  { %v102_v6 = vand.u32 %v281_v1, %v100_v4  ;;  %v283_v7 = vld [vmem:[%s408_s0 + $0x20] sm:$0xff]   ;;  %v287_v11 = vld [vmem:[%s408_s0 + $0x30] ss:$0 sps:$4 sm:$0xff]   ;;  %v288_v12 = vld [vmem:[%s408_s0 + $0x18] sm:$0xff]  }
   0x4   :  { %v353_v13 = vld [vmem:[%s409_s2] ss:$0 sm:$0xff] }
   0x5   :  { %247 = vmatpush3.bf16.msra.mxu0 %v102_v6  ;;  %277 = vmatpush3.bf16.msra.mxu1 %v102_v6 }
   0x8   :  { %249 = vmatmul.mubr.msk.bf16.vlgmr.msra.gmra.mrb[0].mxu0 %vm75_vm3, %v282_v5  ;;  %265 = vmatmul.mubr.msk.bf16.vlgmr.msra.gmra.mrb[0].mxu1 %vm75_vm3, %v283_v7 }
   0x9   :  { %252 = vmatprep.mubr.msk.bf16.mxu0 %vm291_vm2, %v289_v0  ;;  %268 = vmatprep.mubr.msk.bf16.mxu1 %vm291_vm2, %v289_v0 }
  0x10   :  { %253 = vmatmul.mubr.msk.bf16.gmra.mrb[4].mxu0 %vm75_vm3, %v284_v8  ;;  %269 = vmatmul.mubr.msk.bf16.gmra.mrb[4].mxu1 %vm75_vm3, %v285_v9 }
  0x11   :  { %256 = vmatprep.mubr.msk.bf16.mxu0 %vm291_vm2, %v289_v0  ;;  %272 = vmatprep.mubr.msk.bf16.mxu1 %vm291_vm2, %v289_v0 }
  0x18   :  { %257 = vmatmul.mubr.msk.bf16.gmra.mrb[8].mxu0 %vm75_vm3, %v286_v10  ;;  %273 = vmatmul.mubr.msk.bf16.gmra.mrb[8].mxu1 %vm75_vm3, %v287_v11 }
  0x19   :  { %260 = vmatprep.mubr.msk.bf16.mxu0 %vm291_vm2, %v289_v0 }
  0x20   :  { %261 = vmatmul.mubr.msk.bf16.gmra.mrb[12].mxu0 %vm75_vm3, %v288_v12 }
  0xdb   :  { %v138_v14 = vpop.f32.mrb[0].mxu0  ;;  %v170_v15 = vpop.f32.mrb[0].mxu1 }
  0xdc   :  { %v139_v16 = vadd.f32 %v353_v13, %v138_v14  ;;  %v250_v17 = vpop.f32.mrb[1].mxu0  ;;  %v171_v18 = vadd.f32 %v353_v13, %v170_v15  ;;  %v266_v19 = vpop.f32.mrb[1].mxu1 }
  0xdd   :  { %v141_v20 = vpop.f32.mrb[2].mxu0  ;;  %v173_v21 = vpop.f32.mrb[2].mxu1 }
  0xde   :  { %v192_v22 = vmax.f32 %v139_v16, 0.0  ;;  %v142_v23 = vadd.f32 %v353_v13, %v141_v20  ;;  %v251_v24 = vpop.f32.mrb[3].mxu0  ;;  %v200_v25 = vmax.f32 %v171_v18, 0.0  ;;  %v174_v26 = vadd.f32 %v353_v13, %v173_v21  ;;  %v267_v27 = vpop.f32.mrb[3].mxu1 }
  0xe0   :  { %205 = vst [vmem:[%s410_s3] sm:$0xff] %v192_v22  ;;  %v193_v28 = vmax.f32 %v142_v23, 0.0  ;;  %213 = vst [vmem:[%s410_s3 + $0x40] sm:$0xff] %v200_v25  ;;  %v201_v29 = vmax.f32 %v174_v26, 0.0 }
  0xe2   :  { %206 = vst [vmem:[%s410_s3 + $0x8] sm:$0xff] %v193_v28  ;;  %214 = vst [vmem:[%s410_s3 + $0x48] sm:$0xff] %v201_v29 }
  0xe3   :  { %v146_v30 = vpop.f32.mrb[4].mxu0  ;;  %v178_v31 = vpop.f32.mrb[4].mxu1 }
  0xe4   :  { %v147_v32 = vadd.f32 %v353_v13, %v146_v30  ;;  %v254_v33 = vpop.f32.mrb[5].mxu0  ;;  %v179_v34 = vadd.f32 %v353_v13, %v178_v31  ;;  %v270_v35 = vpop.f32.mrb[5].mxu1 }
  0xe5   :  { %v149_v36 = vpop.f32.mrb[6].mxu0  ;;  %v181_v37 = vpop.f32.mrb[6].mxu1 }
  0xe6   :  { %v194_v38 = vmax.f32 %v147_v32, 0.0  ;;  %v150_v39 = vadd.f32 %v353_v13, %v149_v36  ;;  %v255_v40 = vpop.f32.mrb[7].mxu0  ;;  %v202_v41 = vmax.f32 %v179_v34, 0.0  ;;  %v182_v42 = vadd.f32 %v353_v13, %v181_v37  ;;  %v271_v43 = vpop.f32.mrb[7].mxu1 }
  0xe8   :  { %207 = vst [vmem:[%s410_s3 + $0x10] sm:$0xff] %v194_v38  ;;  %v195_v44 = vmax.f32 %v150_v39, 0.0  ;;  %215 = vst [vmem:[%s410_s3 + $0x50] sm:$0xff] %v202_v41  ;;  %v203_v45 = vmax.f32 %v182_v42, 0.0 }
  0xea   :  { %208 = vst [vmem:[%s410_s3 + $0x18] sm:$0xff] %v195_v44  ;;  %216 = vst [vmem:[%s410_s3 + $0x58] sm:$0xff] %v203_v45 }
  0xeb   :  { %v154_v46 = vpop.f32.mrb[8].mxu0  ;;  %v186_v47 = vpop.f32.mrb[8].mxu1 }
  0xec   :  { %v155_v48 = vadd.f32 %v353_v13, %v154_v46  ;;  %v258_v49 = vpop.f32.mrb[9].mxu0  ;;  %v187_v50 = vadd.f32 %v353_v13, %v186_v47  ;;  %v274_v51 = vpop.f32.mrb[9].mxu1 }
  0xed   :  { %v157_v52 = vpop.f32.mrb[10].mxu0  ;;  %v189_v53 = vpop.f32.mrb[10].mxu1 }
  0xee   :  { %v196_v54 = vmax.f32 %v155_v48, 0.0  ;;  %v158_v55 = vadd.f32 %v353_v13, %v157_v52  ;;  %v259_v56 = vpop.f32.mrb[11].mxu0  ;;  %v204_v57 = vmax.f32 %v187_v50, 0.0  ;;  %v275_v58 = vpop.f32.mrb[11].mxu1 }
  0xf0   :  { %209 = vst [vmem:[%s410_s3 + $0x20] sm:$0xff] %v196_v54  ;;  %v197_v59 = vmax.f32 %v158_v55, 0.0  ;;  %217 = vst [vmem:[%s410_s3 + $0x60] sm:$0xff] %v204_v57 }
  0xf2   :  { %210 = vst [vmem:[%s410_s3 + $0x28] sm:$0xff] %v197_v59 }
  0xf3   :  { %v162_v60 = vpop.f32.mrb[12].mxu0 }
  0xf4   :  { %v163_v61 = vadd.f32 %v353_v13, %v162_v60  ;;  %v262_v62 = vpop.f32.mrb[13].mxu0 }
  0xf5   :  { %v165_v63 = vpop.f32.mrb[14].mxu0 }
  0xf6   :  { %v198_v0 = vmax.f32 %v163_v61, 0.0  ;;  %v166_v1 = vadd.f32 %v353_v13, %v165_v63  ;;  %v263_v2 = vpop.f32.mrb[15].mxu0 }
  0xf8   :  { %211 = vst [vmem:[%s410_s3 + $0x30] sm:$0xff] %v198_v0  ;;  %v199_v3 = vmax.f32 %v166_v1, 0.0 }
  0xfa   :  { %212 = vst [vmem:[%s410_s3 + $0x38] sm:$0xff] %v199_v3 }

// kernel: fwd.8
= control target key start
LH: loop header
LB: loop body
LE: loop exit
PB: predicated region body
PF: predicated region fallthrough
CT: control target
= control target key end

     0   :  { %s1938_s1 = inlined_call_operand.vmem [shape: bf16[1152,128], index: 1, kind: input, shape index: {}]   ;;  %s1939_s0 = inlined_call_operand.vmem [shape: bf16[56,1152], index: 0, kind: input, shape index: {}]   ;;  %s1940_s2 = inlined_call_operand.vmem [shape: f32[1,128], index: 2, kind: input, shape index: {}]   ;;  %s1941_s3 = inlined_call_operand.vmem [shape: f32[56,128], index: 3, kind: output, shape index: {}]  }
   0x1   :  { %v1462_v0 = vld [vmem:[%s1938_s1 + $0x40] sm:$0xff]   ;;  %v1466_v4 = vld [vmem:[%s1938_s1 + $0x48] sm:$0xff]   ;;  %v1470_v8 = vld [vmem:[%s1938_s1 + $0x50] sm:$0xff]  }
   0x2   :  { %v1463_v1 = vld [vmem:[%s1938_s1 + $0xc0] sm:$0xff]   ;;  %1250 = vmatprep.subr.bf16.mxu0 %v1462_v0  ;;  %v1467_v5 = vld [vmem:[%s1938_s1 + $0xc8] sm:$0xff]   ;;  %v1471_v9 = vld [vmem:[%s1938_s1 + $0xd0] sm:$0xff]  }
   0x3   :  { %v1464_v2 = vld [vmem:[%s1938_s1] sm:$0xff]   ;;  %1290 = vmatprep.subr.bf16.mxu1 %v1463_v1  ;;  %v1468_v6 = vld [vmem:[%s1938_s1 + $0x8] sm:$0xff]   ;;  %v1472_v10 = vld [vmem:[%s1938_s1 + $0x10] sm:$0xff]  }
   0x4   :  { %v1465_v3 = vld [vmem:[%s1938_s1 + $0x80] sm:$0xff]   ;;  %1251 = vmatpush3.bf16.msra.mxu0 %v1464_v2  ;;  %v1469_v7 = vld [vmem:[%s1938_s1 + $0x88] sm:$0xff]   ;;  %v1473_v11 = vld [vmem:[%s1938_s1 + $0x90] sm:$0xff]  }
   0x5   :  { %1291 = vmatpush3.bf16.msra.mxu1 %v1465_v3  ;;  %1252 = vmatprep.subr.bf16.mxu0 %v1466_v4  ;;  %v1474_v12 = vld [vmem:[%s1938_s1 + $0x58] sm:$0xff]   ;;  %v1478_v16 = vld [vmem:[%s1938_s1 + $0x60] sm:$0xff]   ;;  %v1482_v20 = vld [vmem:[%s1938_s1 + $0x68] sm:$0xff]  }
   0x6   :  { %1292 = vmatprep.subr.bf16.mxu1 %v1467_v5  ;;  %v1475_v13 = vld [vmem:[%s1938_s1 + $0xd8] sm:$0xff]   ;;  %v1479_v17 = vld [vmem:[%s1938_s1 + $0xe0] sm:$0xff]   ;;  %v1483_v21 = vld [vmem:[%s1938_s1 + $0xe8] sm:$0xff]  }
   0x7   :  { %v1476_v14 = vld [vmem:[%s1938_s1 + $0x18] sm:$0xff]   ;;  %v1480_v18 = vld [vmem:[%s1938_s1 + $0x20] sm:$0xff]   ;;  %v1484_v22 = vld [vmem:[%s1938_s1 + $0x28] sm:$0xff]  }
   0x8   :  { %1253 = vmatpush3.bf16.msra.mxu0 %v1468_v6  ;;  %v1477_v15 = vld [vmem:[%s1938_s1 + $0x98] sm:$0xff]   ;;  %v1481_v19 = vld [vmem:[%s1938_s1 + $0xa0] sm:$0xff]   ;;  %v1485_v23 = vld [vmem:[%s1938_s1 + $0xa8] sm:$0xff]  }
   0x9   :  { %1293 = vmatpush3.bf16.msra.mxu1 %v1469_v7  ;;  %1254 = vmatprep.subr.bf16.mxu0 %v1470_v8  ;;  %v1486_v24 = vld [vmem:[%s1938_s1 + $0x70] sm:$0xff]   ;;  %v1490_v28 = vld [vmem:[%s1938_s1 + $0x78] sm:$0xff]   ;;  %v1494_v32 = vld [vmem:[%s1939_s0] ss:$36 sps:$4 sm:$0xff]  }
   0xa   :  { %1294 = vmatprep.subr.bf16.mxu1 %v1471_v9  ;;  %v1487_v25 = vld [vmem:[%s1938_s1 + $0xf0] sm:$0xff]   ;;  %v1491_v29 = vld [vmem:[%s1938_s1 + $0xf8] sm:$0xff]   ;;  %v1496_v33 = vld [vmem:[%s1939_s0 + $0x4] ss:$36 sps:$4 sm:$0xff]  }
   0xb   :  { %v1488_v26 = vld [vmem:[%s1938_s1 + $0x30] sm:$0xff]   ;;  %v1492_v30 = vld [vmem:[%s1938_s1 + $0x38] sm:$0xff]   ;;  %v1497_v34 = vld [vmem:[%s1939_s0 + $0x8] ss:$36 sps:$4 sm:$0xff]   ;;  %835 = vmatprep.mubr.bf16.mxu0 %v1496_v33 }
   0xc   :  { %1255 = vmatpush3.bf16.msra.mxu0 %v1472_v10  ;;  %v1489_v27 = vld [vmem:[%s1938_s1 + $0xb0] sm:$0xff]   ;;  %v1493_v31 = vld [vmem:[%s1938_s1 + $0xb8] sm:$0xff]   ;;  %v1500_v36 = vld [vmem:[%s1938_s1 + $0x140] sm:$0xff]  }
   0xd   :  { %1295 = vmatpush3.bf16.msra.mxu1 %v1473_v11  ;;  %1256 = vmatprep.subr.bf16.mxu0 %v1474_v12  ;;  %v1499_v35 = vld [vmem:[%s1939_s0 + $0xc] ss:$36 sps:$4 sm:$0xff]   ;;  %v1501_v37 = vld [vmem:[%s1938_s1 + $0x1c0] sm:$0xff]   ;;  %v1510_v45 = vld [vmem:[%s1939_s0 + $0x54] ss:$36 sps:$4 sm:$0xff]  }
   0xe   :  { %1296 = vmatprep.subr.bf16.mxu1 %v1475_v13  ;;  %899 = vmatprep.mubr.bf16.mxu1 %v1499_v35  ;;  %v1502_v38 = vld [vmem:[%s1938_s1 + $0x100] sm:$0xff]   ;;  %v1504_v40 = vld [vmem:[%s1938_s1 + $0x148] sm:$0xff]   ;;  %v1513_v47 = vld [vmem:[%s1939_s0 + $0x50] ss:$36 sps:$4 sm:$0xff]  }
   0xf   :  { %v1503_v39 = vld [vmem:[%s1938_s1 + $0x180] sm:$0xff]   ;;  %v1505_v41 = vld [vmem:[%s1938_s1 + $0x1c8] sm:$0xff]   ;;  %v1514_v48 = vld [vmem:[%s1938_s1 + $0x150] sm:$0xff]  }
  0x10   :  { %1257 = vmatpush3.bf16.msra.mxu0 %v1476_v14  ;;  %v1506_v42 = vld [vmem:[%s1938_s1 + $0x108] sm:$0xff]   ;;  %v1515_v49 = vld [vmem:[%s1938_s1 + $0x1d0] sm:$0xff]   ;;  %v1518_v52 = vld [vmem:[%s1938_s1 + $0x158] sm:$0xff]  }
  0x11   :  { %1297 = vmatpush3.bf16.msra.mxu1 %v1477_v15  ;;  %1258 = vmatprep.subr.bf16.mxu0 %v1478_v16  ;;  %v1507_v43 = vld [vmem:[%s1938_s1 + $0x188] sm:$0xff]   ;;  %v1516_v50 = vld [vmem:[%s1938_s1 + $0x110] sm:$0xff]   ;;  %v1519_v53 = vld [vmem:[%s1938_s1 + $0x1d8] sm:$0xff]  }
  0x12   :  { %1298 = vmatprep.subr.bf16.mxu1 %v1479_v17  ;;  %v1508_v44 = vld [vmem:[%s1939_s0 + $0x4c] ss:$36 sps:$4 sm:$0xff]   ;;  %v1520_v54 = vld [vmem:[%s1938_s1 + $0x118] sm:$0xff]   ;;  %v1528_v60 = vld [vmem:[%s1938_s1 + $0x160] sm:$0xff]  }
  0x13   :  { %v1512_v46 = vld [vmem:[%s1939_s0 + $0x48] ss:$36 sps:$4 sm:$0xff]   ;;  %v1517_v51 = vld [vmem:[%s1938_s1 + $0x190] sm:$0xff]   ;;  %v1521_v55 = vld [vmem:[%s1938_s1 + $0x198] sm:$0xff]  }
  0x14   :  { %1259 = vmatpush3.bf16.msra.mxu0 %v1480_v18  ;;  %v1522_v56 = vld [vmem:[%s1939_s0 + $0x94] ss:$36 sps:$4 sm:$0xff]   ;;  %v1524_v57 = vld [vmem:[%s1939_s0 + $0x9c] ss:$36 sps:$4 sm:$0xff]   ;;  %v1532_v0 = vld [vmem:[%s1938_s1 + $0x168] sm:$0xff]  }
  0x15   :  { %1299 = vmatpush3.bf16.msra.mxu1 %v1481_v19  ;;  %1260 = vmatprep.subr.bf16.mxu0 %v1482_v20  ;;  %v1526_v58 = vld [vmem:[%s1939_s0 + $0x90] ss:$36 sps:$4 sm:$0xff]   ;;  %v1527_v59 = vld [vmem:[%s1939_s0 + $0x98] ss:$36 sps:$4 sm:$0xff]   ;;  %v1529_v61 = vld [vmem:[%s1938_s1 + $0x1e0] sm:$0xff]  }
  0x16   :  { %1300 = vmatprep.subr.bf16.mxu1 %v1483_v21  ;;  %v1530_v62 = vld [vmem:[%s1938_s1 + $0x120] sm:$0xff]   ;;  %v1533_v1 = vld [vmem:[%s1938_s1 + $0x1e8] sm:$0xff]   ;;  %v45_v4 = vld [vmem:[%s1939_s0 + $0xd8] sm:$0xff] }
  0x17   :  { %v1531_v63 = vld [vmem:[%s1938_s1 + $0x1a0] sm:$0xff]   ;;  %v1534_v2 = vld [vmem:[%s1938_s1 + $0x128] sm:$0xff]   ;;  %v1170_v6 = vcombine.high %v45_v4, %v45_v4  ;;  %v1169_v8 = vcombine.low %v45_v4, %v45_v4  ;;  %v1540_v10 = vld [vmem:[%s1938_s1 + $0x170] sm:$0xff]  }
  0x18   :  { %1261 = vmatpush3.bf16.msra.mxu0 %v1484_v22  ;;  %v1535_v3 = vld [vmem:[%s1938_s1 + $0x1a8] sm:$0xff]   ;;  %v46_v5 = vld [vmem:[%s1939_s0 + $0xe0] sm:$0xff]  ;;  %v1541_v11 = vld [vmem:[%s1938_s1 + $0x1f0] sm:$0xff]  }
  0x19   :  { %1301 = vmatpush3.bf16.msra.mxu1 %v1485_v23  ;;  %1262 = vmatprep.subr.bf16.mxu0 %v1486_v24  ;;  %v1172_v7 = vcombine.high %v46_v5, %v46_v5  ;;  %v1171_v9 = vcombine.low %v46_v5, %v46_v5  ;;  %v1542_v12 = vld [vmem:[%s1938_s1 + $0x130] sm:$0xff]   ;;  %v1544_v14 = vld [vmem:[%s1938_s1 + $0x178] sm:$0xff]   ;;  %v1554_v22 = vld [vmem:[%s1938_s1 + $0x200] sm:$0xff]  }
  0x1a   :  { %1302 = vmatprep.subr.bf16.mxu1 %v1487_v25  ;;  %v1543_v13 = vld [vmem:[%s1938_s1 + $0x1b0] sm:$0xff]   ;;  %v1545_v15 = vld [vmem:[%s1938_s1 + $0x1f8] sm:$0xff]   ;;  %v1555_v23 = vld [vmem:[%s1938_s1 + $0x208] sm:$0xff]  }
  0x1b   :  { %v1546_v16 = vld [vmem:[%s1938_s1 + $0x138] sm:$0xff]   ;;  %v1548_v18 = vld [vmem:[%s1939_s0 + $0x10] ss:$36 sps:$4 sm:$0xff]   ;;  %v1558_v25 = vld [vmem:[%s1939_s0 + $0x64] ss:$36 sps:$4 sm:$0xff]  }
  0x1c   :  { %1263 = vmatpush3.bf16.msra.mxu0 %v1488_v26  ;;  %v1547_v17 = vld [vmem:[%s1938_s1 + $0x1b8] sm:$0xff]   ;;  %v47_v33 = vld [vmem:[%s1939_s0 + $0xe8] sm:$0xff]  ;;  %v1568_v35 = vld [vmem:[%s1939_s0 + $0xa0] ss:$36 sps:$4 sm:$0xff]  }
  0x1d   :  { %1303 = vmatpush3.bf16.msra.mxu1 %v1489_v27  ;;  %1264 = vmatprep.subr.bf16.mxu0 %v1490_v28  ;;  %v1550_v19 = vld [vmem:[%s1939_s0 + $0x14] ss:$36 sps:$4 sm:$0xff]   ;;  %v1553_v21 = vld [vmem:[%s1939_s0 + $0x1c] ss:$36 sps:$4 sm:$0xff]  }
  0x1e   :  { %1304 = vmatprep.subr.bf16.mxu1 %v1491_v29  ;;  %v1551_v20 = vld [vmem:[%s1939_s0 + $0x18] ss:$36 sps:$4 sm:$0xff]   ;;  %v1562_v27 = vld [vmem:[%s1938_s1 + $0x210] sm:$0xff]   ;;  %v1561_v28 = vld [vmem:[%s1939_s0 + $0x60] ss:$36 sps:$4 sm:$0xff]  }
  0x1f   :  { %v1556_v24 = vld [vmem:[%s1939_s0 + $0x5c] ss:$36 sps:$4 sm:$0xff]   ;;  %v1564_v29 = vld [vmem:[%s1939_s0 + $0xa4] ss:$36 sps:$4 sm:$0xff]  }
  0x20   :  { %1265 = vmatpush3.bf16.msra.mxu0 %v1492_v30  ;;  %v1560_v26 = vld [vmem:[%s1939_s0 + $0x58] ss:$36 sps:$4 sm:$0xff]   ;;  %v1566_v30 = vld [vmem:[%s1939_s0 + $0xac] ss:$36 sps:$4 sm:$0xff]  }
  0x21   :  { %1305 = vmatpush3.bf16.msra.mxu1 %v1493_v31  ;;  %1330 = vmatprep.subr.bf16.mxu0 %v1500_v36  ;;  %v1563_v31 = vld [vmem:[%s1938_s1 + $0x218] sm:$0xff]   ;;  %v1569_v36 = vld [vmem:[%s1939_s0 + $0xa8] ss:$36 sps:$4 sm:$0xff]  }
  0x22   :  { %1370 = vmatprep.subr.bf16.mxu1 %v1501_v37  ;;  %v1174_v37 = vcombine.high %v47_v33, %v47_v33 }
  0x23   :  { %836 = vmatmul.mubr.bf16.vlgmr.msra.gmra.mrb[0].mxu0 %v1494_v32  ;;  %v1570_v32 = vld [vmem:[%s1938_s1 + $0x220] sm:$0xff]  }
  0x24   :  { %900 = vmatmul.mubr.bf16.vlgmr.msra.gmra.mrb[0].mxu1 %v1497_v34  ;;  %1331 = vmatpush3.bf16.msra.mxu0 %v1502_v38  ;;  %v48_v34 = vld [vmem:[%s1939_s0 + $0xf0] sm:$0xff] }
  0x25   :  { %1371 = vmatpush3.bf16.msra.mxu1 %v1503_v39  ;;  %1332 = vmatprep.subr.bf16.mxu0 %v1504_v40  ;;  %v1176_v38 = vcombine.high %v48_v34, %v48_v34  ;;  %v1571_v39 = vld [vmem:[%s1938_s1 + $0x228] sm:$0xff]   ;;  %v1576_v40 = vld [vmem:[%s1938_s1 + $0x230] sm:$0xff]  }
  0x26   :  { %1372 = vmatprep.subr.bf16.mxu1 %v1505_v41  ;;  %843 = vmatprep.mubr.bf16.mxu0 %v1508_v44  ;;  %v1173_v41 = vcombine.low %v47_v33, %v47_v33  ;;  %v1579_v44 = vld [vmem:[%s1939_s0 + $0xb0] ss:$36 sps:$4 sm:$0xff]  }
  0x27   :  { %907 = vmatprep.mubr.bf16.mxu1 %v1510_v45  ;;  %v1577_v45 = vld [vmem:[%s1938_s1 + $0x238] sm:$0xff]  }
  0x28   :  { %1333 = vmatpush3.bf16.msra.mxu0 %v1506_v42  ;;  %v1175_v42 = vcombine.low %v48_v34, %v48_v34 }
  0x29   :  { %1373 = vmatpush3.bf16.msra.mxu1 %v1507_v43  ;;  %1334 = vmatprep.subr.bf16.mxu0 %v1514_v48  ;;  %v1578_v43 = vld [vmem:[%s1939_s0 + $0x20] ss:$36 sps:$4 sm:$0xff]  }
  0x2a   :  { %1374 = vmatprep.subr.bf16.mxu1 %v1515_v49 }
  0x2b   :  { %844 = vmatmul.mubr.bf16.gmra.mrb[4].mxu0 %v1512_v46  ;;  %v1580_v46 = vld [vmem:[%s1939_s0 + $0x68] ss:$36 sps:$4 sm:$0xff]  }
  0x2c   :  { %908 = vmatmul.mubr.bf16.gmra.mrb[4].mxu1 %v1513_v47  ;;  %1335 = vmatpush3.bf16.msra.mxu0 %v1516_v50  ;;  %v1581_v47 = vld [vmem:[%s1939_s0 + $0xf8] ss:$0 sps:$4 sm:$0xff]   ;;  %v1141_v50 = vld [vmem:[%s1940_s2] ss:$0 sm:$0xff] }
  0x2d   :  { %1375 = vmatpush3.bf16.msra.mxu1 %v1517_v51  ;;  %1336 = vmatprep.subr.bf16.mxu0 %v1518_v52 }
  0x2e   :  { %1376 = vmatprep.subr.bf16.mxu1 %v1519_v53  ;;  %851 = vmatprep.mubr.bf16.mxu0 %v1522_v56 }
  0x2f   :  { %915 = vmatprep.mubr.bf16.mxu1 %v1524_v57 }
  0x30   :  { %1337 = vmatpush3.bf16.msra.mxu0 %v1520_v54 }
  0x31   :  { %1377 = vmatpush3.bf16.msra.mxu1 %v1521_v55  ;;  %1338 = vmatprep.subr.bf16.mxu0 %v1528_v60 }
  0x32   :  { %1378 = vmatprep.subr.bf16.mxu1 %v1529_v61 }
  0x33   :  { %852 = vmatmul.mubr.bf16.gmra.mrb[8].mxu0 %v1526_v58 }
  0x34   :  { %916 = vmatmul.mubr.bf16.gmra.mrb[8].mxu1 %v1527_v59  ;;  %1339 = vmatpush3.bf16.msra.mxu0 %v1530_v62 }
  0x35   :  { %1379 = vmatpush3.bf16.msra.mxu1 %v1531_v63  ;;  %1340 = vmatprep.subr.bf16.mxu0 %v1532_v0 }
  0x36   :  { %1380 = vmatprep.subr.bf16.mxu1 %v1533_v1  ;;  %859 = vmatprep.mubr.bf16.mxu0 %v1170_v6 }
  0x37   :  { %923 = vmatprep.mubr.bf16.mxu1 %v1172_v7 }
  0x38   :  { %1341 = vmatpush3.bf16.msra.mxu0 %v1534_v2 }
  0x39   :  { %1381 = vmatpush3.bf16.msra.mxu1 %v1535_v3  ;;  %1342 = vmatprep.subr.bf16.mxu0 %v1540_v10 }
  0x3a   :  { %1382 = vmatprep.subr.bf16.mxu1 %v1541_v11 }
  0x3b   :  { %860 = vmatmul.mubr.bf16.gmra.mrb[12].mxu0 %v1169_v8 }
  0x3c   :  { %924 = vmatmul.mubr.bf16.gmra.mrb[12].mxu1 %v1171_v9  ;;  %1343 = vmatpush3.bf16.msra.mxu0 %v1542_v12 }
  0x3d   :  { %1383 = vmatpush3.bf16.msra.mxu1 %v1543_v13  ;;  %1344 = vmatprep.subr.bf16.mxu0 %v1544_v14 }
  0x3e   :  { %1384 = vmatprep.subr.bf16.mxu1 %v1545_v15  ;;  %963 = vmatprep.mubr.bf16.mxu0 %v1550_v19 }
  0x3f   :  { %1027 = vmatprep.mubr.bf16.mxu1 %v1553_v21 }
  0x40   :  { %1345 = vmatpush3.bf16.msra.mxu0 %v1546_v16 }
  0x41   :  { %1385 = vmatpush3.bf16.msra.mxu1 %v1547_v17  ;;  %1422 = vmatprep.subr.bf16.mxu0 %v1554_v22 }
  0x42   :  { %1446 = vmatprep.subr.bf16.mxu1 %v1554_v22 }
  0x43   :  { %964 = vmatmul.mubr.bf16.vlgmr.msra.gmra.mrb[16].mxu0 %v1548_v18 }
  0x44   :  { %1028 = vmatmul.mubr.bf16.vlgmr.msra.gmra.mrb[16].mxu1 %v1551_v20  ;;  %1423 = vmatpush3.bf16.msra.mxu0 %v1554_v22 }
  0x45   :  { %1454 = vmatpush3.bf16.msra.mxu1 %v1554_v22  ;;  %1424 = vmatprep.subr.bf16.mxu0 %v1555_v23 }
  0x46   :  { %1447 = vmatprep.subr.bf16.mxu1 %v1555_v23  ;;  %971 = vmatprep.mubr.bf16.mxu0 %v1556_v24 }
  0x47   :  { %1035 = vmatprep.mubr.bf16.mxu1 %v1558_v25 }
  0x48   :  { %1425 = vmatpush3.bf16.msra.mxu0 %v1555_v23 }
  0x49   :  { %1455 = vmatpush3.bf16.msra.mxu1 %v1555_v23  ;;  %1426 = vmatprep.subr.bf16.mxu0 %v1562_v27 }
  0x4a   :  { %1448 = vmatprep.subr.bf16.mxu1 %v1562_v27 }
  0x4b   :  { %972 = vmatmul.mubr.bf16.gmra.mrb[20].mxu0 %v1560_v26 }
  0x4c   :  { %1036 = vmatmul.mubr.bf16.gmra.mrb[20].mxu1 %v1561_v28  ;;  %979 = vmatprep.mubr.bf16.mxu0 %v1564_v29 }
  0x4d   :  { %1427 = vmatpush3.bf16.msra.mxu0 %v1562_v27  ;;  %1043 = vmatprep.mubr.bf16.mxu1 %v1566_v30 }
  0x4e   :  { %1456 = vmatpush3.bf16.msra.mxu1 %v1562_v27  ;;  %1428 = vmatprep.subr.bf16.mxu0 %v1563_v31 }
  0x4f   :  { %1449 = vmatprep.subr.bf16.mxu1 %v1563_v31 }
  0x51   :  { %1429 = vmatpush3.bf16.msra.mxu0 %v1563_v31 }
  0x52   :  { %1457 = vmatpush3.bf16.msra.mxu1 %v1563_v31  ;;  %1430 = vmatprep.subr.bf16.mxu0 %v1570_v32 }
  0x53   :  { %980 = vmatmul.mubr.bf16.gmra.mrb[24].mxu0 %v1568_v35  ;;  %1450 = vmatprep.subr.bf16.mxu1 %v1570_v32 }
  0x54   :  { %1044 = vmatmul.mubr.bf16.gmra.mrb[24].mxu1 %v1569_v36  ;;  %987 = vmatprep.mubr.bf16.mxu0 %v1174_v37 }
  0x55   :  { %1431 = vmatpush3.bf16.msra.mxu0 %v1570_v32  ;;  %1051 = vmatprep.mubr.bf16.mxu1 %v1176_v38 }
  0x56   :  { %1458 = vmatpush3.bf16.msra.mxu1 %v1570_v32  ;;  %1432 = vmatprep.subr.bf16.mxu0 %v1571_v39 }
  0x57   :  { %1451 = vmatprep.subr.bf16.mxu1 %v1571_v39 }
  0x59   :  { %1433 = vmatpush3.bf16.msra.mxu0 %v1571_v39 }
  0x5a   :  { %1459 = vmatpush3.bf16.msra.mxu1 %v1571_v39  ;;  %1434 = vmatprep.subr.bf16.mxu0 %v1576_v40 }
  0x5b   :  { %988 = vmatmul.mubr.bf16.gmra.mrb[28].mxu0 %v1173_v41  ;;  %1452 = vmatprep.subr.bf16.mxu1 %v1576_v40 }
  0x5c   :  { %1052 = vmatmul.mubr.bf16.gmra.mrb[28].mxu1 %v1175_v42  ;;  %1438 = vmatprep.mubr.bf16.mxu0 %v1578_v43 }
  0x5d   :  { %1435 = vmatpush3.bf16.msra.mxu0 %v1576_v40  ;;  %1442 = vmatprep.mubr.bf16.mxu1 %v1579_v44 }
  0x5e   :  { %1460 = vmatpush3.bf16.msra.mxu1 %v1576_v40  ;;  %1436 = vmatprep.subr.bf16.mxu0 %v1577_v45 }
  0x5f   :  { %1453 = vmatprep.subr.bf16.mxu1 %v1577_v45 }
  0x61   :  { %1437 = vmatpush3.bf16.msra.mxu0 %v1577_v45 }
  0x62   :  { %1461 = vmatpush3.bf16.msra.mxu1 %v1577_v45 }
  0x64   :  { %1439 = vmatmul.mubr.bf16.vlgmr.msra.gmra.mrb[32].mxu0 %v1580_v46 }
  0x65   :  { %1443 = vmatmul.mubr.bf16.vlgmr.msra.gmra.mrb[32].mxu1 %v1581_v47 }
  0xf6   :  { %v1266_v48 = vpop.f32.mrb[0].mxu0 }
  0xf7   :  { %v1306_v49 = vpop.f32.mrb[0].mxu1  ;;  %v1267_v51 = vpop.f32.mrb[1].mxu0 }
  0xf8   :  { %v1268_v52 = vadd.f32 %v1267_v51, %v1266_v48  ;;  %v1307_v53 = vpop.f32.mrb[1].mxu1  ;;  %v1269_v54 = vpop.f32.mrb[2].mxu0 }
  0xf9   :  { %v1308_v55 = vadd.f32 %v1307_v53, %v1306_v49  ;;  %v1309_v56 = vpop.f32.mrb[2].mxu1  ;;  %v1270_v57 = vpop.f32.mrb[3].mxu0 }
  0xfa   :  { %v838_v58 = vadd.f32 %v1268_v52, %v1141_v50  ;;  %v1271_v59 = vadd.f32 %v1270_v57, %v1269_v54  ;;  %v1310_v60 = vpop.f32.mrb[3].mxu1 }
  0xfb   :  { %v1311_v61 = vadd.f32 %v1310_v60, %v1309_v56 }
  0xfc   :  { %v902_v62 = vadd.f32 %v1308_v55, %v838_v58  ;;  %v841_v63 = vadd.f32 %v1271_v59, %v1141_v50 }
  0xfe   :  { %v905_v0 = vadd.f32 %v1311_v61, %v841_v63  ;;  %v1272_v1 = vpop.f32.mrb[4].mxu0 }
  0xff   :  { %v1312_v2 = vpop.f32.mrb[4].mxu1  ;;  %v1273_v3 = vpop.f32.mrb[5].mxu0 }
 0x100   :  { %v1274_v4 = vadd.f32 %v1273_v3, %v1272_v1  ;;  %v1313_v5 = vpop.f32.mrb[5].mxu1  ;;  %v1275_v6 = vpop.f32.mrb[6].mxu0 }
 0x101   :  { %v1314_v7 = vadd.f32 %v1313_v5, %v1312_v2  ;;  %v1315_v8 = vpop.f32.mrb[6].mxu1  ;;  %v1276_v9 = vpop.f32.mrb[7].mxu0 }
 0x102   :  { %v846_v10 = vadd.f32 %v1274_v4, %v1141_v50  ;;  %v1277_v11 = vadd.f32 %v1276_v9, %v1275_v6  ;;  %v1316_v12 = vpop.f32.mrb[7].mxu1 }
 0x103   :  { %v1317_v13 = vadd.f32 %v1316_v12, %v1315_v8 }
 0x104   :  { %v910_v14 = vadd.f32 %v1314_v7, %v846_v10  ;;  %v849_v15 = vadd.f32 %v1277_v11, %v1141_v50 }
 0x106   :  { %v913_v16 = vadd.f32 %v1317_v13, %v849_v15  ;;  %v1278_v17 = vpop.f32.mrb[8].mxu0 }
 0x107   :  { %v1318_v18 = vpop.f32.mrb[8].mxu1  ;;  %v1279_v19 = vpop.f32.mrb[9].mxu0 }
 0x108   :  { %v1280_v20 = vadd.f32 %v1279_v19, %v1278_v17  ;;  %v1319_v21 = vpop.f32.mrb[9].mxu1  ;;  %v1281_v22 = vpop.f32.mrb[10].mxu0 }
 0x109   :  { %v1320_v23 = vadd.f32 %v1319_v21, %v1318_v18  ;;  %v1321_v24 = vpop.f32.mrb[10].mxu1  ;;  %v1282_v25 = vpop.f32.mrb[11].mxu0 }
 0x10a   :  { %v854_v26 = vadd.f32 %v1280_v20, %v1141_v50  ;;  %v1283_v27 = vadd.f32 %v1282_v25, %v1281_v22  ;;  %v1322_v28 = vpop.f32.mrb[11].mxu1 }
 0x10b   :  { %v1323_v29 = vadd.f32 %v1322_v28, %v1321_v24 }
 0x10c   :  { %v918_v30 = vadd.f32 %v1320_v23, %v854_v26  ;;  %v857_v31 = vadd.f32 %v1283_v27, %v1141_v50 }
 0x10e   :  { %v921_v32 = vadd.f32 %v1323_v29, %v857_v31  ;;  %v1284_v33 = vpop.f32.mrb[12].mxu0 }
 0x10f   :  { %v1324_v34 = vpop.f32.mrb[12].mxu1  ;;  %v1285_v35 = vpop.f32.mrb[13].mxu0 }
 0x110   :  { %v1325_v36 = vpop.f32.mrb[13].mxu1  ;;  %v1286_v37 = vadd.f32 %v1285_v35, %v1284_v33  ;;  %v1287_v39 = vpop.f32.mrb[14].mxu0 }
 0x111   :  { %v1326_v38 = vadd.f32 %v1325_v36, %v1324_v34  ;;  %v1327_v40 = vpop.f32.mrb[14].mxu1  ;;  %v1288_v41 = vpop.f32.mrb[15].mxu0 }
 0x112   :  { %v1328_v42 = vpop.f32.mrb[15].mxu1  ;;  %v862_v43 = vadd.f32 %v1286_v37, %v1141_v50 }
 0x114   :  { %v926_v44 = vadd.f32 %v1326_v38, %v862_v43 }
 0x116   :  { %v1346_v45 = vpop.f32.mrb[16].mxu0 }
 0x117   :  { %v1386_v46 = vpop.f32.mrb[16].mxu1  ;;  %v1347_v47 = vpop.f32.mrb[17].mxu0 }
 0x118   :  { %v1348_v48 = vadd.f32 %v1347_v47, %v1346_v45  ;;  %v1387_v49 = vpop.f32.mrb[17].mxu1  ;;  %v1349_v51 = vpop.f32.mrb[18].mxu0 }
 0x119   :  { %v1388_v52 = vadd.f32 %v1387_v49, %v1386_v46  ;;  %v1389_v53 = vpop.f32.mrb[18].mxu1  ;;  %v1350_v54 = vpop.f32.mrb[19].mxu0 }
 0x11a   :  { %v966_v55 = vadd.f32 %v1348_v48, %v902_v62  ;;  %v1351_v56 = vadd.f32 %v1350_v54, %v1349_v51  ;;  %v1390_v57 = vpop.f32.mrb[19].mxu1 }
 0x11b   :  { %v1391_v58 = vadd.f32 %v1390_v57, %v1389_v53 }
 0x11c   :  { %v969_v59 = vadd.f32 %v1351_v56, %v905_v0  ;;  %v1030_v60 = vadd.f32 %v1388_v52, %v966_v55 }
 0x11e   :  { %v1352_v61 = vpop.f32.mrb[20].mxu0  ;;  %v1033_v63 = vadd.f32 %v1391_v58, %v969_v59 }
 0x11f   :  { %v1392_v1 = vpop.f32.mrb[20].mxu1  ;;  %v1353_v50 = vpop.f32.mrb[21].mxu0 }
 0x120   :  { %v1354_v2 = vadd.f32 %v1353_v50, %v1352_v61  ;;  %v1393_v3 = vpop.f32.mrb[21].mxu1  ;;  %v1355_v4 = vpop.f32.mrb[22].mxu0 }
 0x121   :  { %v1394_v5 = vadd.f32 %v1393_v3, %v1392_v1  ;;  %v1395_v6 = vpop.f32.mrb[22].mxu1  ;;  %v1356_v7 = vpop.f32.mrb[23].mxu0 }
 0x122   :  { %v974_v8 = vadd.f32 %v1354_v2, %v910_v14  ;;  %v1357_v9 = vadd.f32 %v1356_v7, %v1355_v4  ;;  %v1396_v10 = vpop.f32.mrb[23].mxu1 }
 0x123   :  { %v1397_v11 = vadd.f32 %v1396_v10, %v1395_v6 }
 0x124   :  { %v977_v62 = vadd.f32 %v1357_v9, %v913_v16  ;;  %v1038_v12 = vadd.f32 %v1394_v5, %v974_v8 }
 0x126   :  { %v1358_v13 = vpop.f32.mrb[24].mxu0  ;;  %v1041_v15 = vadd.f32 %v1397_v11, %v977_v62 }
 0x127   :  { %v1398_v0 = vpop.f32.mrb[24].mxu1  ;;  %v1359_v17 = vpop.f32.mrb[25].mxu0 }
 0x128   :  { %v1360_v18 = vadd.f32 %v1359_v17, %v1358_v13  ;;  %v1399_v19 = vpop.f32.mrb[25].mxu1  ;;  %v1361_v20 = vpop.f32.mrb[26].mxu0 }
 0x129   :  { %v1400_v21 = vadd.f32 %v1399_v19, %v1398_v0  ;;  %v1401_v22 = vpop.f32.mrb[26].mxu1  ;;  %v1362_v23 = vpop.f32.mrb[27].mxu0 }
 0x12a   :  { %v982_v24 = vadd.f32 %v1360_v18, %v918_v30  ;;  %v1363_v25 = vadd.f32 %v1362_v23, %v1361_v20  ;;  %v1402_v26 = vpop.f32.mrb[27].mxu1 }
 0x12b   :  { %v1403_v27 = vadd.f32 %v1402_v26, %v1401_v22 }
 0x12c   :  { %v985_v14 = vadd.f32 %v1363_v25, %v921_v32  ;;  %v1046_v28 = vadd.f32 %v1400_v21, %v982_v24 }
 0x12e   :  { %v1364_v29 = vpop.f32.mrb[28].mxu0  ;;  %v1049_v31 = vadd.f32 %v1403_v27, %v985_v14 }
 0x12f   :  { %v1404_v16 = vpop.f32.mrb[28].mxu1  ;;  %v1365_v33 = vpop.f32.mrb[29].mxu0 }
 0x130   :  { %v1366_v34 = vadd.f32 %v1365_v33, %v1364_v29  ;;  %v1405_v35 = vpop.f32.mrb[29].mxu1  ;;  %v1367_v36 = vpop.f32.mrb[30].mxu0 }
 0x131   :  { %v1406_v37 = vadd.f32 %v1405_v35, %v1404_v16  ;;  %v1407_v38 = vpop.f32.mrb[30].mxu1  ;;  %v1368_v39 = vpop.f32.mrb[31].mxu0 }
 0x132   :  { %v990_v40 = vadd.f32 %v1366_v34, %v926_v44  ;;  %v1408_v41 = vpop.f32.mrb[31].mxu1 }
 0x134   :  { %v1054_v42 = vadd.f32 %v1406_v37, %v990_v40 }
 0x137   :  { %v1440_v43 = vpop.f32.mrb[32].mxu0 }
 0x138   :  { %v1102_v30 = vadd.f32 %v1440_v43, %v1038_v12  ;;  %v1444_v45 = vpop.f32.mrb[32].mxu1  ;;  %v1093_v46 = vpop.f32.mrb[33].mxu0 }
 0x139   :  { %v1118_v47 = vadd.f32 %v1444_v45, %v1054_v42  ;;  %v1094_v32 = vadd.f32 %v1093_v46, %v1030_v60  ;;  %v1109_v48 = vpop.f32.mrb[33].mxu1  ;;  %v1441_v49 = vpop.f32.mrb[34].mxu0 }
 0x13a   :  { %v1125_v51 = vmax.f32 %v1102_v30, 0.0  ;;  %v1110_v52 = vadd.f32 %v1109_v48, %v1046_v28  ;;  %v1105_v53 = vadd.f32 %v1441_v49, %v1041_v15  ;;  %v1445_v54 = vpop.f32.mrb[34].mxu1  ;;  %v1096_v55 = vpop.f32.mrb[35].mxu0 }
 0x13b   :  { %v1129_v56 = vmax.f32 %v1118_v47, 0.0  ;;  %v1123_v57 = vmax.f32 %v1094_v32, 0.0  ;;  %v1097_v58 = vadd.f32 %v1096_v55, %v1033_v63  ;;  %v1112_v59 = vpop.f32.mrb[35].mxu1 }
 0x13c   :  { %1132 = vst [vmem:[%s1941_s3 + $0x10] sm:$0xff] %v1125_v51  ;;  %v1127_v44 = vmax.f32 %v1110_v52, 0.0  ;;  %v1126_v61 = vmax.f32 %v1105_v53, 0.0  ;;  %v1113_v1 = vadd.f32 %v1112_v59, %v1049_v31 }
 0x13d   :  { %1136 = vst [vmem:[%s1941_s3 + $0x30] sm:$0xff] %v1129_v56  ;;  %1130 = vst [vmem:[%s1941_s3] sm:$0xff] %v1123_v57  ;;  %v1124_v60 = vmax.f32 %v1097_v58, 0.0 }
 0x13e   :  { %1134 = vst [vmem:[%s1941_s3 + $0x20] sm:$0xff] %v1127_v44  ;;  %1133 = vst [vmem:[%s1941_s3 + $0x18] sm:$0xff] %v1126_v61  ;;  %v1128_v63 = vmax.f32 %v1113_v1, 0.0 }
 0x13f   :  { %1131 = vst [vmem:[%s1941_s3 + $0x8] sm:$0xff] %v1124_v60 }
 0x140   :  { %1135 = vst [vmem:[%s1941_s3 + $0x28] sm:$0xff] %v1128_v63 }

// kernel: fwd.9
= control target key start
LH: loop header
LB: loop body
LE: loop exit
PB: predicated region body
PF: predicated region fallthrough
CT: control target
= control target key end

     0   :  { %v671_v33 = vmov 0.0   ;;  %vm672_vm0 = vmmov 0   ;;  %s837_s1 = inlined_call_operand.vmem [shape: bf16[640,128], index: 1, kind: input, shape index: {}]   ;;  %s838_s0 = inlined_call_operand.vmem [shape: bf16[16,640], index: 0, kind: input, shape index: {}]   ;;  %s839_s2 = inlined_call_operand.vmem [shape: f32[1,128], index: 2, kind: input, shape index: {}]   ;;  %s840_s3 = inlined_call_operand.vmem [shape: f32[16,128], index: 3, kind: output, shape index: {}]  }
   0x1   :  { %v624_v0 = vld [vmem:[%s837_s1 + $0x40] sm:$0xff]   ;;  %v628_v4 = vld [vmem:[%s837_s1 + $0x48] sm:$0xff]   ;;  %v632_v8 = vld [vmem:[%s837_s1 + $0x50] sm:$0xff]  }
   0x2   :  { %v625_v1 = vld [vmem:[%s837_s1] sm:$0xff]   ;;  %549 = vmatprep.subr.bf16.mxu0 %v624_v0  ;;  %v629_v5 = vld [vmem:[%s837_s1 + $0x8] sm:$0xff]   ;;  %v633_v9 = vld [vmem:[%s837_s1 + $0x10] sm:$0xff]  }
   0x3   :  { %v626_v2 = vld [vmem:[%s837_s1 + $0xc0] sm:$0xff]   ;;  %550 = vmatpush3.bf16.msra.mxu0 %v625_v1  ;;  %v630_v6 = vld [vmem:[%s837_s1 + $0xc8] sm:$0xff]   ;;  %v634_v10 = vld [vmem:[%s837_s1 + $0xd0] sm:$0xff]  }
   0x4   :  { %v627_v3 = vld [vmem:[%s837_s1 + $0x80] sm:$0xff]   ;;  %571 = vmatprep.subr.bf16.mxu1 %v626_v2  ;;  %551 = vmatprep.subr.bf16.mxu0 %v628_v4  ;;  %v631_v7 = vld [vmem:[%s837_s1 + $0x88] sm:$0xff]   ;;  %v635_v11 = vld [vmem:[%s837_s1 + $0x90] sm:$0xff]  }
   0x5   :  { %572 = vmatpush3.bf16.msra.mxu1 %v627_v3  ;;  %v636_v12 = vld [vmem:[%s837_s1 + $0x58] sm:$0xff]   ;;  %v640_v16 = vld [vmem:[%s837_s1 + $0x60] sm:$0xff]   ;;  %v644_v20 = vld [vmem:[%s837_s1 + $0x68] sm:$0xff]  }
   0x6   :  { %573 = vmatprep.subr.bf16.mxu1 %v630_v6  ;;  %v637_v13 = vld [vmem:[%s837_s1 + $0x18] sm:$0xff]   ;;  %v641_v17 = vld [vmem:[%s837_s1 + $0x20] sm:$0xff]   ;;  %v645_v21 = vld [vmem:[%s837_s1 + $0x28] sm:$0xff]  }
   0x7   :  { %552 = vmatpush3.bf16.msra.mxu0 %v629_v5  ;;  %v638_v14 = vld [vmem:[%s837_s1 + $0xd8] sm:$0xff]   ;;  %v642_v18 = vld [vmem:[%s837_s1 + $0xe0] sm:$0xff]   ;;  %v646_v22 = vld [vmem:[%s837_s1 + $0xe8] sm:$0xff]  }
   0x8   :  { %553 = vmatprep.subr.bf16.mxu0 %v632_v8  ;;  %v639_v15 = vld [vmem:[%s837_s1 + $0x98] sm:$0xff]   ;;  %v643_v19 = vld [vmem:[%s837_s1 + $0xa0] sm:$0xff]   ;;  %v647_v23 = vld [vmem:[%s837_s1 + $0xa8] sm:$0xff]  }
   0x9   :  { %574 = vmatpush3.bf16.msra.mxu1 %v631_v7  ;;  %v648_v24 = vld [vmem:[%s837_s1 + $0x70] sm:$0xff]   ;;  %v652_v28 = vld [vmem:[%s837_s1 + $0x78] sm:$0xff]   ;;  %v661_v36 = vld [vmem:[%s838_s0 + $0xc] ss:$20 sps:$4 sm:$0xff]  }
   0xa   :  { %575 = vmatprep.subr.bf16.mxu1 %v634_v10  ;;  %v649_v25 = vld [vmem:[%s837_s1 + $0x30] sm:$0xff]   ;;  %v653_v29 = vld [vmem:[%s837_s1 + $0x38] sm:$0xff]   ;;  %v662_v37 = vld [vmem:[%s837_s1 + $0x100] sm:$0xff]   ;;  %447 = vmatprep.mubr.bf16.mxu1 %v661_v36 }
   0xb   :  { %554 = vmatpush3.bf16.msra.mxu0 %v633_v9  ;;  %v650_v26 = vld [vmem:[%s837_s1 + $0xf0] sm:$0xff]   ;;  %v654_v30 = vld [vmem:[%s837_s1 + $0xf8] sm:$0xff]   ;;  %v663_v38 = vld [vmem:[%s837_s1 + $0x108] sm:$0xff]  }
   0xc   :  { %555 = vmatprep.subr.bf16.mxu0 %v636_v12  ;;  %v651_v27 = vld [vmem:[%s837_s1 + $0xb0] sm:$0xff]   ;;  %v657_v32 = vld [vmem:[%s838_s0 + $0x4] ss:$20 sps:$4 sm:$0xff]   ;;  %v659_v35 = vld [vmem:[%s838_s0 + $0x8] ss:$20 sps:$4 sm:$0xff]  }
   0xd   :  { %576 = vmatpush3.bf16.msra.mxu1 %v635_v11  ;;  %v655_v31 = vld [vmem:[%s838_s0] ss:$20 sps:$4 sm:$0xff]   ;;  %v658_v34 = vld [vmem:[%s837_s1 + $0xb8] sm:$0xff]   ;;  %406 = vmatprep.mubr.bf16.mxu0 %v657_v32  ;;  %v667_v42 = vld [vmem:[%s837_s1 + $0x128] sm:$0xff]  }
   0xe   :  { %577 = vmatprep.subr.bf16.mxu1 %v638_v14  ;;  %v664_v39 = vld [vmem:[%s837_s1 + $0x110] sm:$0xff]   ;;  %v665_v40 = vld [vmem:[%s837_s1 + $0x118] sm:$0xff]   ;;  %v666_v41 = vld [vmem:[%s837_s1 + $0x120] sm:$0xff]  }
   0xf   :  { %556 = vmatpush3.bf16.msra.mxu0 %v637_v13  ;;  %v668_v43 = vld [vmem:[%s837_s1 + $0x130] sm:$0xff]   ;;  %v669_v44 = vld [vmem:[%s837_s1 + $0x138] sm:$0xff]   ;;  %v503_v47 = vld [vmem:[%s839_s2] ss:$0 sm:$0xff] }
  0x10   :  { %557 = vmatprep.subr.bf16.mxu0 %v640_v16  ;;  %v670_v45 = vld [vmem:[%s838_s0 + $0x10] ss:$20 sps:$4 sm:$0xff]  }
  0x11   :  { %578 = vmatpush3.bf16.msra.mxu1 %v639_v15 }
  0x12   :  { %579 = vmatprep.subr.bf16.mxu1 %v642_v18 }
  0x13   :  { %558 = vmatpush3.bf16.msra.mxu0 %v641_v17 }
  0x14   :  { %559 = vmatprep.subr.bf16.mxu0 %v644_v20 }
  0x15   :  { %580 = vmatpush3.bf16.msra.mxu1 %v643_v19 }
  0x16   :  { %581 = vmatprep.subr.bf16.mxu1 %v646_v22 }
  0x17   :  { %560 = vmatpush3.bf16.msra.mxu0 %v645_v21 }
  0x18   :  { %561 = vmatprep.subr.bf16.mxu0 %v648_v24 }
  0x19   :  { %582 = vmatpush3.bf16.msra.mxu1 %v647_v23 }
  0x1a   :  { %583 = vmatprep.subr.bf16.mxu1 %v650_v26 }
  0x1b   :  { %562 = vmatpush3.bf16.msra.mxu0 %v649_v25 }
  0x1c   :  { %563 = vmatprep.subr.bf16.mxu0 %v652_v28 }
  0x1d   :  { %584 = vmatpush3.bf16.msra.mxu1 %v651_v27 }
  0x1e   :  { %585 = vmatprep.subr.bf16.mxu1 %v654_v30 }
  0x1f   :  { %564 = vmatpush3.bf16.msra.mxu0 %v653_v29 }
  0x20   :  { %602 = vmatprep.subr.bf16.mxu0 %v671_v33 }
  0x21   :  { %586 = vmatpush3.bf16.msra.mxu1 %v658_v34 }
  0x22   :  { %407 = vmatmul.mubr.bf16.vlgmr.msra.gmra.mrb[0].mxu0 %v655_v31 }
  0x23   :  { %618 = vmatprep.mubr.msk.bf16.mxu0 %vm672_vm0, %v671_v33  ;;  %603 = vmatpush3.bf16.msra.mxu0 %v662_v37 }
  0x24   :  { %448 = vmatmul.mubr.bf16.vlgmr.msra.gmra.mrb[0].mxu1 %v659_v35  ;;  %604 = vmatprep.subr.bf16.mxu0 %v671_v33 }
  0x27   :  { %605 = vmatpush3.bf16.msra.mxu0 %v663_v38 }
  0x28   :  { %606 = vmatprep.subr.bf16.mxu0 %v671_v33 }
  0x2b   :  { %607 = vmatpush3.bf16.msra.mxu0 %v664_v39 }
  0x2c   :  { %608 = vmatprep.subr.bf16.mxu0 %v671_v33 }
  0x2f   :  { %609 = vmatpush3.bf16.msra.mxu0 %v665_v40 }
  0x30   :  { %610 = vmatprep.subr.bf16.mxu0 %v671_v33 }
  0x33   :  { %611 = vmatpush3.bf16.msra.mxu0 %v666_v41 }
  0x34   :  { %612 = vmatprep.subr.bf16.mxu0 %v671_v33 }
  0x37   :  { %613 = vmatpush3.bf16.msra.mxu0 %v667_v42 }
  0x38   :  { %614 = vmatprep.subr.bf16.mxu0 %v671_v33 }
  0x3b   :  { %615 = vmatpush3.bf16.msra.mxu0 %v668_v43 }
  0x3c   :  { %616 = vmatprep.subr.bf16.mxu0 %v671_v33 }
  0x3f   :  { %617 = vmatpush3.bf16.msra.mxu0 %v669_v44 }
  0x42   :  { %619 = vmatmul.mubr.bf16.vlgmr.msra.gmra.mrb[4].mxu0 %v670_v45 }
  0xf5   :  { %v565_v46 = vpop.f32.mrb[0].mxu0 }
  0xf6   :  { %v566_v48 = vpop.f32.mrb[1].mxu0 }
  0xf7   :  { %v567_v49 = vadd.f32 %v566_v48, %v565_v46  ;;  %v568_v50 = vpop.f32.mrb[2].mxu0  ;;  %v587_v51 = vpop.f32.mrb[0].mxu1 }
  0xf8   :  { %v569_v52 = vpop.f32.mrb[3].mxu0  ;;  %v588_v55 = vpop.f32.mrb[1].mxu1 }
  0xf9   :  { %v409_v53 = vadd.f32 %v567_v49, %v503_v47  ;;  %v570_v54 = vadd.f32 %v569_v52, %v568_v50  ;;  %v589_v56 = vadd.f32 %v588_v55, %v587_v51  ;;  %v590_v57 = vpop.f32.mrb[2].mxu1 }
  0xfa   :  { %v591_v59 = vpop.f32.mrb[3].mxu1 }
  0xfb   :  { %v412_v58 = vadd.f32 %v570_v54, %v503_v47  ;;  %v592_v60 = vadd.f32 %v591_v59, %v590_v57  ;;  %v450_v61 = vadd.f32 %v589_v56, %v409_v53 }
  0xfd   :  { %v453_v62 = vadd.f32 %v592_v60, %v412_v58 }
 0x115   :  { %v490_v63 = vpop.f32.mrb[4].mxu0 }
 0x116   :  { %v491_v0 = vadd.f32 %v490_v63, %v450_v61  ;;  %v620_v1 = vpop.f32.mrb[5].mxu0 }
 0x117   :  { %v493_v2 = vpop.f32.mrb[6].mxu0 }
 0x118   :  { %497 = vst [vmem:[%s840_s3] sm:$0xff] %v491_v0  ;;  %v494_v3 = vadd.f32 %v493_v2, %v453_v62  ;;  %v621_v4 = vpop.f32.mrb[7].mxu0 }
 0x11a   :  { %498 = vst [vmem:[%s840_s3 + $0x8] sm:$0xff] %v494_v3 }

// kernel: fwd.10
= control target key start
LH: loop header
LB: loop body
LE: loop exit
PB: predicated region body
PF: predicated region fallthrough
CT: control target
= control target key end

     0   :  { %v212_v1 = vmov 0   ;;  %v34_v18 = vlaneseq  ;;  %s293_s1 = inlined_call_operand.vmem [shape: bf16[128,256], index: 1, kind: input, shape index: {}]   ;;  %s294_s0 = inlined_call_operand.vmem [shape: bf16[8,128], index: 0, kind: input, shape index: {}]   ;;  %s295_s2 = inlined_call_operand.vmem [shape: f32[1,256], index: 2, kind: input, shape index: {}]   ;;  %s296_s3 = inlined_call_operand.vmem [shape: f32[8,256], index: 3, kind: output, shape index: {}]  }
   0x1   :  { %v188_v0 = vld [vmem:[%s293_s1 + $0x4] ss:$8 sps:$4 sm:$0xff]   ;;  %156 = vmatprep.mubr.bf16.mxu0 %v212_v1  ;;  %v190_v2 = vld [vmem:[%s293_s1] ss:$8 sps:$4 sm:$0xff]   ;;  %v191_v3 = vld [vmem:[%s293_s1 + $0x14] ss:$8 sps:$4 sm:$0xff]  }
   0x2   :  { %124 = vmatprep.subr.bf16.mxu0 %v188_v0  ;;  %v193_v4 = vld [vmem:[%s293_s1 + $0x10] ss:$8 sps:$4 sm:$0xff]   ;;  %v194_v5 = vld [vmem:[%s293_s1 + $0x24] ss:$8 sps:$4 sm:$0xff]   ;;  %v196_v6 = vld [vmem:[%s293_s1 + $0x20] ss:$8 sps:$4 sm:$0xff]  }
   0x3   :  { %125 = vmatpush1.bf16.msra.mxu0 %v190_v2  ;;  %v197_v7 = vld [vmem:[%s293_s1 + $0x34] ss:$8 sps:$4 sm:$0xff]   ;;  %v199_v8 = vld [vmem:[%s293_s1 + $0x30] ss:$8 sps:$4 sm:$0xff]   ;;  %v200_v9 = vld [vmem:[%s293_s1 + $0x44] ss:$8 sps:$4 sm:$0xff]  }
   0x4   :  { %126 = vmatprep.subr.bf16.mxu0 %v191_v3  ;;  %v202_v10 = vld [vmem:[%s293_s1 + $0x40] ss:$8 sps:$4 sm:$0xff]   ;;  %v203_v11 = vld [vmem:[%s293_s1 + $0x54] ss:$8 sps:$4 sm:$0xff]   ;;  %v205_v12 = vld [vmem:[%s293_s1 + $0x50] ss:$8 sps:$4 sm:$0xff]  }
   0x5   :  { %v206_v13 = vld [vmem:[%s293_s1 + $0x64] ss:$8 sps:$4 sm:$0xff]   ;;  %v208_v14 = vld [vmem:[%s293_s1 + $0x60] ss:$8 sps:$4 sm:$0xff]   ;;  %v209_v15 = vld [vmem:[%s293_s1 + $0x74] ss:$8 sps:$4 sm:$0xff]  }
   0x6   :  { %v211_v16 = vld [vmem:[%s293_s1 + $0x70] ss:$8 sps:$4 sm:$0xff]   ;;  %v15_v17 = vld [vmem:[%s294_s0] sm:$0xf]  ;;  %v35_v19 = vshrl.u32 %v34_v18, 7 }
   0x7   :  { %127 = vmatpush1.bf16.msra.mxu0 %v193_v4  ;;  %v32_v21 = vld [vmem:[%s295_s2] sm:$0x3] }
   0x8   :  { %128 = vmatprep.subr.bf16.mxu0 %v194_v5  ;;  %v36_v20 = vsub.s32 0, %v35_v19  ;;  %v40_v22 = vsub.s32 1, %v35_v19 }
   0xa   :  { %v37_v23 = vrot.slane %v32_v21, %v36_v20  ;;  %v41_v24 = vrot.slane %v32_v21, %v40_v22 }
   0xb   :  { %129 = vmatpush1.bf16.msra.mxu0 %v196_v6 }
   0xc   :  { %130 = vmatprep.subr.bf16.mxu0 %v197_v7 }
   0xf   :  { %131 = vmatpush1.bf16.msra.mxu0 %v199_v8 }
  0x10   :  { %132 = vmatprep.subr.bf16.mxu0 %v200_v9 }
  0x13   :  { %133 = vmatpush1.bf16.msra.mxu0 %v202_v10 }
  0x14   :  { %134 = vmatprep.subr.bf16.mxu0 %v203_v11 }
  0x17   :  { %135 = vmatpush1.bf16.msra.mxu0 %v205_v12 }
  0x18   :  { %136 = vmatprep.subr.bf16.mxu0 %v206_v13 }
  0x1b   :  { %137 = vmatpush1.bf16.msra.mxu0 %v208_v14 }
  0x1c   :  { %138 = vmatprep.subr.bf16.mxu0 %v209_v15 }
  0x1f   :  { %139 = vmatpush1.bf16.msra.mxu0 %v211_v16 }
  0x22   :  { %157 = vmatmul.mubr.bf16.vlgmr.msra.gmra.mrb[0].mxu0 %v15_v17 }
  0xf5   :  { %v158_v25 = vpop.f32.mrb[0].mxu0 }
  0xf6   :  { %v159_v26 = vadd.f32 %v158_v25, %v37_v23  ;;  %v160_v27 = vpop.f32.mrb[1].mxu0 }
  0xf7   :  { %v161_v28 = vadd.f32 %v160_v27, %v41_v24  ;;  %v162_v29 = vpop.f32.mrb[2].mxu0 }
  0xf8   :  { %165 = vst [vmem:[%s296_s3] sm:$0xff] %v159_v26  ;;  %v163_v30 = vpop.f32.mrb[3].mxu0 }
  0xf9   :  { %166 = vst [vmem:[%s296_s3 + $0x8] sm:$0xff] %v161_v28 }

// kernel: fwd.13
= control target key start
LH: loop header
LB: loop body
LE: loop exit
PB: predicated region body
PF: predicated region fallthrough
CT: control target
= control target key end

     0   :  { %s107_s0 = inlined_call_operand.vmem [shape: f32[16,128], index: 0, kind: input, shape index: {}]   ;;  %s108_s1 = inlined_call_operand.vmem [shape: f32[1,128], index: 1, kind: input, shape index: {}]   ;;  %s109_s2 = inlined_call_operand.vmem [shape: f32[1,128], index: 2, kind: input, shape index: {}]   ;;  %s110_s3 = inlined_call_operand.vmem [shape: f32[16,128], index: 3, kind: output, shape index: {}]  }
   0x1   :  { %v14_v0 = vld [vmem:[%s107_s0] sm:$0xff]  ;;  %v15_v1 = vld [vmem:[%s107_s0 + $0x8] sm:$0xff] }
   0x2   :  { %18 = vadd.xlane.f32.xlu0 %v14_v0  ;;  %v63_v17 = vld [vmem:[%s108_s1] ss:$0 sm:$0xff] }
   0x3   :  { %v64_v19 = vld [vmem:[%s109_s2] ss:$0 sm:$0xff] }
   0x6   :  { %20 = vadd.xlane.f32.xlu0 %v15_v1 }
  0x8f   :  { %v19_v2 = vpop.xlane.xlu0 %18 }
  0x90   :  { %v23_v3 = vmul.f32 0.0078125, %v19_v2 }
  0x92   :  { %v25_v4 = vsub.f32 %v14_v0, %v23_v3 }
  0x93   :  { %v21_v5 = vpop.xlane.xlu0 %20 }
  0x94   :  { %v24_v6 = vmul.f32 0.0078125, %v21_v5  ;;  %v27_v7 = vmul.f32 %v25_v4, %v25_v4 }
  0x96   :  { %v26_v8 = vsub.f32 %v15_v1, %v24_v6  ;;  %29 = vadd.xlane.f32.xlu1 %v27_v7 }
  0x98   :  { %v28_v9 = vmul.f32 %v26_v8, %v26_v8 }
  0x9a   :  { %31 = vadd.xlane.f32.xlu1 %v28_v9 }
 0x123   :  { %v30_v10 = vpop.xlane.xlu1 %29 }
 0x124   :  { %v33_v11 = vmul.f32 0.0078125, %v30_v10 }
 0x126   :  { %v35_v12 = vadd.f32 1e-05, %v33_v11 }
 0x127   :  { %v32_v13 = vpop.xlane.xlu1 %31 }
 0x128   :  { %65 = vrsqrt.f32 %v35_v12  ;;  %v34_v14 = vmul.f32 0.0078125, %v32_v13 }
 0x12a   :  { %v36_v15 = vadd.f32 1e-05, %v34_v14 }
 0x12c   :  { %67 = vrsqrt.f32 %v36_v15 }
 0x132   :  { %v66_v16 = vpop.eup %65 }
 0x133   :  { %v39_v18 = vmul.f32 %v66_v16, %v25_v4 }
 0x135   :  { %v47_v20 = vmul.f32 %v63_v17, %v39_v18 }
 0x136   :  { %v68_v21 = vpop.eup %67 }
 0x137   :  { %v55_v22 = vadd.f32 %v64_v19, %v47_v20  ;;  %v40_v23 = vmul.f32 %v68_v21, %v26_v8 }
 0x139   :  { %57 = vst [vmem:[%s110_s3] sm:$0xff] %v55_v22  ;;  %v48_v24 = vmul.f32 %v63_v17, %v40_v23 }
 0x13b   :  { %v56_v25 = vadd.f32 %v64_v19, %v48_v24 }
 0x13d   :  { %58 = vst [vmem:[%s110_s3 + $0x8] sm:$0xff] %v56_v25 }

// kernel: fwd.11
= control target key start
LH: loop header
LB: loop body
LE: loop exit
PB: predicated region body
PF: predicated region fallthrough
CT: control target
= control target key end

     0   :  { %s3454_s21 = smov 0   ;;  %s4120_s0 = inlined_call_operand.vmem [shape: f32[2,5,128], index: 0, kind: input, shape index: {}]   ;;  %s4121_s1 = inlined_call_operand.vmem [shape: f32[19,128], index: 1, kind: input, shape index: {}]   ;;  %s4122_s2 = inlined_call_operand.vmem [shape: f32[1,256], index: 2, kind: input, shape index: {}]   ;;  %s4123_s3 = inlined_call_operand.vmem [shape: bf16[128,256], index: 3, kind: input, shape index: {}]   ;;  %s4124_s4 = inlined_call_operand.vmem [shape: bf16[256,128], index: 4, kind: input, shape index: {}]   ;;  %s4125_s5 = inlined_call_operand.vmem [shape: bf16[128,384], index: 5, kind: input, shape index: {}]   ;;  %s4126_s6 = inlined_call_operand.vmem [shape: f32[1,384], index: 6, kind: input, shape index: {}]   ;;  %s4127_s7 = inlined_call_operand.vmem [shape: bf16[5,128], index: 7, kind: input, shape index: {}]   ;;  %s4128_s8 = inlined_call_operand.vmem [shape: bf16[128,128], index: 8, kind: input, shape index: {}]   ;;  %s4129_s9 = inlined_call_operand.vmem [shape: bf16[128,128], index: 9, kind: input, shape index: {}]   ;;  %s4130_s10 = inlined_call_operand.vmem [shape: bf16[128,128], index: 10, kind: input, shape index: {}]   ;;  %s4131_s11 = inlined_call_operand.vmem [shape: f32[15,128], index: 11, kind: input, shape index: {}]   ;;  %s4132_s12 = inlined_call_operand.vmem [shape: bf16[128,128], index: 12, kind: input, shape index: {}]   ;;  %s4133_s13 = inlined_call_operand.vmem [shape: f32[1,256], index: 13, kind: input, shape index: {}]   ;;  %s4134_s14 = inlined_call_operand.vmem [shape: bf16[128,256], index: 14, kind: input, shape index: {}]   ;;  %s4135_s15 = inlined_call_operand.vmem [shape: bf16[256,128], index: 15, kind: input, shape index: {}]   ;;  %s4136_s16 = inlined_call_operand.vmem [shape: f32[2,5,128], index: 16, kind: output, shape index: {}]  }
   0x1   :  { %4137 = sst [smem:[#allocation3_spill]] %s4120_s0 }
   0x2 LB: > { %s2728_s22 = sadd.s32 4294967295, %s3360_s21   ;;  %p2732_p0 = scmp.ge.s32.totalorder %s3360_s21, 1  ;;  %s3360_s21 = sphi %s3454_s21, %s26_s21  }
   0x3   : > { %p461_p1 = scmp.lt.s32.totalorder %s3360_s21, 3 }
   0x5   : > { %p462_p2 = pnand %p2732_p0, %p461_p1 }
   0x6   : > { %p509_p3 = scmp.lt.s32.totalorder (!%p462_p2), %s2728_s22, 1  ;;  %vm521_vm0 = vcmask (!%p462_p2), 1044480   ;;  %s4138_s26 = sld [smem:[#allocation3_spill]] (!%p462_p2)  ;;  %v3159_v2 = vld [vmem:[%s4123_s3 + $0x4] ss:$8 sps:$4 sm:$0xff] (!%p462_p2)   ;;  %v3362_v18 = vmov (!%p462_p2), 0   ;;  %v565_v50 = vlaneseq (!%p462_p2) }
   0x7   : > { %465 = sbr.rel (%p462_p2) target bundleno = 4530 (0x11b2), region = 84  ;;  %v3161_v3 = vld [vmem:[%s4123_s3] ss:$8 sps:$4 sm:$0xff] (!%p462_p2)   ;;  %v3162_v4 = vld [vmem:[%s4123_s3 + $0x14] ss:$8 sps:$4 sm:$0xff] (!%p462_p2)   ;;  %655 = vmatprep.subr.bf16.mxu0 (!%p462_p2), %v3159_v2  ;;  %687 = vmatprep.mubr.bf16.mxu0 (!%p462_p2), %v3362_v18  ;;  %vm3364_vm1 = vmmov (!%p462_p2), 0  }
   0x8   : > { %v3164_v5 = vld [vmem:[%s4123_s3 + $0x10] ss:$8 sps:$4 sm:$0xff] (!%p462_p2)   ;;  %v3165_v6 = vld [vmem:[%s4123_s3 + $0x24] ss:$8 sps:$4 sm:$0xff] (!%p462_p2)   ;;  %656 = vmatpush1.bf16.msra.mxu0 (!%p462_p2), %v3161_v3  ;;  %v3167_v12 = vld [vmem:[%s4123_s3 + $0x20] ss:$8 sps:$4 sm:$0xff] (!%p462_p2)  }
   0x9   : > { %657 = vmatprep.subr.bf16.mxu0 (!%p462_p2), %v3162_v4  ;;  %v3168_v13 = vld [vmem:[%s4123_s3 + $0x34] ss:$8 sps:$4 sm:$0xff] (!%p462_p2)   ;;  %v3170_v14 = vld [vmem:[%s4123_s3 + $0x30] ss:$8 sps:$4 sm:$0xff] (!%p462_p2)   ;;  %v3171_v15 = vld [vmem:[%s4123_s3 + $0x44] ss:$8 sps:$4 sm:$0xff] (!%p462_p2)  }
   0xa   : > { %v3173_v16 = vld [vmem:[%s4123_s3 + $0x40] ss:$8 sps:$4 sm:$0xff] (!%p462_p2)   ;;  %v3174_v17 = vld [vmem:[%s4123_s3 + $0x54] ss:$8 sps:$4 sm:$0xff] (!%p462_p2)   ;;  %v3176_v19 = vld [vmem:[%s4123_s3 + $0x50] ss:$8 sps:$4 sm:$0xff] (!%p462_p2)  }
   0xb   : > { %v3177_v20 = vld [vmem:[%s4123_s3 + $0x64] ss:$8 sps:$4 sm:$0xff] (!%p462_p2)   ;;  %v3179_v21 = vld [vmem:[%s4123_s3 + $0x60] ss:$8 sps:$4 sm:$0xff] (!%p462_p2)   ;;  %v3180_v22 = vld [vmem:[%s4123_s3 + $0x74] ss:$8 sps:$4 sm:$0xff] (!%p462_p2)  }
   0xc   : > { %658 = vmatpush1.bf16.msra.mxu0 (!%p462_p2), %v3164_v5  ;;  %v3182_v23 = vld [vmem:[%s4123_s3 + $0x70] ss:$8 sps:$4 sm:$0xff] (!%p462_p2)   ;;  %v2735_v28 = vld [vmem:[%s4121_s1] ss:$0 sm:$0xff] (!%p462_p2)  ;;  %v2736_v30 = vld [vmem:[%s4121_s1 + $0x1] ss:$0 sm:$0xff] (!%p462_p2) }
   0xd   : > { %659 = vmatprep.subr.bf16.mxu0 (!%p462_p2), %v3165_v6  ;;  %v3183_v34 = vld [vmem:[%s4124_s4 + $0x40] sm:$0xff] (!%p462_p2)   ;;  %v3185_v36 = vld [vmem:[%s4124_s4 + $0x48] sm:$0xff] (!%p462_p2)   ;;  %v3187_v38 = vld [vmem:[%s4124_s4 + $0x50] sm:$0xff] (!%p462_p2)   ;;  %v3580_v51 = vshrl.u32 (!%p462_p2), %v565_v50, 7  ;;  %s3365_s30 = smov (!%p462_p2), 32   ;;  %vm1265_vm2 = vcmask (!%p462_p2), 1041408  }
   0xe   : > { %s4140_s22 = smov (!%p509_p3, %s2728_s22), 1  ;;  %v3184_v35 = vld [vmem:[%s4124_s4] sm:$0xff]   ;;  %2891 = vmatprep.subr.bf16.mxu1 %v3183_v34  ;;  %v3186_v37 = vld [vmem:[%s4124_s4 + $0x8] sm:$0xff]   ;;  %v3188_v39 = vld [vmem:[%s4124_s4 + $0x10] sm:$0xff]   ;;  %vm1266_vm3 = vcmask 1042432   ;;  %vm1191_vm4 = vcmask 261120  }
   0xf   : > { %s2733_s23 = sshll.u32 %s4140_s22, 3  ;;  %2892 = vmatpush3.bf16.msra.mxu1 %v3184_v35  ;;  %v3189_v40 = vld [vmem:[%s4124_s4 + $0x58] sm:$0xff]   ;;  %v3191_v42 = vld [vmem:[%s4124_s4 + $0x60] sm:$0xff]   ;;  %v3193_v44 = vld [vmem:[%s4124_s4 + $0x68] sm:$0xff]   ;;  %v3583_v52 = vsub.s32 0, %v3580_v51  ;;  %v3589_v54 = vsub.s32 1, %v3580_v51 }
  0x10   : > { %s512_s27 = scalar_lea.vmem %s4138_s26, %s2733_s23  ;;  %660 = vmatpush1.bf16.msra.mxu0 %v3167_v12  ;;  %2893 = vmatprep.subr.bf16.mxu1 %v3185_v36  ;;  %v3190_v41 = vld [vmem:[%s4124_s4 + $0x18] sm:$0xff]   ;;  %v3192_v43 = vld [vmem:[%s4124_s4 + $0x20] sm:$0xff]   ;;  %v3194_v45 = vld [vmem:[%s4124_s4 + $0x28] sm:$0xff]   ;;  %vm1203_vm5 = vcmask 523264   ;;  %s3367_s29 = smov 64   ;;  %vm1248_vm6 = vcmask 36864  }
  0x11   : > { %v3470_v0 = vld [vmem:[%s512_s27] sm:$0x1f]  ;;  %661 = vmatprep.subr.bf16.mxu0 %v3168_v13  ;;  %v3195_v46 = vld [vmem:[%s4124_s4 + $0x70] sm:$0xff]   ;;  %v3197_v48 = vld [vmem:[%s4124_s4 + $0x78] sm:$0xff]   ;;  %s3368_s0 = smov 96   ;;  %vm1261_vm7 = vcmask 39936   ;;  %s516_s25 = scalar_lea.vmem %s4136_s16, %s2733_s23 }
  0x12   : > { %v522_v1 = vsel %vm521_vm0, %v3470_v0, 0.0  ;;  %v3196_v47 = vld [vmem:[%s4124_s4 + $0x30] sm:$0xff]   ;;  %v3198_v49 = vld [vmem:[%s4124_s4 + $0x38] sm:$0xff]   ;;  %v563_v53 = vld [vmem:[%s4122_s2] sm:$0x3]  ;;  %vm1679_vm8 = vcmask 785408  }
  0x13   : > { %523 = vadd.xlane.f32.xlu0 %v522_v1  ;;  %2894 = vmatpush3.bf16.msra.mxu1 %v3186_v37  ;;  %v568_v55 = vrot.slane %v563_v53, %v3583_v52  ;;  %v572_v56 = vrot.slane %v563_v53, %v3589_v54  ;;  %v2755_v13 = vld [vmem:[%s4121_s1 + $0x2] ss:$0 sm:$0xff]  ;;  %v3210_v36 = vld [vmem:[%s4125_s5 + $0x38] ss:$12 sps:$4 sm:$0xff]   ;;  %v3227_v50 = vld [vmem:[%s4125_s5 + $0xa8] ss:$12 sps:$4 sm:$0xff]  }
  0x14   : > { %662 = vmatpush1.bf16.msra.mxu0 %v3170_v14  ;;  %2895 = vmatprep.subr.bf16.mxu1 %v3187_v38  ;;  %v3213_v37 = vld [vmem:[%s4125_s5 + $0x4c] ss:$12 sps:$4 sm:$0xff]   ;;  %v3211_v38 = vld [vmem:[%s4125_s5 + $0x48] ss:$12 sps:$4 sm:$0xff]   ;;  %v3230_v53 = vld [vmem:[%s4125_s5 + $0xb0] ss:$12 sps:$4 sm:$0xff]  }
  0x15   : > { %663 = vmatprep.subr.bf16.mxu0 %v3171_v15  ;;  %vm2046_vm9 = vcmask 1046528   ;;  %vm2048_vm10 = vcmask 1043456  }
  0x17   : > { %2896 = vmatpush3.bf16.msra.mxu1 %v3188_v39  ;;  %v3214_v39 = vld [vmem:[%s4125_s5 + $0x50] ss:$12 sps:$4 sm:$0xff]  }
  0x18   : > { %664 = vmatpush1.bf16.msra.mxu0 %v3173_v16  ;;  %2897 = vmatprep.subr.bf16.mxu1 %v3189_v40  ;;  %v3215_v40 = vld [vmem:[%s4125_s5 + $0x60] ss:$12 sps:$4 sm:$0xff]  }
  0x19   : > { %665 = vmatprep.subr.bf16.mxu0 %v3174_v17 }
  0x1b   : > { %2898 = vmatpush3.bf16.msra.mxu1 %v3190_v41  ;;  %v3217_v41 = vld [vmem:[%s4125_s5 + $0x64] ss:$12 sps:$4 sm:$0xff]  }
  0x1c   : > { %666 = vmatpush1.bf16.msra.mxu0 %v3176_v19  ;;  %2899 = vmatprep.subr.bf16.mxu1 %v3191_v42  ;;  %v3218_v42 = vld [vmem:[%s4125_s5 + $0x68] ss:$12 sps:$4 sm:$0xff]  }
  0x1d   : > { %667 = vmatprep.subr.bf16.mxu0 %v3177_v20 }
  0x1f   : > { %2900 = vmatpush3.bf16.msra.mxu1 %v3192_v43  ;;  %v3221_v43 = vld [vmem:[%s4125_s5 + $0x7c] ss:$12 sps:$4 sm:$0xff]  }
  0x20   : > { %668 = vmatpush1.bf16.msra.mxu0 %v3179_v21  ;;  %2901 = vmatprep.subr.bf16.mxu1 %v3193_v44  ;;  %v3219_v44 = vld [vmem:[%s4125_s5 + $0x78] ss:$12 sps:$4 sm:$0xff]  }
  0x21   : > { %669 = vmatprep.subr.bf16.mxu0 %v3180_v22 }
  0x23   : > { %2902 = vmatpush3.bf16.msra.mxu1 %v3194_v45  ;;  %v3222_v45 = vld [vmem:[%s4125_s5 + $0x80] ss:$12 sps:$4 sm:$0xff]  }
  0x24   : > { %670 = vmatpush1.bf16.msra.mxu0 %v3182_v23  ;;  %2903 = vmatprep.subr.bf16.mxu1 %v3195_v46  ;;  %v3199_v23 = vld [vmem:[%s4125_s5] ss:$12 sps:$4 sm:$0xff]  }
  0x25   : > { %v3225_v46 = vld [vmem:[%s4125_s5 + $0x94] ss:$12 sps:$4 sm:$0xff]  }
  0x27   : > { %2904 = vmatpush3.bf16.msra.mxu1 %v3196_v47  ;;  %v3223_v47 = vld [vmem:[%s4125_s5 + $0x90] ss:$12 sps:$4 sm:$0xff]  }
  0x28   : > { %2905 = vmatprep.subr.bf16.mxu1 %v3197_v48  ;;  %v3226_v48 = vld [vmem:[%s4125_s5 + $0x98] ss:$12 sps:$4 sm:$0xff]  }
  0x2b   : > { %2906 = vmatpush3.bf16.msra.mxu1 %v3198_v49  ;;  %v3229_v49 = vld [vmem:[%s4125_s5 + $0xac] ss:$12 sps:$4 sm:$0xff]  }
  0xa0   : > { %v524_v7 = vpop.xlane.xlu0 %523 }
  0xa1   : > { %v526_v8 = vmul.f32 0.0078125, %v524_v7 }
  0xa3   : > { %v527_v9 = vsub.f32 %v3470_v0, %v526_v8 }
  0xa5   : > { %v528_v10 = vmul.f32 %v527_v9, %v527_v9 }
  0xa7   : > { %v529_v11 = vsel %vm521_vm0, %v528_v10, 0.0 }
  0xa8   : > { %530 = vadd.xlane.f32.xlu0 %v529_v11 }
 0x135   : > { %v531_v24 = vpop.xlane.xlu0 %530 }
 0x136   : > { %v532_v25 = vmul.f32 0.0078125, %v531_v24  ;;  %v3201_v24 = vld [vmem:[%s4125_s5 + $0x4] ss:$12 sps:$4 sm:$0xff]  }
 0x137   : > { %1090 = vmatprep.subr.bf16.mxu0 %v3201_v24 }
 0x138   : > { %v533_v26 = vadd.f32 1e-05, %v532_v25  ;;  %v3363_v25 = vmov 0.0  }
 0x139   : > { %2996 = vmatprep.subr.bf16.mxu1 %v3363_v25  ;;  %2052 = vst [vmem:[#allocation2 + $0x10] sm:$0x7] %v3363_v25 }
 0x13a   : > { %3304 = vrsqrt.f32 %v533_v26  ;;  %v3205_v26 = vld [vmem:[%s4125_s5 + $0x1c] ss:$12 sps:$4 sm:$0xff]  }
 0x144   : > { %v3305_v27 = vpop.eup %3304 }
 0x145   : > { %v535_v29 = vmul.f32 %v3305_v27, %v527_v9  ;;  %v3203_v27 = vld [vmem:[%s4125_s5 + $0x18] ss:$12 sps:$4 sm:$0xff]  }
 0x147   : > { %v540_v31 = vmul.f32 %v2735_v28, %v535_v29  ;;  %v3206_v28 = vld [vmem:[%s4125_s5 + $0x20] ss:$12 sps:$4 sm:$0xff]  }
 0x148   : > { %v3209_v29 = vld [vmem:[%s4125_s5 + $0x34] ss:$12 sps:$4 sm:$0xff]  }
 0x149   : > { %v545_v32 = vadd.f32 %v2736_v30, %v540_v31  ;;  %v3207_v30 = vld [vmem:[%s4125_s5 + $0x30] ss:$12 sps:$4 sm:$0xff]  }
 0x14b   : > { %v546_v33 = vpack.c.bf16 %v545_v32, %v545_v32 }
 0x14d   : > { %688 = vmatmul.mubr.bf16.vlgmr.msra.gmra.mrb[0].mxu0 %v546_v33 }
 0x14e   : > { %1122 = vmatprep.mubr.bf16.mxu0 %v3362_v18  ;;  %1091 = vmatpush1.bf16.msra.mxu0 %v3199_v23 }
 0x14f   : > { %1092 = vmatprep.subr.bf16.mxu0 %v3205_v26 }
 0x152   : > { %1093 = vmatpush1.bf16.msra.mxu0 %v3203_v27 }
 0x153   : > { %1094 = vmatprep.subr.bf16.mxu0 %v3209_v29 }
 0x156   : > { %1095 = vmatpush1.bf16.msra.mxu0 %v3207_v30 }
 0x157   : > { %1096 = vmatprep.subr.bf16.mxu0 %v3213_v37 }
 0x15a   : > { %1097 = vmatpush1.bf16.msra.mxu0 %v3211_v38 }
 0x15b   : > { %1098 = vmatprep.subr.bf16.mxu0 %v3217_v41 }
 0x15e   : > { %1099 = vmatpush1.bf16.msra.mxu0 %v3215_v40 }
 0x15f   : > { %1100 = vmatprep.subr.bf16.mxu0 %v3221_v43 }
 0x162   : > { %1101 = vmatpush1.bf16.msra.mxu0 %v3219_v44 }
 0x163   : > { %1102 = vmatprep.subr.bf16.mxu0 %v3225_v46 }
 0x166   : > { %1103 = vmatpush1.bf16.msra.mxu0 %v3223_v47 }
 0x167   : > { %1104 = vmatprep.subr.bf16.mxu0 %v3229_v49 }
 0x16a   : > { %1105 = vmatpush1.bf16.msra.mxu0 %v3227_v50 }
 0x16b   : > { %3016 = vmatprep.subr.bf16.mxu0 %v3363_v25 }
 0x220   : > { %v689_v57 = vpop.f32.mrb[0].mxu0 }
 0x221   : > { %v690_v58 = vadd.f32 %v689_v57, %v568_v55  ;;  %v691_v59 = vpop.f32.mrb[1].mxu0  ;;  %v3691_v55 = vld [vmem:[%s4127_s7] sm:$0x7] }
 0x222   : > { %v692_v60 = vadd.f32 %v691_v59, %v572_v56  ;;  %v693_v61 = vpop.f32.mrb[2].mxu0  ;;  %v3695_v56 = vcombine.low %v3691_v55, %v3691_v55 }
 0x223   : > { %v2753_v62 = vmul.f32 -1.442695, %v690_v58  ;;  %v694_v63 = vpop.f32.mrb[3].mxu0  ;;  %v2772_v61 = vld [vmem:[%s4121_s1 + $0x3] ss:$0 sm:$0xff] }
 0x224   : > { %v2754_v1 = vmul.f32 -1.442695, %v692_v60  ;;  %1198 = vrot.lane.b32.xlu0 %v3695_v56, %s3365_s30  ;;  %v2773_v63 = vld [vmem:[%s4121_s1 + $0x4] ss:$0 sm:$0xff] }
 0x225   : > { %3306 = vpow2.f32 %v2753_v62 }
 0x226   : > { %3308 = vpow2.f32 %v2754_v1 }
 0x22f   : > { %v3307_v2 = vpop.eup %3306 }
 0x230   : > { %v3309_v3 = vpop.eup %3308  ;;  %v702_v4 = vadd.f32 1.0, %v3307_v2 }
 0x231   : > { %v703_v5 = vadd.f32 1.0, %v3309_v3 }
 0x232   : > { %3310 = vrcp.f32 %v702_v4  ;;  %v3710_v4 = vsub.s32 2, %v3580_v51 }
 0x233   : > { %3312 = vrcp.f32 %v703_v5  ;;  %v945_v5 = vld [vmem:[%s4126_s6] sm:$0x7] }
 0x23c   : > { %v3311_v6 = vpop.eup %3310 }
 0x23d   : > { %v3313_v7 = vpop.eup %3312  ;;  %v708_v8 = vmul.f32 %v3311_v6, %v690_v58  ;;  %v950_v6 = vrot.slane %v945_v5, %v3583_v52 }
 0x23e   : > { %v709_v9 = vmul.f32 %v3313_v7, %v692_v60  ;;  %v958_v7 = vrot.slane %v945_v5, %v3710_v4 }
 0x23f   : > { %v710_v11 = vpack.c.bf16 %v708_v8, %v708_v8  ;;  %v954_v8 = vrot.slane %v945_v5, %v3589_v54 }
 0x240   : > { %v711_v10 = vpack.c.bf16 %v709_v9, %v709_v9 }
 0x242   : > { %877 = vmatprep.mubr.bf16.mxu1 %v711_v10  ;;  %v3366_v10 = vmov 65535  }
 0x243   : > { %878 = vmatmul.mubr.bf16.vlgmr.msra.gmra.mrb[0].mxu1 %v710_v11  ;;  %v1267_v11 = vsel %vm1265_vm2, 4294967295, %v3366_v10 }
 0x244   : > { %3012 = vmatprep.mubr.msk.bf16.mxu1 %vm3364_vm1, %v3363_v25 }
 0x296   : > { %v1199_v9 = vpop.permute.xlu0 %1198 }
 0x316   : > { %v2907_v12 = vpop.f32.mrb[0].mxu1 }
 0x317   : > { %v2908_v14 = vpop.f32.mrb[1].mxu1 }
 0x318   : > { %v2909_v15 = vadd.f32 %v2908_v14, %v2907_v12  ;;  %v2910_v16 = vpop.f32.mrb[2].mxu1 }
 0x319   : > { %v2911_v17 = vpop.f32.mrb[3].mxu1  ;;  %v2799_v16 = vld [vmem:[%s4121_s1 + $0x6] ss:$0 sm:$0xff] }
 0x31a   : > { %v880_v19 = vadd.f32 %v2909_v15, %v2755_v13  ;;  %v2798_v15 = vld [vmem:[%s4121_s1 + $0x5] ss:$0 sm:$0xff] }
 0x31c   : > { %v885_v20 = vmul.f32 0.5, %v880_v19 }
 0x31e   : > { %v3597_v21 = vadd.f32 %v885_v20, %v3470_v0  ;;  %v3202_v0 = vld [vmem:[%s4125_s5 + $0x8] ss:$12 sps:$4 sm:$0xff]  }
 0x31f   : > { %2997 = vmatpush3.bf16.msra.mxu1 %v3202_v0  ;;  %v3724_v0 = vsel %vm1266_vm3, %v1267_v11, 0 }
 0x320   : > { %v889_v22 = vsel %vm521_vm0, %v3597_v21, 0.0  ;;  %2998 = vmatprep.subr.bf16.mxu1 %v3363_v25 }
 0x321   : > { %890 = vadd.xlane.f32.xlu1 %v889_v22 }
 0x323   : > { %2999 = vmatpush3.bf16.msra.mxu1 %v3206_v28 }
 0x324   : > { %3000 = vmatprep.subr.bf16.mxu1 %v3363_v25 }
 0x327   : > { %3001 = vmatpush3.bf16.msra.mxu1 %v3210_v36 }
 0x328   : > { %3002 = vmatprep.subr.bf16.mxu1 %v3363_v25 }
 0x32b   : > { %3003 = vmatpush3.bf16.msra.mxu1 %v3214_v39 }
 0x32c   : > { %3004 = vmatprep.subr.bf16.mxu1 %v3363_v25 }
 0x32f   : > { %3005 = vmatpush3.bf16.msra.mxu1 %v3218_v42 }
 0x330   : > { %3006 = vmatprep.subr.bf16.mxu1 %v3363_v25 }
 0x333   : > { %3007 = vmatpush3.bf16.msra.mxu1 %v3222_v45 }
 0x334   : > { %3008 = vmatprep.subr.bf16.mxu1 %v3363_v25 }
 0x337   : > { %3009 = vmatpush3.bf16.msra.mxu1 %v3226_v48 }
 0x338   : > { %3010 = vmatprep.subr.bf16.mxu1 %v3363_v25 }
 0x33b   : > { %3011 = vmatpush3.bf16.msra.mxu1 %v3230_v53 }
 0x33c   : > { %3022 = vmatprep.subr.bf16.mxu1 %v3363_v25 }
 0x3ae   : > { %v891_v31 = vpop.xlane.xlu1 %890 }
 0x3af   : > { %v892_v32 = vmul.f32 0.0078125, %v891_v31 }
 0x3b1   : > { %v893_v33 = vsub.f32 %v3597_v21, %v892_v32 }
 0x3b3   : > { %v894_v34 = vmul.f32 %v893_v33, %v893_v33 }
 0x3b5   : > { %v895_v35 = vsel %vm521_vm0, %v894_v34, 0.0 }
 0x3b6   : > { %896 = vadd.xlane.f32.xlu1 %v895_v35 }
 0x443   : > { %v897_v57 = vpop.xlane.xlu1 %896 }
 0x444   : > { %v898_v58 = vmul.f32 0.0078125, %v897_v57 }
 0x446   : > { %v899_v59 = vadd.f32 1e-05, %v898_v58 }
 0x448   : > { %3314 = vrsqrt.f32 %v899_v59 }
 0x452   : > { %v3315_v60 = vpop.eup %3314 }
 0x453   : > { %v901_v62 = vmul.f32 %v3315_v60, %v893_v33 }
 0x455   : > { %v906_v1 = vmul.f32 %v2772_v61, %v901_v62 }
 0x457   : > { %v911_v2 = vadd.f32 %v2773_v63, %v906_v1 }
 0x459   : > { %v912_v3 = vpack.c.bf16 %v911_v2, %v911_v2 }
 0x45b   : > { %1123 = vmatmul.mubr.bf16.vlgmr.msra.gmra.mrb[4].mxu0 %v912_v3  ;;  %3013 = vmatmul.mubr.bf16.vlgmr.msra.gmra.mrb[4].mxu1 %v912_v3 }
 0x45c   : > { %3018 = vmatprep.mubr.msk.bf16.mxu0 %vm3364_vm1, %v3363_v25  ;;  %3024 = vmatprep.mubr.msk.bf16.mxu1 %vm3364_vm1, %v3363_v25 }
 0x52e   : > { %v1124_v12 = vpop.f32.mrb[4].mxu0  ;;  %v1165_v13 = vpop.f32.mrb[4].mxu1 }
 0x52f   : > { %v1125_v14 = vadd.f32 %v1124_v12, %v950_v6  ;;  %v1166_v17 = vadd.f32 %v1165_v13, %v958_v7  ;;  %v1126_v19 = vpop.f32.mrb[5].mxu0  ;;  %v3014_v20 = vpop.f32.mrb[5].mxu1 }
 0x530   : > { %v1127_v22 = vadd.f32 %v1126_v19, %v954_v8  ;;  %v1128_v23 = vpop.f32.mrb[6].mxu0  ;;  %v1168_v24 = vpop.f32.mrb[6].mxu1 }
 0x531   : > { %v3726_v26 = vpack.c.bf16 %v1166_v17, %v1166_v17  ;;  %v1129_v27 = vpop.f32.mrb[7].mxu0  ;;  %v3015_v28 = vpop.f32.mrb[7].mxu1  ;;  %v1176_v29 = vadd.f32 %v2798_v15, %v1125_v14  ;;  %v1183_v30 = vadd.f32 %v2799_v16, %v1125_v14 }
 0x532   : > { %v1185_v31 = vpack.c.bf16 %v1127_v22, %v1127_v22 }
 0x533   : > { %v1270_v32 = vand.u32 %v3724_v0, %v3726_v26  ;;  %v1177_v35 = vpack.c.bf16 %v1176_v29, %v1176_v29  ;;  %v1184_v36 = vpack.c.bf16 %v1183_v30, %v1183_v30 }
 0x534   : > { %v1202_v33 = vsel %vm1191_vm4, %v1185_v31, %v1199_v9  ;;  %1436 = vrot.lane.b32.xlu0 %v1185_v31, %s3367_s29  ;;  %1319 = vrot.lane.b32.xlu1 %v1185_v31, %s3368_s0 }
 0x535   : > { %v1206_v34 = vsel %vm1203_vm5, %v1202_v33, 0  ;;  %3023 = vmatpush3.bf16.msra.mxu1 %v1270_v32 }
 0x536   : > { %3017 = vmatpush3.bf16.xpose.msra.mxu0 %v1206_v34  ;;  %3034 = vmatprep.subr.bf16.mxu1 %v3363_v25 }
 0x537   : > { %3028 = vmatprep.subr.bf16.mxu0 %v3363_v25 }
 0x538   : > { %1189 = vrot.lane.b32.xlu1 %v1184_v36, %s3365_s30  ;;  %1429 = vrot.lane.b32.xlu0 %v1177_v35, %s3367_s29 }
 0x53c   : > { %1438 = vrot.lane.b32.xlu1 %v3695_v56, %s3368_s0  ;;  %1554 = vrot.lane.b32.xlu0 %v1185_v31, %s3365_s30 }
 0x540   : > { %1547 = vrot.lane.b32.xlu0 %v1177_v35, %s3365_s30  ;;  %1313 = vrot.lane.b32.xlu1 %v1177_v35, %s3368_s0 }
 0x544   : > { %1431 = vrot.lane.b32.xlu1 %v1184_v36, %s3368_s0 }
 0x548   : > { %1556 = vrot.lane.b32.xlu1 %v3695_v56, %s3367_s29 }
 0x54c   : > { %1549 = vrot.lane.b32.xlu1 %v1184_v36, %s3367_s29 }
 0x5a6   : > { %v1320_v37 = vpop.permute.xlu1 %1319  ;;  %v1437_v42 = vpop.permute.xlu0 %1436 }
 0x5a7   : > { %v1323_v38 = vsel %vm1191_vm4, %v1320_v37, %v3691_v55 }
 0x5a8   : > { %v1326_v41 = vsel %vm1203_vm5, %v1323_v38, 0 }
 0x5aa   : > { %v1190_v39 = vpop.permute.xlu1 %1189  ;;  %v1430_v47 = vpop.permute.xlu0 %1429 }
 0x5ab   : > { %v1194_v40 = vsel %vm1191_vm4, %v1177_v35, %v1190_v39 }
 0x5ac   : > { %3019 = vmatmul.mubr.msk.bf16.vlgmr.msra.gmra.mrb[8].mxu0 %vm1203_vm5, %v1194_v40 }
 0x5ad   : > { %3029 = vmatpush3.bf16.xpose.msra.mxu0 %v1326_v41  ;;  %3030 = vmatprep.mubr.msk.bf16.mxu0 %vm3364_vm1, %v3363_v25 }
 0x5ae   : > { %v1439_v43 = vpop.permute.xlu1 %1438  ;;  %3040 = vmatprep.subr.bf16.mxu0 %v3363_v25  ;;  %v1555_v50 = vpop.permute.xlu0 %1554 }
 0x5af   : > { %v1442_v44 = vsel %vm1191_vm4, %v1437_v42, %v1439_v43 }
 0x5b0   : > { %v1445_v48 = vsel %vm1203_vm5, %v1442_v44, 0 }
 0x5b2   : > { %v1314_v45 = vpop.permute.xlu1 %1313  ;;  %v1548_v59 = vpop.permute.xlu0 %1547 }
 0x5b3   : > { %v1317_v46 = vsel %vm1191_vm4, %v1314_v45, %v1184_v36 }
 0x5b4   : > { %3031 = vmatmul.mubr.msk.bf16.vlgmr.msra.gmra.mrb[12].mxu0 %vm1203_vm5, %v1317_v46 }
 0x5b5   : > { %3041 = vmatpush3.bf16.xpose.msra.mxu0 %v1445_v48  ;;  %3042 = vmatprep.mubr.msk.bf16.mxu0 %vm3364_vm1, %v3363_v25 }
 0x5b6   : > { %v1432_v49 = vpop.permute.xlu1 %1431  ;;  %3052 = vmatprep.subr.bf16.mxu0 %v3363_v25 }
 0x5b7   : > { %v1435_v55 = vsel %vm1191_vm4, %v1430_v47, %v1432_v49 }
 0x5ba   : > { %v1557_v53 = vpop.permute.xlu1 %1556 }
 0x5bb   : > { %v1560_v56 = vsel %vm1191_vm4, %v1555_v50, %v1557_v53 }
 0x5bc   : > { %v1563_v57 = vsel %vm1203_vm5, %v1560_v56, 0  ;;  %3043 = vmatmul.mubr.msk.bf16.vlgmr.msra.gmra.mrb[16].mxu0 %vm1203_vm5, %v1435_v55 }
 0x5bd   : > { %3053 = vmatpush3.bf16.xpose.msra.mxu0 %v1563_v57  ;;  %3054 = vmatprep.mubr.msk.bf16.mxu0 %vm3364_vm1, %v3363_v25 }
 0x5be   : > { %3064 = vmatprep.subr.bf16.mxu0 %v3363_v25  ;;  %v1550_v58 = vpop.permute.xlu1 %1549 }
 0x5bf   : > { %v1553_v60 = vsel %vm1191_vm4, %v1548_v59, %v1550_v58 }
 0x5c4   : > { %3055 = vmatmul.mubr.msk.bf16.vlgmr.msra.gmra.mrb[20].mxu0 %vm1203_vm5, %v1553_v60 }
 0x5c5   : > { %3080 = vmatprep.mubr.msk.bf16.mxu0 %vm3364_vm1, %v3363_v25 }
 0x67f   : > { %v1242_v61 = vpop.f32.mrb[8].mxu0 }
 0x680   : > { %v3020_v62 = vpop.f32.mrb[9].mxu0  ;;  %v1249_v63 = vsel %vm1248_vm6, %v1242_v61, -inf }
 0x681   : > { %1250 = vmax.xlane.f32.xlu0 %v1249_v63  ;;  %v1245_v1 = vpop.f32.mrb[10].mxu0 }
 0x682   : > { %v3021_v2 = vpop.f32.mrb[11].mxu0 }
 0x687   : > { %v1362_v3 = vpop.f32.mrb[12].mxu0 }
 0x688   : > { %v3032_v5 = vpop.f32.mrb[13].mxu0  ;;  %v1368_v6 = vsel %vm1248_vm6, %v1362_v3, -inf }
 0x689   : > { %1369 = vmax.xlane.f32.xlu1 %v1368_v6  ;;  %v1365_v7 = vpop.f32.mrb[14].mxu0 }
 0x68a   : > { %v3033_v8 = vpop.f32.mrb[15].mxu0 }
 0x68f   : > { %v1481_v9 = vpop.f32.mrb[16].mxu0 }
 0x690   : > { %v3044_v10 = vpop.f32.mrb[17].mxu0  ;;  %v1487_v11 = vsel %vm1248_vm6, %v1481_v9, -inf }
 0x691   : > { %1488 = vmax.xlane.f32.xlu0 %v1487_v11  ;;  %v1484_v12 = vpop.f32.mrb[18].mxu0 }
 0x692   : > { %v3045_v13 = vpop.f32.mrb[19].mxu0 }
 0x693   : > { %v3234_v13 = vld [vmem:[%s4128_s8 + $0x10] sm:$0xff]  }
 0x697   : > { %v1599_v14 = vpop.f32.mrb[20].mxu0 }
 0x698   : > { %v3056_v15 = vpop.f32.mrb[21].mxu0  ;;  %v1605_v16 = vsel %vm1248_vm6, %v1599_v14, -inf }
 0x699   : > { %1606 = vmax.xlane.f32.xlu0 %v1605_v16  ;;  %v1602_v17 = vpop.f32.mrb[22].mxu0  ;;  %v3235_v15 = vld [vmem:[%s4128_s8 + $0x18] sm:$0xff]  }
 0x69a   : > { %v3057_v19 = vpop.f32.mrb[23].mxu0 }
 0x70e   : > { %v1251_v20 = vpop.xlane.xlu0 %1250 }
 0x70f   : > { %v1252_v22 = vsub.f32 %v1242_v61, %v1251_v20  ;;  %v3236_v20 = vld [vmem:[%s4128_s8 + $0x20] sm:$0xff]  }
 0x711   : > { %v1253_v23 = vmul.f32 1.442695, %v1252_v22 }
 0x713   : > { %3316 = vpow2.f32 %v1253_v23  ;;  %v3237_v23 = vld [vmem:[%s4128_s8 + $0x28] sm:$0xff]  }
 0x716   : > { %v1370_v24 = vpop.xlane.xlu1 %1369 }
 0x717   : > { %v1371_v27 = vsub.f32 %v1362_v3, %v1370_v24  ;;  %v3238_v24 = vld [vmem:[%s4128_s8 + $0x30] sm:$0xff]  }
 0x719   : > { %v1372_v28 = vmul.f32 1.442695, %v1371_v27  ;;  %v3239_v27 = vld [vmem:[%s4128_s8 + $0x38] sm:$0xff]  }
 0x71b   : > { %3318 = vpow2.f32 %v1372_v28 }
 0x71d   : > { %v3317_v29 = vpop.eup %3316 }
 0x71e   : > { %v1489_v30 = vpop.xlane.xlu0 %1488  ;;  %v1255_v31 = vsel %vm1248_vm6, %v3317_v29, 0.0 }
 0x71f   : > { %v1490_v32 = vsub.f32 %v1481_v9, %v1489_v30  ;;  %1256 = vadd.xlane.f32.xlu0 %v1255_v31  ;;  %v3232_v9 = vld [vmem:[%s4128_s8] sm:$0xff]  }
 0x720   : > { %3065 = vmatpush3.bf16.msra.mxu0 %v3232_v9 }
 0x721   : > { %v1491_v33 = vmul.f32 1.442695, %v1490_v32  ;;  %3066 = vmatprep.subr.bf16.mxu0 %v3363_v25 }
 0x723   : > { %3320 = vpow2.f32 %v1491_v33 }
 0x725   : > { %v3319_v34 = vpop.eup %3318 }
 0x726   : > { %v1374_v35 = vsel %vm1248_vm6, %v3319_v34, 0.0  ;;  %v1607_v38 = vpop.xlane.xlu0 %1606 }
 0x727   : > { %1375 = vadd.xlane.f32.xlu1 %v1374_v35  ;;  %v1608_v39 = vsub.f32 %v1599_v14, %v1607_v38 }
 0x729   : > { %v1609_v40 = vmul.f32 1.442695, %v1608_v39  ;;  %v2809_v39 = vld [vmem:[%s4121_s1 + $0x7] ss:$0 sm:$0xff] }
 0x72b   : > { %3322 = vpow2.f32 %v1609_v40 }
 0x72d   : > { %v3321_v36 = vpop.eup %3320 }
 0x72e   : > { %v1493_v37 = vsel %vm1248_vm6, %v3321_v36, 0.0 }
 0x72f   : > { %1494 = vadd.xlane.f32.xlu0 %v1493_v37 }
 0x735   : > { %v3323_v41 = vpop.eup %3322 }
 0x736   : > { %v1611_v42 = vsel %vm1248_vm6, %v3323_v41, 0.0 }
 0x738   : > { %1499 = vrot.lane.b32.xlu1 %v3726_v26, %s3367_s29 }
 0x745   : > { %1381 = vrot.lane.b32.xlu0 %v3726_v26, %s3368_s0 }
 0x75c   : > { %1612 = vadd.xlane.f32.xlu1 %v1611_v42 }
 0x76d   : > { %1617 = vrot.lane.b32.xlu1 %v3726_v26, %s3365_s30 }
 0x7ac   : > { %v1257_v43 = vpop.xlane.xlu0 %1256 }
 0x7ad   : > { %3324 = vrcp.f32 %v1257_v43 }
 0x7b4   : > { %v1376_v44 = vpop.xlane.xlu1 %1375 }
 0x7b5   : > { %3326 = vrcp.f32 %v1376_v44 }
 0x7b7   : > { %v3325_v45 = vpop.eup %3324 }
 0x7b8   : > { %v1259_v46 = vmul.f32 %v3325_v45, %v3317_v29  ;;  %v1500_v55 = vpop.permute.xlu1 %1499 }
 0x7b9   : > { %v1505_v57 = vand.u32 %v1500_v55, %v3724_v0 }
 0x7ba   : > { %v1260_v47 = vpack.c.bf16 %v1259_v46, %v1259_v46 }
 0x7bc   : > { %3025 = vmatmul.mubr.msk.bf16.vlgmr.msra.gmra.mrb[8].mxu1 %vm1261_vm7, %v1260_v47  ;;  %v1495_v48 = vpop.xlane.xlu0 %1494  ;;  %v3240_v47 = vld [vmem:[%s4129_s9] sm:$0xff]  }
 0x7bd   : > { %3328 = vrcp.f32 %v1495_v48  ;;  %3036 = vmatprep.mubr.msk.bf16.mxu1 %vm3364_vm1, %v3363_v25  ;;  %v3241_v48 = vld [vmem:[%s4130_s10] sm:$0xff]  }
 0x7bf   : > { %v3327_v49 = vpop.eup %3326 }
 0x7c0   : > { %v1378_v50 = vmul.f32 %v3327_v49, %v3319_v34  ;;  %v1382_v53 = vpop.permute.xlu0 %1381  ;;  %v3243_v49 = vld [vmem:[%s4130_s10 + $0x8] sm:$0xff]  }
 0x7c1   : > { %v1387_v26 = vand.u32 %v1382_v53, %v3724_v0 }
 0x7c2   : > { %v1379_v56 = vpack.c.bf16 %v1378_v50, %v1378_v50 }
 0x7c3   : > { %3035 = vmatpush3.bf16.msra.mxu1 %v1387_v26 }
 0x7c4   : > { %3046 = vmatprep.subr.bf16.mxu1 %v3363_v25 }
 0x7c6   : > { %3037 = vmatmul.mubr.msk.bf16.vlgmr.msra.gmra.mrb[12].mxu1 %vm1261_vm7, %v1379_v56 }
 0x7c7   : > { %v3329_v58 = vpop.eup %3328  ;;  %3047 = vmatpush3.bf16.msra.mxu1 %v1505_v57  ;;  %3048 = vmatprep.mubr.msk.bf16.mxu1 %vm3364_vm1, %v3363_v25  ;;  %v3244_v57 = vld [vmem:[%s4129_s9 + $0x10] sm:$0xff]  }
 0x7c8   : > { %v1497_v59 = vmul.f32 %v3329_v58, %v3321_v36  ;;  %3058 = vmatprep.subr.bf16.mxu1 %v3363_v25  ;;  %v3245_v58 = vld [vmem:[%s4130_s10 + $0x10] sm:$0xff]  }
 0x7ca   : > { %v1498_v60 = vpack.c.bf16 %v1497_v59, %v1497_v59  ;;  %v3246_v59 = vld [vmem:[%s4129_s9 + $0x18] sm:$0xff]  }
 0x7ce   : > { %3049 = vmatmul.mubr.msk.bf16.vlgmr.msra.gmra.mrb[16].mxu1 %vm1261_vm7, %v1498_v60  ;;  %v3247_v60 = vld [vmem:[%s4130_s10 + $0x18] sm:$0xff]  }
 0x7cf   : > { %3060 = vmatprep.mubr.msk.bf16.mxu1 %vm3364_vm1, %v3363_v25 }
 0x7e9   : > { %v1613_v61 = vpop.xlane.xlu1 %1612 }
 0x7ea   : > { %3330 = vrcp.f32 %v1613_v61  ;;  %v3248_v61 = vld [vmem:[%s4129_s9 + $0x20] sm:$0xff]  }
 0x7ed   : > { %v1618_v62 = vpop.permute.xlu1 %1617 }
 0x7ee   : > { %v1623_v63 = vand.u32 %v1618_v62, %v3724_v0  ;;  %v3233_v0 = vld [vmem:[%s4128_s8 + $0x8] sm:$0xff]   ;;  %v3249_v62 = vld [vmem:[%s4130_s10 + $0x20] sm:$0xff]  }
 0x7ef   : > { %3067 = vmatpush3.bf16.msra.mxu0 %v3233_v0 }
 0x7f0   : > { %3059 = vmatpush3.bf16.msra.mxu1 %v1623_v63  ;;  %3068 = vmatprep.subr.bf16.mxu0 %v3363_v25  ;;  %v3250_v63 = vld [vmem:[%s4129_s9 + $0x28] sm:$0xff]  }
 0x7f1   : > { %3084 = vmatprep.subr.bf16.mxu1 %v3363_v25 }
 0x7f3   : > { %3069 = vmatpush3.bf16.msra.mxu0 %v3234_v13 }
 0x7f4   : > { %v3331_v1 = vpop.eup %3330  ;;  %3070 = vmatprep.subr.bf16.mxu0 %v3363_v25 }
 0x7f5   : > { %v1615_v2 = vmul.f32 %v3331_v1, %v3323_v41  ;;  %v3251_v1 = vld [vmem:[%s4130_s10 + $0x28] sm:$0xff]  }
 0x7f7   : > { %v1616_v3 = vpack.c.bf16 %v1615_v2, %v1615_v2  ;;  %3071 = vmatpush3.bf16.msra.mxu0 %v3235_v15  ;;  %v3252_v2 = vld [vmem:[%s4129_s9 + $0x30] sm:$0xff]  }
 0x7f8   : > { %3072 = vmatprep.subr.bf16.mxu0 %v3363_v25 }
 0x7f9   : > { %3061 = vmatmul.mubr.msk.bf16.vlgmr.msra.gmra.mrb[20].mxu1 %vm1261_vm7, %v1616_v3  ;;  %v3253_v3 = vld [vmem:[%s4130_s10 + $0x30] sm:$0xff]  }
 0x7fa   : > { %3100 = vmatprep.mubr.msk.bf16.mxu1 %vm3364_vm1, %v3363_v25  ;;  %3085 = vmatpush3.bf16.msra.mxu1 %v3240_v47  ;;  %v2053_v47 = vld [vmem:[%s4131_s11] sm:$0xff] }
 0x7fb   : > { %3073 = vmatpush3.bf16.msra.mxu0 %v3236_v20  ;;  %3086 = vmatprep.subr.bf16.mxu1 %v3363_v25  ;;  %v3260_v20 = vld [vmem:[%s4132_s12 + $0x20] sm:$0xff]  }
 0x7fc   : > { %3074 = vmatprep.subr.bf16.mxu0 %v3363_v25 }
 0x7ff   : > { %3075 = vmatpush3.bf16.msra.mxu0 %v3237_v23  ;;  %v3262_v23 = vld [vmem:[%s4132_s12 + $0x30] sm:$0xff]  }
 0x800   : > { %3076 = vmatprep.subr.bf16.mxu0 %v3363_v25 }
 0x803   : > { %3077 = vmatpush3.bf16.msra.mxu0 %v3238_v24  ;;  %v3263_v24 = vld [vmem:[%s4132_s12 + $0x38] sm:$0xff]  }
 0x804   : > { %3078 = vmatprep.subr.bf16.mxu0 %v3363_v25 }
 0x807   : > { %3079 = vmatpush3.bf16.msra.mxu0 %v3239_v27  ;;  %v2829_v27 = vld [vmem:[%s4121_s1 + $0xb] ss:$0 sm:$0xff] }
 0x808   : > { %3104 = vmatprep.subr.bf16.mxu0 %v3363_v25 }
 0x88f   : > { %v1306_v5 = vpop.f32.mrb[8].mxu1 }
 0x890   : > { %v3026_v6 = vpop.f32.mrb[9].mxu1 }
 0x891   : > { %v1309_v7 = vpop.f32.mrb[10].mxu1  ;;  %v3255_v6 = vld [vmem:[%s4130_s10 + $0x38] sm:$0xff]  }
 0x892   : > { %v3027_v8 = vpop.f32.mrb[11].mxu1 }
 0x899   : > { %v1423_v10 = vpop.f32.mrb[12].mxu1 }
 0x89a   : > { %1666 = vrot.lane.b32.xlu1 %v1423_v10, %s3365_s30  ;;  %v3038_v11 = vpop.f32.mrb[13].mxu1  ;;  %v2818_v10 = vld [vmem:[%s4121_s1 + $0x8] ss:$0 sm:$0xff] }
 0x89b   : > { %v1426_v12 = vpop.f32.mrb[14].mxu1 }
 0x89c   : > { %v3039_v14 = vpop.f32.mrb[15].mxu1  ;;  %v2819_v12 = vld [vmem:[%s4121_s1 + $0x9] ss:$0 sm:$0xff] }
 0x8a1   : > { %v1541_v16 = vpop.f32.mrb[16].mxu1 }
 0x8a2   : > { %1670 = vrot.lane.b32.xlu0 %v1541_v16, %s3367_s29  ;;  %v3050_v17 = vpop.f32.mrb[17].mxu1  ;;  %v3256_v16 = vld [vmem:[%s4132_s12] sm:$0xff]  }
 0x8a3   : > { %v1544_v19 = vpop.f32.mrb[18].mxu1  ;;  %v3257_v17 = vld [vmem:[%s4132_s12 + $0x8] sm:$0xff]  }
 0x8a4   : > { %v3051_v22 = vpop.f32.mrb[19].mxu1  ;;  %v3258_v19 = vld [vmem:[%s4132_s12 + $0x10] sm:$0xff]  }
 0x8a5   : > { %v3261_v22 = vld [vmem:[%s4132_s12 + $0x28] sm:$0xff]  }
 0x8cc   : > { %v1659_v28 = vpop.f32.mrb[20].mxu1 }
 0x8cd   : > { %1674 = vrot.lane.b32.xlu1 %v1659_v28, %s3368_s0  ;;  %v3062_v29 = vpop.f32.mrb[21].mxu1 }
 0x8ce   : > { %v1662_v30 = vpop.f32.mrb[22].mxu1 }
 0x8cf   : > { %v3063_v31 = vpop.f32.mrb[23].mxu1 }
 0x90c   : > { %v1667_v32 = vpop.permute.xlu1 %1666 }
 0x90d   : > { %v1677_v34 = vsel %vm1191_vm4, %v1306_v5, %v1667_v32  ;;  %v3254_v5 = vld [vmem:[%s4129_s9 + $0x38] sm:$0xff]  }
 0x914   : > { %v1671_v33 = vpop.permute.xlu0 %1670 }
 0x915   : > { %v1678_v35 = vsel %vm1203_vm5, %v1677_v34, %v1671_v33 }
 0x93f   : > { %v1675_v36 = vpop.permute.xlu1 %1674 }
 0x940   : > { %v1680_v37 = vsel %vm1679_vm8, %v1678_v35, %v1675_v36 }
 0x941   : > { %v1681_v38 = vpack.c.bf16 %v1680_v37, %v1680_v37 }
 0x943   : > { %3081 = vmatmul.mubr.bf16.vlgmr.msra.gmra.mrb[24].mxu0 %v1681_v38 }
 0x944   : > { %3120 = vmatprep.mubr.msk.bf16.mxu0 %vm3364_vm1, %v3363_v25  ;;  %3105 = vmatpush3.bf16.msra.mxu0 %v3241_v48  ;;  %v2059_v48 = vrot.slane %v2053_v47, %v3583_v52 }
 0x945   : > { %3106 = vmatprep.subr.bf16.mxu0 %v3363_v25 }
 0x948   : > { %3107 = vmatpush3.bf16.msra.mxu0 %v3243_v49  ;;  %v2078_v49 = vsub.s32 3, %v3580_v51 }
 0x949   : > { %3108 = vmatprep.subr.bf16.mxu0 %v3363_v25 }
 0x94c   : > { %3109 = vmatpush3.bf16.msra.mxu0 %v3245_v58 }
 0x94d   : > { %3110 = vmatprep.subr.bf16.mxu0 %v3363_v25 }
 0x950   : > { %3111 = vmatpush3.bf16.msra.mxu0 %v3247_v60  ;;  %v2092_v60 = vsub.s32 5, %v3580_v51 }
 0x951   : > { %3112 = vmatprep.subr.bf16.mxu0 %v3363_v25 }
 0x954   : > { %3113 = vmatpush3.bf16.msra.mxu0 %v3249_v62 }
 0x955   : > { %3114 = vmatprep.subr.bf16.mxu0 %v3363_v25 }
 0x958   : > { %3115 = vmatpush3.bf16.msra.mxu0 %v3251_v1 }
 0x959   : > { %3116 = vmatprep.subr.bf16.mxu0 %v3363_v25 }
 0x95c   : > { %3117 = vmatpush3.bf16.msra.mxu0 %v3253_v3 }
 0x95d   : > { %3118 = vmatprep.subr.bf16.mxu0 %v3363_v25 }
 0x960   : > { %3119 = vmatpush3.bf16.msra.mxu0 %v3255_v6 }
 0xa16   : > { %v1785_v40 = vpop.f32.mrb[24].mxu0 }
 0xa17   : > { %v1786_v41 = vadd.f32 %v2809_v39, %v1785_v40  ;;  %v3082_v42 = vpop.f32.mrb[25].mxu0 }
 0xa18   : > { %v1788_v43 = vpop.f32.mrb[26].mxu0 }
 0xa19   : > { %v3848_v44 = vadd.f32 %v1786_v41, %v3597_v21  ;;  %v3083_v45 = vpop.f32.mrb[27].mxu0  ;;  %v3242_v21 = vld [vmem:[%s4129_s9 + $0x8] sm:$0xff]  }
 0xa1a   : > { %3087 = vmatpush3.bf16.msra.mxu1 %v3242_v21  ;;  %v2065_v21 = vrot.slane %v2053_v47, %v3589_v54 }
 0xa1b   : > { %v1794_v46 = vsel %vm521_vm0, %v3848_v44, 0.0  ;;  %3088 = vmatprep.subr.bf16.mxu1 %v3363_v25 }
 0xa1c   : > { %1795 = vadd.xlane.f32.xlu0 %v1794_v46 }
 0xa1e   : > { %3089 = vmatpush3.bf16.msra.mxu1 %v3244_v57 }
 0xa1f   : > { %3090 = vmatprep.subr.bf16.mxu1 %v3363_v25 }
 0xa22   : > { %3091 = vmatpush3.bf16.msra.mxu1 %v3246_v59  ;;  %v2079_v59 = vrot.slane %v2053_v47, %v2078_v49 }
 0xa23   : > { %3092 = vmatprep.subr.bf16.mxu1 %v3363_v25 }
 0xa26   : > { %3093 = vmatpush3.bf16.msra.mxu1 %v3248_v61 }
 0xa27   : > { %3094 = vmatprep.subr.bf16.mxu1 %v3363_v25 }
 0xa2a   : > { %3095 = vmatpush3.bf16.msra.mxu1 %v3250_v63 }
 0xa2b   : > { %3096 = vmatprep.subr.bf16.mxu1 %v3363_v25 }
 0xa2e   : > { %3097 = vmatpush3.bf16.msra.mxu1 %v3252_v2  ;;  %v2099_v2 = vsub.s32 6, %v3580_v51 }
 0xa2f   : > { %3098 = vmatprep.subr.bf16.mxu1 %v3363_v25 }
 0xa32   : > { %3099 = vmatpush3.bf16.msra.mxu1 %v3254_v5 }
 0xa33   : > { %3124 = vmatprep.subr.bf16.mxu1 %v3363_v25 }
 0xaa9   : > { %v1796_v50 = vpop.xlane.xlu0 %1795 }
 0xaaa   : > { %v1797_v53 = vmul.f32 0.0078125, %v1796_v50  ;;  %v2072_v50 = vrot.slane %v2053_v47, %v3710_v4 }
 0xaac   : > { %v1798_v26 = vsub.f32 %v3848_v44, %v1797_v53  ;;  %v2085_v53 = vsub.s32 4, %v3580_v51 }
 0xaae   : > { %v1799_v55 = vmul.f32 %v1798_v26, %v1798_v26  ;;  %v2086_v1 = vrot.slane %v2053_v47, %v2085_v53 }
 0xab0   : > { %v1800_v56 = vsel %vm521_vm0, %v1799_v55, 0.0 }
 0xab1   : > { %1801 = vadd.xlane.f32.xlu1 %v1800_v56 }
 0xb3e   : > { %v1802_v7 = vpop.xlane.xlu1 %1801 }
 0xb3f   : > { %v1803_v8 = vmul.f32 0.0078125, %v1802_v7  ;;  %v2093_v7 = vrot.slane %v2053_v47, %v2092_v60 }
 0xb41   : > { %v1804_v9 = vadd.f32 1e-05, %v1803_v8  ;;  %v2106_v8 = vsub.s32 7, %v3580_v51 }
 0xb43   : > { %3332 = vrsqrt.f32 %v1804_v9 }
 0xb4d   : > { %v3333_v0 = vpop.eup %3332 }
 0xb4e   : > { %v1806_v11 = vmul.f32 %v3333_v0, %v1798_v26 }
 0xb50   : > { %v1811_v13 = vmul.f32 %v2818_v10, %v1806_v11  ;;  %v2100_v11 = vrot.slane %v2053_v47, %v2099_v2 }
 0xb52   : > { %v1816_v14 = vadd.f32 %v2819_v12, %v1811_v13  ;;  %v2054_v12 = vld [vmem:[%s4131_s11 + $0x8] sm:$0x7f] }
 0xb54   : > { %v1817_v15 = vpack.c.bf16 %v1816_v14, %v1816_v14 }
 0xb56   : > { %3101 = vmatmul.mubr.bf16.vlgmr.msra.gmra.mrb[24].mxu1 %v1817_v15  ;;  %3121 = vmatmul.mubr.bf16.vlgmr.msra.gmra.mrb[28].mxu0 %v1817_v15 }
 0xb57   : > { %3140 = vmatprep.mubr.msk.bf16.mxu1 %vm3364_vm1, %v3363_v25  ;;  %2449 = vmatprep.mubr.bf16.mxu0 %v3362_v18  ;;  %v3259_v18 = vld [vmem:[%s4132_s12 + $0x18] sm:$0xff]  }
 0xb58   : > { %3125 = vmatpush3.bf16.msra.mxu1 %v3256_v16  ;;  %v2107_v16 = vrot.slane %v2053_v47, %v2106_v8  ;;  %v3266_v8 = vld [vmem:[%s4134_s14 + $0x4] ss:$8 sps:$4 sm:$0xff]  }
 0xb59   : > { %3126 = vmatprep.subr.bf16.mxu1 %v3363_v25  ;;  %2417 = vmatprep.subr.bf16.mxu0 %v3266_v8 }
 0xb5c   : > { %3127 = vmatpush3.bf16.msra.mxu1 %v3257_v17 }
 0xb5d   : > { %3128 = vmatprep.subr.bf16.mxu1 %v3363_v25 }
 0xb60   : > { %3129 = vmatpush3.bf16.msra.mxu1 %v3258_v19 }
 0xb61   : > { %3130 = vmatprep.subr.bf16.mxu1 %v3363_v25 }
 0xb64   : > { %3131 = vmatpush3.bf16.msra.mxu1 %v3259_v18 }
 0xb65   : > { %3132 = vmatprep.subr.bf16.mxu1 %v3363_v25 }
 0xb68   : > { %3133 = vmatpush3.bf16.msra.mxu1 %v3260_v20  ;;  %v2114_v20 = vrot.slane %v2054_v12, %v3583_v52 }
 0xb69   : > { %3134 = vmatprep.subr.bf16.mxu1 %v3363_v25 }
 0xb6c   : > { %3135 = vmatpush3.bf16.msra.mxu1 %v3261_v22 }
 0xb6d   : > { %3136 = vmatprep.subr.bf16.mxu1 %v3363_v25 }
 0xb70   : > { %3137 = vmatpush3.bf16.msra.mxu1 %v3262_v23 }
 0xb71   : > { %3138 = vmatprep.subr.bf16.mxu1 %v3363_v25  ;;  %v2820_v25 = vld [vmem:[%s4121_s1 + $0xa] ss:$0 sm:$0xff] }
 0xb74   : > { %3139 = vmatpush3.bf16.msra.mxu1 %v3263_v24  ;;  %v2121_v24 = vrot.slane %v2054_v12, %v3589_v54 }
 0xc29   : > { %v1921_v28 = vpop.f32.mrb[24].mxu1  ;;  %v2030_v29 = vpop.f32.mrb[28].mxu0 }
 0xc2a   : > { %v2031_v30 = vadd.f32 %v2829_v27, %v2030_v29  ;;  %v3102_v31 = vpop.f32.mrb[25].mxu1  ;;  %v3122_v32 = vpop.f32.mrb[29].mxu0  ;;  %v1922_v40 = vadd.f32 %v2820_v25, %v1921_v28  ;;  %v2128_v28 = vrot.slane %v2054_v12, %v3710_v4 }
 0xc2b   : > { %v1924_v33 = vpop.f32.mrb[26].mxu1  ;;  %v2033_v34 = vpop.f32.mrb[30].mxu0 }
 0xc2c   : > { %v2838_v35 = vmul.f32 -1.442695, %v2031_v30  ;;  %v3103_v36 = vpop.f32.mrb[27].mxu1  ;;  %v3123_v37 = vpop.f32.mrb[31].mxu0  ;;  %v2135_v34 = vrot.slane %v2054_v12, %v2078_v49  ;;  %v2839_v49 = vld [vmem:[%s4121_s1 + $0xc] ss:$0 sm:$0xff] }
 0xc2e   : > { %3334 = vpow2.f32 %v2838_v35 }
 0xc38   : > { %v3335_v38 = vpop.eup %3334 }
 0xc39   : > { %v2039_v39 = vadd.f32 1.0, %v3335_v38  ;;  %v2142_v38 = vrot.slane %v2054_v12, %v2085_v53 }
 0xc3b   : > { %3336 = vrcp.f32 %v2039_v39 }
 0xc45   : > { %v3337_v41 = vpop.eup %3336 }
 0xc46   : > { %v2042_v42 = vmul.f32 %v3337_v41, %v1922_v40  ;;  %v2149_v41 = vrot.slane %v2054_v12, %v2092_v60 }
 0xc48   : > { %v2044_v43 = vrot.slane %v2042_v42, 1 }
 0xc4a   : > { %v2047_v45 = vsel %vm2046_vm9, 0.0, %v2044_v43  ;;  %v2049_v46 = vsel %vm2048_vm10, %v2044_v43, 0.0 }
 0xc4b   : > { %2050 = vst [vmem:[#allocation2] sm:$0xff] %v2047_v45  ;;  %2051 = vst [vmem:[#allocation2 + $0x8] sm:$0xff] %v2049_v46  ;;  %v2156_v46 = vrot.slane %v2054_v12, %v2099_v2 }
 0xc52   : > { %v2055_v26 = vld [vmem:[#allocation2] sm:$0x1f]  ;;  %v2089_v9 = vld [vmem:[#allocation2 + $0x5] sm:$0x1f]  ;;  %v2124_v31 = vld [vmem:[#allocation2 + $0xa] sm:$0x1f] }
 0xc53   : > { %v2061_v55 = vld [vmem:[#allocation2 + $0x1] sm:$0x1f]  ;;  %v2060_v57 = vmul.f32 %v2059_v48, %v2055_v26  ;;  %v2096_v13 = vld [vmem:[#allocation2 + $0x6] sm:$0x1f]  ;;  %v2094_v15 = vmul.f32 %v2093_v7, %v2089_v9  ;;  %v2131_v35 = vld [vmem:[#allocation2 + $0xb] sm:$0x1f]  ;;  %v2129_v37 = vmul.f32 %v2128_v28, %v2124_v31 }
 0xc54   : > { %v2068_v56 = vld [vmem:[#allocation2 + $0x2] sm:$0x1f]  ;;  %v2066_v58 = vmul.f32 %v2065_v21, %v2061_v55  ;;  %v2103_v17 = vld [vmem:[#allocation2 + $0x7] sm:$0x1f]  ;;  %v2101_v18 = vmul.f32 %v2100_v11, %v2096_v13  ;;  %v2138_v39 = vld [vmem:[#allocation2 + $0xc] sm:$0x1f]  ;;  %v2136_v40 = vmul.f32 %v2135_v34, %v2131_v35 }
 0xc55   : > { %v2075_v61 = vld [vmem:[#allocation2 + $0x3] sm:$0x1f]  ;;  %v2073_v63 = vmul.f32 %v2072_v50, %v2068_v56  ;;  %v2110_v22 = vld [vmem:[#allocation2 + $0x8] sm:$0x1f]  ;;  %v2108_v51 = vmul.f32 %v2107_v16, %v2103_v17  ;;  %v2145_v42 = vld [vmem:[#allocation2 + $0xd] sm:$0x1f]  ;;  %v2143_v45 = vmul.f32 %v2142_v38, %v2138_v39 }
 0xc56   : > { %v2067_v62 = vadd.f32 %v2066_v58, %v2060_v57  ;;  %v2082_v3 = vld [vmem:[#allocation2 + $0x4] sm:$0x1f]  ;;  %v2080_v6 = vmul.f32 %v2079_v59, %v2075_v61  ;;  %v2117_v27 = vld [vmem:[#allocation2 + $0x9] sm:$0x1f]  ;;  %v2115_v30 = vmul.f32 %v2114_v20, %v2110_v22  ;;  %v2152_v47 = vld [vmem:[#allocation2 + $0xe] sm:$0x1f]  ;;  %v2150_v48 = vmul.f32 %v2149_v41, %v2145_v42 }
 0xc57   : > { %v2087_v10 = vmul.f32 %v2086_v1, %v2082_v3  ;;  %v2122_v33 = vmul.f32 %v2121_v24, %v2117_v27  ;;  %v2157_v50 = vmul.f32 %v2156_v46, %v2152_v47  ;;  %v2841_v61 = vld [vmem:[%s4121_s1 + $0xd] ss:$0 sm:$0xff]  ;;  %v3264_v7 = vld [vmem:[%s4134_s14] ss:$8 sps:$4 sm:$0xff]   ;;  %v3269_v9 = vld [vmem:[%s4134_s14 + $0x14] ss:$8 sps:$4 sm:$0xff]  }
 0xc58   : > { %v2074_v5 = vadd.f32 %v2073_v63, %v2067_v62  ;;  %2418 = vmatpush1.bf16.msra.mxu0 %v3264_v7  ;;  %v3273_v16 = vld [vmem:[%s4134_s14 + $0x30] ss:$8 sps:$4 sm:$0xff]   ;;  %v3275_v17 = vld [vmem:[%s4134_s14 + $0x34] ss:$8 sps:$4 sm:$0xff]   ;;  %v2851_v34 = vld [vmem:[%s4121_s1 + $0xf] ss:$0 sm:$0xff] }
 0xc59   : > { %2419 = vmatprep.subr.bf16.mxu0 %v3269_v9  ;;  %v3281_v20 = vld [vmem:[%s4134_s14 + $0x54] ss:$8 sps:$4 sm:$0xff]   ;;  %v3279_v22 = vld [vmem:[%s4134_s14 + $0x50] ss:$8 sps:$4 sm:$0xff]   ;;  %v3288_v38 = vld [vmem:[%s4135_s15 + $0x40] sm:$0xff]  }
 0xc5a   : > { %v2081_v0 = vadd.f32 %v2080_v6, %v2074_v5  ;;  %v3287_v24 = vld [vmem:[%s4134_s14 + $0x74] ss:$8 sps:$4 sm:$0xff]   ;;  %v3285_v27 = vld [vmem:[%s4134_s14 + $0x70] ss:$8 sps:$4 sm:$0xff]   ;;  %v3289_v39 = vld [vmem:[%s4135_s15] sm:$0xff]   ;;  %2974 = vmatprep.subr.bf16.mxu1 %v3288_v38 }
 0xc5b   : > { %v3292_v41 = vld [vmem:[%s4135_s15 + $0x50] sm:$0xff]   ;;  %v3296_v46 = vld [vmem:[%s4135_s15 + $0x60] sm:$0xff]  }
 0xc5c   : > { %v2088_v14 = vadd.f32 %v2087_v10, %v2081_v0  ;;  %v3272_v0 = vld [vmem:[%s4134_s14 + $0x24] ss:$8 sps:$4 sm:$0xff]   ;;  %v3270_v10 = vld [vmem:[%s4134_s14 + $0x20] ss:$8 sps:$4 sm:$0xff]   ;;  %v3293_v42 = vld [vmem:[%s4135_s15 + $0x10] sm:$0xff]  }
 0xc5d   : > { %v3297_v47 = vld [vmem:[%s4135_s15 + $0x20] sm:$0xff]  }
 0xc5e   : > { %v2095_v19 = vadd.f32 %v2094_v15, %v2088_v14 }
 0xc60   : > { %v2102_v23 = vadd.f32 %v2101_v18, %v2095_v19  ;;  %v3278_v19 = vld [vmem:[%s4134_s14 + $0x44] ss:$8 sps:$4 sm:$0xff]   ;;  %v3276_v18 = vld [vmem:[%s4134_s14 + $0x40] ss:$8 sps:$4 sm:$0xff]  }
 0xc62   : > { %v2109_v29 = vadd.f32 %v2108_v51, %v2102_v23  ;;  %v3284_v23 = vld [vmem:[%s4134_s14 + $0x64] ss:$8 sps:$4 sm:$0xff]   ;;  %v3282_v51 = vld [vmem:[%s4134_s14 + $0x60] ss:$8 sps:$4 sm:$0xff]  }
 0xc64   : > { %v2116_v32 = vadd.f32 %v2115_v30, %v2109_v29 }
 0xc66   : > { %v2123_v36 = vadd.f32 %v2122_v33, %v2116_v32  ;;  %v2850_v32 = vld [vmem:[%s4121_s1 + $0xe] ss:$0 sm:$0xff] }
 0xc68   : > { %v2130_v25 = vadd.f32 %v2129_v37, %v2123_v36 }
 0xc6a   : > { %v2137_v43 = vadd.f32 %v2136_v40, %v2130_v25  ;;  %v3290_v25 = vld [vmem:[%s4135_s15 + $0x48] sm:$0xff]  }
 0xc6b   : > { %v3291_v40 = vld [vmem:[%s4135_s15 + $0x8] sm:$0xff]  }
 0xc6c   : > { %v2144_v4 = vadd.f32 %v2143_v45, %v2137_v43  ;;  %v3294_v43 = vld [vmem:[%s4135_s15 + $0x58] sm:$0xff]  }
 0xc6d   : > { %v3295_v45 = vld [vmem:[%s4135_s15 + $0x18] sm:$0xff]  }
 0xc6e   : > { %v2151_v21 = vadd.f32 %v2150_v48, %v2144_v4  ;;  %v3298_v4 = vld [vmem:[%s4135_s15 + $0x68] sm:$0xff]  }
 0xc6f   : > { %v3299_v48 = vld [vmem:[%s4135_s15 + $0x28] sm:$0xff]  }
 0xc70   : > { %v2158_v26 = vadd.f32 %v2157_v50, %v2151_v21  ;;  %v3300_v21 = vld [vmem:[%s4135_s15 + $0x70] sm:$0xff]  }
 0xc71   : > { %v3301_v50 = vld [vmem:[%s4135_s15 + $0x30] sm:$0xff]  }
 0xc72   : > { %v2164_v55 = vadd.f32 %v2839_v49, %v2158_v26  ;;  %v3302_v49 = vld [vmem:[%s4135_s15 + $0x78] sm:$0xff]  }
 0xc73   : > { %v3303_v26 = vld [vmem:[%s4135_s15 + $0x38] sm:$0xff]  }
 0xc74   : > { %v2840_v53 = vmul.f32 -1.442695, %v2164_v55 }
 0xc76   : > { %3338 = vpow2.f32 %v2840_v53 }
 0xc80   : > { %v3339_v56 = vpop.eup %3338 }
 0xc81   : > { %v2168_v57 = vadd.f32 1.0, %v3339_v56 }
 0xc83   : > { %3340 = vrcp.f32 %v2168_v57 }
 0xc8d   : > { %v3341_v58 = vpop.eup %3340 }
 0xc8e   : > { %v2171_v59 = vmul.f32 %v3341_v58, %v2164_v55  ;;  %v2325_v55 = vld [vmem:[%s4133_s13] sm:$0x3] }
 0xc8f   : > { %v2330_v53 = vrot.slane %v2325_v55, %v3583_v52  ;;  %v2334_v56 = vrot.slane %v2325_v55, %v3589_v54 }
 0xc90   : > { %v2172_v60 = vpack.c.bf16 %v2171_v59, %v2171_v59 }
 0xc92   : > { %3141 = vmatmul.mubr.bf16.vlgmr.msra.gmra.mrb[28].mxu1 %v2172_v60 }
 0xc93   : > { %2975 = vmatpush3.bf16.msra.mxu1 %v3289_v39 }
 0xc94   : > { %2976 = vmatprep.subr.bf16.mxu1 %v3290_v25 }
 0xc97   : > { %2977 = vmatpush3.bf16.msra.mxu1 %v3291_v40 }
 0xc98   : > { %2978 = vmatprep.subr.bf16.mxu1 %v3292_v41 }
 0xc9b   : > { %2979 = vmatpush3.bf16.msra.mxu1 %v3293_v42 }
 0xc9c   : > { %2980 = vmatprep.subr.bf16.mxu1 %v3294_v43 }
 0xc9f   : > { %2981 = vmatpush3.bf16.msra.mxu1 %v3295_v45 }
 0xca0   : > { %2982 = vmatprep.subr.bf16.mxu1 %v3296_v46 }
 0xca3   : > { %2983 = vmatpush3.bf16.msra.mxu1 %v3297_v47 }
 0xca4   : > { %2984 = vmatprep.subr.bf16.mxu1 %v3298_v4 }
 0xca7   : > { %2985 = vmatpush3.bf16.msra.mxu1 %v3299_v48 }
 0xca8   : > { %2986 = vmatprep.subr.bf16.mxu1 %v3300_v21 }
 0xcab   : > { %2987 = vmatpush3.bf16.msra.mxu1 %v3301_v50 }
 0xcac   : > { %2988 = vmatprep.subr.bf16.mxu1 %v3302_v49 }
 0xcaf   : > { %2989 = vmatpush3.bf16.msra.mxu1 %v3303_v26 }
 0xd65   : > { %v2276_v62 = vpop.f32.mrb[28].mxu1 }
 0xd66   : > { %v2277_v63 = vadd.f32 %v2841_v61, %v2276_v62  ;;  %v3142_v1 = vpop.f32.mrb[29].mxu1 }
 0xd67   : > { %v2279_v2 = vpop.f32.mrb[30].mxu1 }
 0xd68   : > { %v3987_v3 = vadd.f32 %v2277_v63, %v3848_v44  ;;  %v3143_v5 = vpop.f32.mrb[31].mxu1  ;;  %v3267_v44 = vld [vmem:[%s4134_s14 + $0x10] ss:$8 sps:$4 sm:$0xff]  }
 0xd69   : > { %2420 = vmatpush1.bf16.msra.mxu0 %v3267_v44 }
 0xd6a   : > { %v2285_v6 = vsel %vm521_vm0, %v3987_v3, 0.0  ;;  %2421 = vmatprep.subr.bf16.mxu0 %v3272_v0 }
 0xd6b   : > { %2286 = vadd.xlane.f32.xlu0 %v2285_v6 }
 0xd6d   : > { %2422 = vmatpush1.bf16.msra.mxu0 %v3270_v10 }
 0xd6e   : > { %2423 = vmatprep.subr.bf16.mxu0 %v3275_v17 }
 0xd71   : > { %2424 = vmatpush1.bf16.msra.mxu0 %v3273_v16 }
 0xd72   : > { %2425 = vmatprep.subr.bf16.mxu0 %v3278_v19 }
 0xd75   : > { %2426 = vmatpush1.bf16.msra.mxu0 %v3276_v18 }
 0xd76   : > { %2427 = vmatprep.subr.bf16.mxu0 %v3281_v20 }
 0xd79   : > { %2428 = vmatpush1.bf16.msra.mxu0 %v3279_v22 }
 0xd7a   : > { %2429 = vmatprep.subr.bf16.mxu0 %v3284_v23 }
 0xd7d   : > { %2430 = vmatpush1.bf16.msra.mxu0 %v3282_v51 }
 0xd7e   : > { %2431 = vmatprep.subr.bf16.mxu0 %v3287_v24 }
 0xd81   : > { %2432 = vmatpush1.bf16.msra.mxu0 %v3285_v27 }
 0xdf8   : > { %v2287_v11 = vpop.xlane.xlu0 %2286 }
 0xdf9   : > { %v2288_v12 = vmul.f32 0.0078125, %v2287_v11  ;;  %v2870_v11 = vld [vmem:[%s4121_s1 + $0x10] ss:$0 sm:$0xff] }
 0xdfb   : > { %v2289_v13 = vsub.f32 %v3987_v3, %v2288_v12 }
 0xdfd   : > { %v2290_v14 = vmul.f32 %v2289_v13, %v2289_v13 }
 0xdff   : > { %v2291_v15 = vsel %vm521_vm0, %v2290_v14, 0.0 }
 0xe00   : > { %2292 = vadd.xlane.f32.xlu0 %v2291_v15 }
 0xe8d   : > { %v2293_v28 = vpop.xlane.xlu0 %2292 }
 0xe8e   : > { %v2294_v29 = vmul.f32 0.0078125, %v2293_v28 }
 0xe90   : > { %v2295_v30 = vadd.f32 1e-05, %v2294_v29 }
 0xe92   : > { %3342 = vrsqrt.f32 %v2295_v30 }
 0xe9c   : > { %v3343_v31 = vpop.eup %3342 }
 0xe9d   : > { %v2297_v33 = vmul.f32 %v3343_v31, %v2289_v13 }
 0xe9f   : > { %v2302_v35 = vmul.f32 %v2850_v32, %v2297_v33  ;;  %v2888_v32 = vld [vmem:[%s4121_s1 + $0x12] ss:$0 sm:$0xff] }
 0xea1   : > { %v2307_v36 = vadd.f32 %v2851_v34, %v2302_v35 }
 0xea3   : > { %v2308_v37 = vpack.c.bf16 %v2307_v36, %v2307_v36 }
 0xea5   : > { %2450 = vmatmul.mubr.bf16.vlgmr.msra.gmra.mrb[32].mxu0 %v2308_v37 }
 0xf78   : > { %v2451_v57 = vpop.f32.mrb[32].mxu0 }
 0xf79   : > { %v2452_v58 = vadd.f32 %v2451_v57, %v2330_v53  ;;  %v2453_v59 = vpop.f32.mrb[33].mxu0 }
 0xf7a   : > { %v2454_v60 = vadd.f32 %v2453_v59, %v2334_v56  ;;  %v2455_v61 = vpop.f32.mrb[34].mxu0 }
 0xf7b   : > { %v2868_v62 = vmul.f32 -1.442695, %v2452_v58  ;;  %v2456_v63 = vpop.f32.mrb[35].mxu0 }
 0xf7c   : > { %v2869_v1 = vmul.f32 -1.442695, %v2454_v60 }
 0xf7d   : > { %3344 = vpow2.f32 %v2868_v62 }
 0xf7e   : > { %3346 = vpow2.f32 %v2869_v1 }
 0xf87   : > { %v3345_v2 = vpop.eup %3344 }
 0xf88   : > { %v3347_v5 = vpop.eup %3346  ;;  %v2464_v6 = vadd.f32 1.0, %v3345_v2 }
 0xf89   : > { %v2465_v7 = vadd.f32 1.0, %v3347_v5 }
 0xf8a   : > { %3348 = vrcp.f32 %v2464_v6 }
 0xf8b   : > { %3350 = vrcp.f32 %v2465_v7 }
 0xf94   : > { %v3349_v8 = vpop.eup %3348 }
 0xf95   : > { %v3351_v52 = vpop.eup %3350  ;;  %v2470_v9 = vmul.f32 %v3349_v8, %v2452_v58 }
 0xf96   : > { %v2471_v54 = vmul.f32 %v3351_v52, %v2454_v60 }
 0xf97   : > { %v2472_v0 = vpack.c.bf16 %v2470_v9, %v2470_v9 }
 0xf98   : > { %v2473_v44 = vpack.c.bf16 %v2471_v54, %v2471_v54 }
 0xf9a   : > { %2639 = vmatprep.mubr.bf16.mxu1 %v2473_v44 }
 0xf9b   : > { %2640 = vmatmul.mubr.bf16.vlgmr.msra.gmra.mrb[32].mxu1 %v2472_v0 }
0x106e   : > { %v2990_v10 = vpop.f32.mrb[32].mxu1 }
0x106f   : > { %v2991_v12 = vpop.f32.mrb[33].mxu1 }
0x1070   : > { %v2992_v13 = vadd.f32 %v2991_v12, %v2990_v10  ;;  %v2993_v14 = vpop.f32.mrb[34].mxu1 }
0x1071   : > { %v2994_v15 = vpop.f32.mrb[35].mxu1 }
0x1072   : > { %v2642_v16 = vadd.f32 %v2992_v13, %v2870_v11 }
0x1074   : > { %v2647_v17 = vmul.f32 0.5, %v2642_v16 }
0x1076   : > { %v2648_v19 = vadd.f32 %v2647_v17, %v3987_v3  ;;  %v2887_v3 = vld [vmem:[%s4121_s1 + $0x11] ss:$0 sm:$0xff] }
0x1078   : > { %v2651_v18 = vsel %vm521_vm0, %v2648_v19, 0.0 }
0x1079   : > { %2652 = vadd.xlane.f32.xlu0 %v2651_v18 }
0x1106   : > { %v2653_v20 = vpop.xlane.xlu0 %2652 }
0x1107   : > { %v2654_v22 = vmul.f32 0.0078125, %v2653_v20 }
0x1109   : > { %v2655_v23 = vsub.f32 %v2648_v19, %v2654_v22 }
0x110b   : > { %v2656_v51 = vmul.f32 %v2655_v23, %v2655_v23 }
0x110d   : > { %v2657_v24 = vsel %vm521_vm0, %v2656_v51, 0.0 }
0x110e   : > { %2658 = vadd.xlane.f32.xlu1 %v2657_v24 }
0x119b   : > { %v2659_v27 = vpop.xlane.xlu1 %2658 }
0x119c   : > { %v2660_v28 = vmul.f32 0.0078125, %v2659_v27 }
0x119e   : > { %v2661_v29 = vadd.f32 1e-05, %v2660_v28 }
0x11a0   : > { %3352 = vrsqrt.f32 %v2661_v29 }
0x11aa   : > { %v3353_v30 = vpop.eup %3352 }
0x11ab   : > { %v2663_v31 = vmul.f32 %v3353_v30, %v2655_v23 }
0x11ad   : > { %v2668_v33 = vmul.f32 %v2887_v3, %v2663_v31 }
0x11af   : > { %v2673_v34 = vadd.f32 %v2888_v32, %v2668_v33 }
0x11b1   : > { %2674 = vst [vmem:[%s516_s25] sm:$0x1f] %v2673_v34 }
0x11b2 PF: > { %s26_s21 = sadd.s32 1, %s3360_s21  }
0x11b3   : > { %p23_p4 = scmp.ge.s32.totalorder %s26_s21, 4  }
0x11b5   :  { %25 = sbr.rel (!%p23_p4) target bundleno = 2 (0x2), region = 114 }

</bundles_post_ra>
